<compile_context>
chip_gen: v5e
topology: v5e:2x2
jax: 0.10.0
libtpu: 0.0.40
codegen_flags: <defaults>
</compile_context>

<pallas_src>
import math

import jax
import jax.numpy as jnp
from jax.experimental import pallas as pl
from jax.experimental.pallas import tpu as pltpu

# ----- synthetic MaskedDiff config dims (lane-dense: all channel dims = 128) -----
B = 2                  # batch
T = 512                # token frames (== feat frames after codebook collapse), multiple of T_TILE
NUM_CODEBOOKS = 4
VOCAB = 64             # synthetic vocab_size (real: 4096)
D_IN = 128             # input_size (real: 512) -- lane-dense toy width
H_ENC = 128            # encoder.output_size()
C_MEL = 128            # output_size (matches real decoder output_size=128)
H_EST = 128            # synthetic CFM-estimator hidden width
SIGMA_MIN = 1e-6       # cfm_params.sigma_min
TRAIN_CFG_RATE = 0.2   # cfm_params.training_cfg_rate
T_TILE = 256           # frames per grid step (pad T to a multiple of this at real sizes)


# ---------------------------------------------------------------------------
# Fused Pallas kernel: encoder+length_regulator MLP, CFM interpolation,
# synthetic estimator, and masked-L1 partial reduction — all in one pass.
#   h    = relu(tok_emb @ W_enc + b_enc) @ W_reg + b_reg
#   mu   = h * cfg_keep[b]                        (classifier-free-guidance dropout)
#   y    = (1 - (1 - sigma_min) t) z + t x1
#   u    = x1 - (1 - sigma_min) z
#   pred = gelu([y|mu] @ W1 + t*wt + b1) @ W2 + b2
#   partial[b] = sum_frames(|pred - u| * mask)     (reg_loss_type='l1' numerator)
# Grid = (B, T//T_TILE); batch axis is "parallel" (per-batch partials, independent
# accumulators), the frame-tile axis is the serial reduction axis.
# ---------------------------------------------------------------------------
def fused_flow_loss_kernel(
        feat_len_ref, t_ref, keep_ref,               # SMEM per-batch scalars (B,)
        tok_ref, x1_ref, z_ref,                      # (T_TILE, 128) bf16 activation tiles
        w_enc_ref, w_reg_ref, w1_ref, w2_ref,        # bf16 weights
        bias_ref,                                    # (8, 128) f32 packed bias/wt slab
        part_ref,                                    # (8, C_MEL) f32 per-batch output
        num_acc):                                    # (8, C_MEL) f32 scratch accumulator
    b = pl.program_id(0)
    tt = pl.program_id(1)
    nt = pl.num_programs(1)

    @pl.when(tt == 0)
    def _():
        num_acc[...] = jnp.zeros_like(num_acc)

    bias = bias_ref[...]                             # (8, 128) f32, one vreg
    b_enc = bias[0:1, :]
    b_reg = bias[1:2, :]
    wt = bias[2:3, :]
    b1 = bias[3:4, :]
    b2 = bias[4:5, :]

    # ---- encoder + length_regulator (token_len == feat_len, so the nearest-neighbor
    #      resample is identity; remaining compute is the channel projection) ----
    x = tok_ref[...]                                                      # bf16 (T_TILE, D_IN)
    h1 = jnp.dot(x, w_enc_ref[...], preferred_element_type=jnp.float32) + b_enc
    h1 = jnp.maximum(h1, 0.0)
    h = jnp.dot(h1.astype(jnp.bfloat16), w_reg_ref[...],
                preferred_element_type=jnp.float32) + b_reg               # f32 (T_TILE, C_MEL)

    # ---- CFM compute_loss ----
    t_b = t_ref[b]          # scalar f32 (per-batch time)
    keep_b = keep_ref[b]    # scalar f32 (CFG dropout of the condition mu)
    mu = h * keep_b

    x1 = x1_ref[...].astype(jnp.float32)
    z = z_ref[...].astype(jnp.float32)
    y = (1.0 - (1.0 - SIGMA_MIN) * t_b) * z + t_b * x1
    u = x1 - (1.0 - SIGMA_MIN) * z

    # fused K=256 estimator matmul: [y | mu] @ [w1y ; w1m]  (fills 256-wide MXU)
    ym = jnp.concatenate([y.astype(jnp.bfloat16), mu.astype(jnp.bfloat16)], axis=-1)
    hh = jnp.dot(ym, w1_ref[...], preferred_element_type=jnp.float32) + t_b * wt + b1
    hh = jax.nn.gelu(hh)
    pred = jnp.dot(hh.astype(jnp.bfloat16), w2_ref[...],
                   preferred_element_type=jnp.float32) + b2

    # frame mask built in-kernel: mask = ~make_pad_mask(feat_len), (T_TILE, 1) column only
    frame = tt * T_TILE + jax.lax.broadcasted_iota(jnp.int32, (T_TILE, 1), 0)
    mask = (frame < feat_len_ref[b]).astype(jnp.float32)
    err = jnp.abs(pred - u) * mask                                        # (T_TILE, C_MEL)

    # fold frames by 8-row strips in registers (pure VPU adds); single scratch RMW/step
    part = err[0:8, :]
    for r in range(1, T_TILE // 8):
        part = part + err[r * 8:(r + 1) * 8, :]
    num_acc[...] += part

    @pl.when(tt == nt - 1)
    def _():
        part_ref[...] = num_acc[...]


def fused_masked_diff_loss(tok_emb, x1_bf16, z_bf16, feat_len, t_b, cfg_keep, params):
    """tok_emb (B,T,D_IN) bf16, x1/z (B,T,C_MEL) bf16, feat_len (B,) i32,
    t_b/cfg_keep (B,) f32 -> (B, 8, C_MEL) f32 per-batch masked-|pred-u| partial sums."""
    assert T % T_TILE == 0, "pad T to a multiple of T_TILE at real sizes"
    nt = T // T_TILE

    smem = pl.BlockSpec(memory_space=pltpu.MemorySpace.SMEM)

    def full(shape):
        return pl.BlockSpec(shape, lambda b, tt: (0, 0))

    return pl.pallas_call(
        fused_flow_loss_kernel,
        out_shape=jax.ShapeDtypeStruct((B, 8, C_MEL), jnp.float32),
        grid=(B, nt),
        in_specs=[
            smem, smem, smem,                                               # feat_len, t, cfg_keep
            pl.BlockSpec((None, T_TILE, D_IN), lambda b, tt: (b, tt, 0)),   # tok_emb (bf16)
            pl.BlockSpec((None, T_TILE, C_MEL), lambda b, tt: (b, tt, 0)),  # x1 (feat, bf16)
            pl.BlockSpec((None, T_TILE, C_MEL), lambda b, tt: (b, tt, 0)),  # z (bf16)
            full((D_IN, H_ENC)),
            full((H_ENC, C_MEL)),
            full((2 * C_MEL, H_EST)),                                       # [w1y ; w1m]
            full((H_EST, C_MEL)),
            full((8, 128)),                                                 # packed bias slab
        ],
        out_specs=pl.BlockSpec((None, 8, C_MEL), lambda b, tt: (b, 0, 0)),
        scratch_shapes=[pltpu.VMEM((8, C_MEL), jnp.float32)],
        compiler_params=pltpu.CompilerParams(
            # batch axis carries independent per-batch accumulators -> safe to shard
            # across TensorCores (v7x); frame-tile axis is the serial reduction axis.
            dimension_semantics=("parallel", "arbitrary"),
            vmem_limit_bytes=16 * 1024 * 1024),
    )(feat_len, t_b, cfg_keep, tok_emb, x1_bf16, z_bf16,
      params["w_enc"], params["w_reg"], params["w1"], params["w2"],
      params["bias_slab"])


# ---------------------------------------------------------------------------
# Parameter init (deterministic, synthetic).  MXU-side weights stored in bf16;
# the five (1,128) bias / wt vectors are packed into one (8,128) f32 slab.
# ---------------------------------------------------------------------------
def init_params(key):
    ks = jax.random.split(key, 8)

    def nrm(k, shape, scale, dtype=jnp.bfloat16):
        return (scale * jax.random.normal(k, shape, jnp.float32)).astype(dtype)

    w1y = nrm(ks[4], (C_MEL, H_EST), 1.0 / math.sqrt(C_MEL))
    w1m = nrm(ks[5], (C_MEL, H_EST), 1.0 / math.sqrt(C_MEL))

    bias_slab = jnp.zeros((8, 128), jnp.float32)
    # rows: 0=b_enc, 1=b_reg, 2=wt (time embedding), 3=b1, 4=b2, 5-7 unused
    bias_slab = bias_slab.at[2].set(
        jax.random.normal(ks[6], (H_EST,), jnp.float32))

    return {
        # nn.Embedding(vocab_size, input_size) -- stored bf16 (gathered rows feed MXU)
        "input_embedding": nrm(ks[0], (VOCAB, D_IN), 0.02),
        # frozen VQVAE quantizer codebooks (quantizer.embed), f32
        "codebooks": nrm(ks[1], (NUM_CODEBOOKS, VOCAB, C_MEL), 0.02, jnp.float32),
        # synthetic encoder + length_regulator
        "w_enc": nrm(ks[2], (D_IN, H_ENC), 1.0 / math.sqrt(D_IN)),
        "w_reg": nrm(ks[3], (H_ENC, C_MEL), 1.0 / math.sqrt(H_ENC)),
        # synthetic CFM estimator; first-layer weights stacked for the K=256 fused matmul
        "w1": jnp.concatenate([w1y, w1m], axis=0),                  # (256, H_EST) bf16
        "w2": nrm(ks[7], (H_EST, C_MEL), 1.0 / math.sqrt(H_EST)),
        "bias_slab": bias_slab,
    }


# ---------------------------------------------------------------------------
# MaskedDiff.forward glue: reshape / embedding gathers / RNG sampling in plain JAX,
# everything else (encoder MLP, flow interpolation, estimator, masked loss numerator)
# in the single fused Pallas kernel.  Final sum + divide done in JAX so the kernel's
# batch axis can stay "parallel".
# ---------------------------------------------------------------------------
def masked_diff_forward(params, batch, key):
    audio_token = batch["acoustic_token"]               # (B, T*K) int32
    audio_token_len = batch["acoustic_token_len"]       # (B,) int32
    audio_token = audio_token.reshape(audio_token.shape[0], -1, NUM_CODEBOOKS)

    # 'semantic_token' not in batch branch
    token = audio_token[:, :, 0]                         # (B, T)
    feat_len = (audio_token_len // NUM_CODEBOOKS).astype(jnp.int32)   # == token_len

    # quantizer.embed(audio_token) (frozen, no grad) -> (B, T, C_MEL)
    # TODO(synk): at real sizes, fold these gathers into the Pallas pipeline via
    # PrefetchScalarGridSpec + pl.Element row gather instead of XLA takes.
    cb = params["codebooks"]
    feat = jnp.zeros((B, T, C_MEL), jnp.float32)
    for k in range(NUM_CODEBOOKS):
        feat = feat + jnp.take(cb[k], audio_token[:, :, k], axis=0)

    # token = self.input_embedding(token)  (bf16 rows, feed MXU directly)
    tok_emb = jnp.take(params["input_embedding"], token, axis=0)       # (B, T, D_IN) bf16

    # self.cond is None -> conds = None; self.interpolate is False.

    # CFM sampling glue: t ~ U(0,1) with cosine schedule, z ~ N(0,1), CFG dropout of mu
    k_t, k_z, k_cfg = jax.random.split(key, 3)
    t_b = jax.random.uniform(k_t, (B,), jnp.float32)
    t_b = 1.0 - jnp.cos(t_b * 0.5 * jnp.pi)              # t_scheduler='cosine'
    z = jax.random.normal(k_z, (B, T, C_MEL), jnp.float32)
    cfg_keep = (jax.random.uniform(k_cfg, (B,)) > TRAIN_CFG_RATE).astype(jnp.float32)

    # stream the two dominant activations (x1=feat, z) into the kernel as bf16
    partials = fused_masked_diff_loss(
        tok_emb, feat.astype(jnp.bfloat16), z.astype(jnp.bfloat16),
        feat_len, t_b, cfg_keep, params)

    # loss = sum(|pred - u| * mask) / (sum(mask) * C_MEL)   (reg_loss_type='l1')
    denom = jnp.maximum(
        jnp.sum(jnp.minimum(feat_len, T)).astype(jnp.float32), 1.0) * C_MEL
    loss = jnp.sum(partials) / denom
    return {"loss": loss}


if __name__ == "__main__":
    key = jax.random.PRNGKey(0)
    k_param, k_tok, k_fwd = jax.random.split(key, 3)

    params = init_params(k_param)

    acoustic_token = jax.random.randint(
        k_tok, (B, T * NUM_CODEBOOKS), 0, VOCAB, dtype=jnp.int32)
    acoustic_token_len = jnp.array(
        [T * NUM_CODEBOOKS, 300 * NUM_CODEBOOKS], dtype=jnp.int32)
    batch = {"acoustic_token": acoustic_token,
             "acoustic_token_len": acoustic_token_len}

    out = masked_diff_forward(params, batch, k_fwd)
    loss = jax.block_until_ready(out["loss"])
    assert bool(jnp.isfinite(loss)), "loss is not finite"
    print("KERNEL_OK")
</pallas_src>

<mosaic_0001>
module attributes {stable_mosaic.version = 11 : i64} {
  func.func @fused_flow_loss_kernel(%arg0: i32, %arg1: i32, %arg2: memref<2xi32, #tpu.memory_space<smem>>, %arg3: memref<2xf32, #tpu.memory_space<smem>>, %arg4: memref<2xf32, #tpu.memory_space<smem>>, %arg5: memref<1x256x128xbf16, #tpu.memory_space<vmem>>, %arg6: memref<1x256x128xbf16, #tpu.memory_space<vmem>>, %arg7: memref<1x256x128xbf16, #tpu.memory_space<vmem>>, %arg8: memref<128x128xbf16, #tpu.memory_space<vmem>>, %arg9: memref<128x128xbf16, #tpu.memory_space<vmem>>, %arg10: memref<256x128xbf16, #tpu.memory_space<vmem>>, %arg11: memref<128x128xbf16, #tpu.memory_space<vmem>>, %arg12: memref<8x128xf32, #tpu.memory_space<vmem>>, %arg13: memref<1x8x128xf32, #tpu.memory_space<vmem>>, %arg14: memref<8x128xf32, #tpu.memory_space<vmem>>) attributes {dimension_semantics = [#tpu.dimension_semantics<parallel>, #tpu.dimension_semantics<arbitrary>], iteration_bounds = array<i64: 2, 2>, scalar_prefetch = 0 : i64, scratch_operands = 1 : i64, tpu.core_type = #tpu.core_type<tc>, window_params = [{transform_indices = @transform_0, window_bounds = array<i64: 2>}, {transform_indices = @transform_1, window_bounds = array<i64: 2>}, {transform_indices = @transform_2, window_bounds = array<i64: 2>}, {transform_indices = @transform_3, window_bounds = array<i64: 1, 256, 128>}, {transform_indices = @transform_4, window_bounds = array<i64: 1, 256, 128>}, {transform_indices = @transform_5, window_bounds = array<i64: 1, 256, 128>}, {pipeline_mode = #tpu.pipeline_mode<synchronous>, transform_indices = @transform_6, window_bounds = array<i64: 128, 128>}, {pipeline_mode = #tpu.pipeline_mode<synchronous>, transform_indices = @transform_7, window_bounds = array<i64: 128, 128>}, {pipeline_mode = #tpu.pipeline_mode<synchronous>, transform_indices = @transform_8, window_bounds = array<i64: 256, 128>}, {pipeline_mode = #tpu.pipeline_mode<synchronous>, transform_indices = @transform_9, window_bounds = array<i64: 128, 128>}, {pipeline_mode = #tpu.pipeline_mode<synchronous>, transform_indices = @transform_10, window_bounds = array<i64: 8, 128>}, {transform_indices = @transform_11, window_bounds = array<i64: 1, 8, 128>}]} {
    %c0_i32 = arith.constant 0 : i32
    %0 = arith.cmpi eq, %arg1, %c0_i32 : i32
    %1 = arith.extui %0 : i1 to i32
    %c0_i32_0 = arith.constant 0 : i32
    %2 = arith.cmpi ne, %1, %c0_i32_0 : i32
    scf.if %2 {
      %cst_35 = arith.constant 0.000000e+00 : f32
      %156 = vector.broadcast %cst_35 : f32 to vector<8x128xf32>
      %c0_36 = arith.constant 0 : index
      %c0_37 = arith.constant 0 : index
      %157 = vector.load %arg14[%c0_36, %c0_37] : memref<8x128xf32, #tpu.memory_space<vmem>>, vector<8x128xf32>
      tpu.vector_store %arg14[%c0_36, %c0_37], %156 {strides = array<i32>} : memref<8x128xf32, #tpu.memory_space<vmem>>, vector<8x128xf32>,
    } else {
    }
    %c0 = arith.constant 0 : index
    %c0_1 = arith.constant 0 : index
    %3 = vector.load %arg12[%c0, %c0_1] : memref<8x128xf32, #tpu.memory_space<vmem>>, vector<8x128xf32>
    %4 = vector.extract_strided_slice %3 {offsets = [0, 0], sizes = [1, 128], strides = [1, 1]} : vector<8x128xf32> to vector<1x128xf32>
    %5 = vector.extract_strided_slice %3 {offsets = [1, 0], sizes = [1, 128], strides = [1, 1]} : vector<8x128xf32> to vector<1x128xf32>
    %6 = vector.extract_strided_slice %3 {offsets = [2, 0], sizes = [1, 128], strides = [1, 1]} : vector<8x128xf32> to vector<1x128xf32>
    %7 = vector.extract_strided_slice %3 {offsets = [3, 0], sizes = [1, 128], strides = [1, 1]} : vector<8x128xf32> to vector<1x128xf32>
    %8 = vector.extract_strided_slice %3 {offsets = [4, 0], sizes = [1, 128], strides = [1, 1]} : vector<8x128xf32> to vector<1x128xf32>
    %c0_2 = arith.constant 0 : index
    %c0_3 = arith.constant 0 : index
    %c0_4 = arith.constant 0 : index
    %9 = vector.load %arg5[%c0_2, %c0_3, %c0_4] : memref<1x256x128xbf16, #tpu.memory_space<vmem>>, vector<1x256x128xbf16>
    %10 = vector.shape_cast %9 : vector<1x256x128xbf16> to vector<256x128xbf16>
    %c0_5 = arith.constant 0 : index
    %c0_6 = arith.constant 0 : index
    %11 = vector.load %arg8[%c0_5, %c0_6] : memref<128x128xbf16, #tpu.memory_space<vmem>>, vector<128x128xbf16>
    %cst = arith.constant dense<0.000000e+00> : vector<256x128xf32>
    %12 = tpu.matmul %10, %11, %cst {dimension_numbers = #tpu.dot_dimension_numbers<[1], [0], [0], [1], [0, 0, 1, 1], [], []>} : vector<256x128xbf16>, vector<128x128xbf16>, vector<256x128xf32> -> vector<256x128xf32>
    %13 = vector.broadcast %4 : vector<1x128xf32> to vector<256x128xf32>
    %14 = arith.addf %12, %13 : vector<256x128xf32>
    %cst_7 = arith.constant 0.000000e+00 : f32
    %15 = vector.broadcast %cst_7 : f32 to vector<256x128xf32>
    %16 = arith.maximumf %14, %15 : vector<256x128xf32>
    %17 = arith.truncf %16 : vector<256x128xf32> to vector<256x128xbf16>
    %c0_8 = arith.constant 0 : index
    %c0_9 = arith.constant 0 : index
    %18 = vector.load %arg9[%c0_8, %c0_9] : memref<128x128xbf16, #tpu.memory_space<vmem>>, vector<128x128xbf16>
    %cst_10 = arith.constant dense<0.000000e+00> : vector<256x128xf32>
    %19 = tpu.matmul %17, %18, %cst_10 {dimension_numbers = #tpu.dot_dimension_numbers<[1], [0], [0], [1], [0, 0, 1, 1], [], []>} : vector<256x128xbf16>, vector<128x128xbf16>, vector<256x128xf32> -> vector<256x128xf32>
    %20 = vector.broadcast %5 : vector<1x128xf32> to vector<256x128xf32>
    %21 = arith.addf %19, %20 : vector<256x128xf32>
    %22 = arith.index_cast %arg0 : i32 to index
    %23 = memref.load %arg3[%22] : memref<2xf32, #tpu.memory_space<smem>>
    %24 = arith.index_cast %arg0 : i32 to index
    %25 = memref.load %arg4[%24] : memref<2xf32, #tpu.memory_space<smem>>
    %26 = vector.broadcast %25 : f32 to vector<256x128xf32>
    %27 = arith.mulf %21, %26 : vector<256x128xf32>
    %c0_11 = arith.constant 0 : index
    %c0_12 = arith.constant 0 : index
    %c0_13 = arith.constant 0 : index
    %28 = vector.load %arg6[%c0_11, %c0_12, %c0_13] : memref<1x256x128xbf16, #tpu.memory_space<vmem>>, vector<1x256x128xbf16>
    %29 = vector.shape_cast %28 : vector<1x256x128xbf16> to vector<256x128xbf16>
    %30 = arith.extf %29 : vector<256x128xbf16> to vector<256x128xf32>
    %c0_14 = arith.constant 0 : index
    %c0_15 = arith.constant 0 : index
    %c0_16 = arith.constant 0 : index
    %31 = vector.load %arg7[%c0_14, %c0_15, %c0_16] : memref<1x256x128xbf16, #tpu.memory_space<vmem>>, vector<1x256x128xbf16>
    %32 = vector.shape_cast %31 : vector<1x256x128xbf16> to vector<256x128xbf16>
    %33 = arith.extf %32 : vector<256x128xbf16> to vector<256x128xf32>
    %cst_17 = arith.constant 0.999998986 : f32
    %34 = arith.mulf %cst_17, %23 : f32
    %cst_18 = arith.constant 1.000000e+00 : f32
    %35 = arith.subf %cst_18, %34 : f32
    %36 = vector.broadcast %35 : f32 to vector<256x128xf32>
    %37 = arith.mulf %36, %33 : vector<256x128xf32>
    %38 = vector.broadcast %23 : f32 to vector<256x128xf32>
    %39 = arith.mulf %38, %30 : vector<256x128xf32>
    %40 = arith.addf %37, %39 : vector<256x128xf32>
    %cst_19 = arith.constant 0.999998986 : f32
    %41 = vector.broadcast %cst_19 : f32 to vector<256x128xf32>
    %42 = arith.mulf %41, %33 : vector<256x128xf32>
    %43 = arith.subf %30, %42 : vector<256x128xf32>
    %44 = arith.truncf %40 : vector<256x128xf32> to vector<256x128xbf16>
    %45 = arith.truncf %27 : vector<256x128xf32> to vector<256x128xbf16>
    %46 = tpu.concatenate %44, %45 in 1 : vector<256x128xbf16>, vector<256x128xbf16> -> vector<256x256xbf16>
    %c0_20 = arith.constant 0 : index
    %c0_21 = arith.constant 0 : index
    %47 = vector.load %arg10[%c0_20, %c0_21] : memref<256x128xbf16, #tpu.memory_space<vmem>>, vector<256x128xbf16>
    %cst_22 = arith.constant dense<0.000000e+00> : vector<256x128xf32>
    %48 = tpu.matmul %46, %47, %cst_22 {dimension_numbers = #tpu.dot_dimension_numbers<[1], [0], [0], [1], [0, 0, 1, 1], [], []>} : vector<256x256xbf16>, vector<256x128xbf16>, vector<256x128xf32> -> vector<256x128xf32>
    %49 = vector.broadcast %23 : f32 to vector<1x128xf32>
    %50 = arith.mulf %49, %6 : vector<1x128xf32>
    %51 = vector.broadcast %50 : vector<1x128xf32> to vector<256x128xf32>
    %52 = arith.addf %48, %51 : vector<256x128xf32>
    %53 = vector.broadcast %7 : vector<1x128xf32> to vector<256x128xf32>
    %54 = arith.addf %52, %53 : vector<256x128xf32>
    %55 = arith.mulf %54, %54 : vector<256x128xf32>
    %56 = arith.mulf %54, %55 : vector<256x128xf32>
    %cst_23 = arith.constant 4.471500e-02 : f32
    %57 = vector.broadcast %cst_23 : f32 to vector<256x128xf32>
    %58 = arith.mulf %57, %56 : vector<256x128xf32>
    %59 = arith.addf %54, %58 : vector<256x128xf32>
    %cst_24 = arith.constant 0.797884583 : f32
    %60 = vector.broadcast %cst_24 : f32 to vector<256x128xf32>
    %61 = arith.mulf %60, %59 : vector<256x128xf32>
    %62 = math.tanh %61 : vector<256x128xf32>
    %cst_25 = arith.constant 1.000000e+00 : f32
    %63 = vector.broadcast %cst_25 : f32 to vector<256x128xf32>
    %64 = arith.addf %63, %62 : vector<256x128xf32>
    %cst_26 = arith.constant 5.000000e-01 : f32
    %65 = vector.broadcast %cst_26 : f32 to vector<256x128xf32>
    %66 = arith.mulf %65, %64 : vector<256x128xf32>
    %67 = arith.mulf %54, %66 : vector<256x128xf32>
    %68 = arith.truncf %67 : vector<256x128xf32> to vector<256x128xbf16>
    %c0_27 = arith.constant 0 : index
    %c0_28 = arith.constant 0 : index
    %69 = vector.load %arg11[%c0_27, %c0_28] : memref<128x128xbf16, #tpu.memory_space<vmem>>, vector<128x128xbf16>
    %cst_29 = arith.constant dense<0.000000e+00> : vector<256x128xf32>
    %70 = tpu.matmul %68, %69, %cst_29 {dimension_numbers = #tpu.dot_dimension_numbers<[1], [0], [0], [1], [0, 0, 1, 1], [], []>} : vector<256x128xbf16>, vector<128x128xbf16>, vector<256x128xf32> -> vector<256x128xf32>
    %71 = vector.broadcast %8 : vector<1x128xf32> to vector<256x128xf32>
    %72 = arith.addf %70, %71 : vector<256x128xf32>
    %c256_i32 = arith.constant 256 : i32
    %73 = arith.muli %arg1, %c256_i32 : i32
    %74 = tpu.iota {dimensions = array<i32: 0>} : vector<256x1xi32>
    %75 = vector.broadcast %73 : i32 to vector<256x1xi32>
    %76 = arith.addi %75, %74 : vector<256x1xi32>
    %77 = arith.index_cast %arg0 : i32 to index
    %78 = memref.load %arg2[%77] : memref<2xi32, #tpu.memory_space<smem>>
    %79 = vector.broadcast %78 : i32 to vector<256x1xi32>
    %80 = arith.cmpi slt, %76, %79 : vector<256x1xi32>
    %81 = arith.extui %80 : vector<256x1xi1> to vector<256x1xi32>
    %82 = arith.sitofp %81 : vector<256x1xi32> to vector<256x1xf32>
    %83 = arith.subf %72, %43 : vector<256x128xf32>
    %84 = math.absf %83 : vector<256x128xf32>
    %85 = vector.broadcast %82 : vector<256x1xf32> to vector<256x128xf32>
    %86 = arith.mulf %84, %85 : vector<256x128xf32>
    %87 = vector.extract_strided_slice %86 {offsets = [0, 0], sizes = [8, 128], strides = [1, 1]} : vector<256x128xf32> to vector<8x128xf32>
    %88 = vector.extract_strided_slice %86 {offsets = [8, 0], sizes = [8, 128], strides = [1, 1]} : vector<256x128xf32> to vector<8x128xf32>
    %89 = arith.addf %87, %88 : vector<8x128xf32>
    %90 = vector.extract_strided_slice %86 {offsets = [16, 0], sizes = [8, 128], strides = [1, 1]} : vector<256x128xf32> to vector<8x128xf32>
    %91 = arith.addf %89, %90 : vector<8x128xf32>
    %92 = vector.extract_strided_slice %86 {offsets = [24, 0], sizes = [8, 128], strides = [1, 1]} : vector<256x128xf32> to vector<8x128xf32>
    %93 = arith.addf %91, %92 : vector<8x128xf32>
    %94 = vector.extract_strided_slice %86 {offsets = [32, 0], sizes = [8, 128], strides = [1, 1]} : vector<256x128xf32> to vector<8x128xf32>
    %95 = arith.addf %93, %94 : vector<8x128xf32>
    %96 = vector.extract_strided_slice %86 {offsets = [40, 0], sizes = [8, 128], strides = [1, 1]} : vector<256x128xf32> to vector<8x128xf32>
    %97 = arith.addf %95, %96 : vector<8x128xf32>
    %98 = vector.extract_strided_slice %86 {offsets = [48, 0], sizes = [8, 128], strides = [1, 1]} : vector<256x128xf32> to vector<8x128xf32>
    %99 = arith.addf %97, %98 : vector<8x128xf32>
    %100 = vector.extract_strided_slice %86 {offsets = [56, 0], sizes = [8, 128], strides = [1, 1]} : vector<256x128xf32> to vector<8x128xf32>
    %101 = arith.addf %99, %100 : vector<8x128xf32>
    %102 = vector.extract_strided_slice %86 {offsets = [64, 0], sizes = [8, 128], strides = [1, 1]} : vector<256x128xf32> to vector<8x128xf32>
    %103 = arith.addf %101, %102 : vector<8x128xf32>
    %104 = vector.extract_strided_slice %86 {offsets = [72, 0], sizes = [8, 128], strides = [1, 1]} : vector<256x128xf32> to vector<8x128xf32>
    %105 = arith.addf %103, %104 : vector<8x128xf32>
    %106 = vector.extract_strided_slice %86 {offsets = [80, 0], sizes = [8, 128], strides = [1, 1]} : vector<256x128xf32> to vector<8x128xf32>
    %107 = arith.addf %105, %106 : vector<8x128xf32>
    %108 = vector.extract_strided_slice %86 {offsets = [88, 0], sizes = [8, 128], strides = [1, 1]} : vector<256x128xf32> to vector<8x128xf32>
    %109 = arith.addf %107, %108 : vector<8x128xf32>
    %110 = vector.extract_strided_slice %86 {offsets = [96, 0], sizes = [8, 128], strides = [1, 1]} : vector<256x128xf32> to vector<8x128xf32>
    %111 = arith.addf %109, %110 : vector<8x128xf32>
    %112 = vector.extract_strided_slice %86 {offsets = [104, 0], sizes = [8, 128], strides = [1, 1]} : vector<256x128xf32> to vector<8x128xf32>
    %113 = arith.addf %111, %112 : vector<8x128xf32>
    %114 = vector.extract_strided_slice %86 {offsets = [112, 0], sizes = [8, 128], strides = [1, 1]} : vector<256x128xf32> to vector<8x128xf32>
    %115 = arith.addf %113, %114 : vector<8x128xf32>
    %116 = vector.extract_strided_slice %86 {offsets = [120, 0], sizes = [8, 128], strides = [1, 1]} : vector<256x128xf32> to vector<8x128xf32>
    %117 = arith.addf %115, %116 : vector<8x128xf32>
    %118 = vector.extract_strided_slice %86 {offsets = [128, 0], sizes = [8, 128], strides = [1, 1]} : vector<256x128xf32> to vector<8x128xf32>
    %119 = arith.addf %117, %118 : vector<8x128xf32>
    %120 = vector.extract_strided_slice %86 {offsets = [136, 0], sizes = [8, 128], strides = [1, 1]} : vector<256x128xf32> to vector<8x128xf32>
    %121 = arith.addf %119, %120 : vector<8x128xf32>
    %122 = vector.extract_strided_slice %86 {offsets = [144, 0], sizes = [8, 128], strides = [1, 1]} : vector<256x128xf32> to vector<8x128xf32>
    %123 = arith.addf %121, %122 : vector<8x128xf32>
    %124 = vector.extract_strided_slice %86 {offsets = [152, 0], sizes = [8, 128], strides = [1, 1]} : vector<256x128xf32> to vector<8x128xf32>
    %125 = arith.addf %123, %124 : vector<8x128xf32>
    %126 = vector.extract_strided_slice %86 {offsets = [160, 0], sizes = [8, 128], strides = [1, 1]} : vector<256x128xf32> to vector<8x128xf32>
    %127 = arith.addf %125, %126 : vector<8x128xf32>
    %128 = vector.extract_strided_slice %86 {offsets = [168, 0], sizes = [8, 128], strides = [1, 1]} : vector<256x128xf32> to vector<8x128xf32>
    %129 = arith.addf %127, %128 : vector<8x128xf32>
    %130 = vector.extract_strided_slice %86 {offsets = [176, 0], sizes = [8, 128], strides = [1, 1]} : vector<256x128xf32> to vector<8x128xf32>
    %131 = arith.addf %129, %130 : vector<8x128xf32>
    %132 = vector.extract_strided_slice %86 {offsets = [184, 0], sizes = [8, 128], strides = [1, 1]} : vector<256x128xf32> to vector<8x128xf32>
    %133 = arith.addf %131, %132 : vector<8x128xf32>
    %134 = vector.extract_strided_slice %86 {offsets = [192, 0], sizes = [8, 128], strides = [1, 1]} : vector<256x128xf32> to vector<8x128xf32>
    %135 = arith.addf %133, %134 : vector<8x128xf32>
    %136 = vector.extract_strided_slice %86 {offsets = [200, 0], sizes = [8, 128], strides = [1, 1]} : vector<256x128xf32> to vector<8x128xf32>
    %137 = arith.addf %135, %136 : vector<8x128xf32>
    %138 = vector.extract_strided_slice %86 {offsets = [208, 0], sizes = [8, 128], strides = [1, 1]} : vector<256x128xf32> to vector<8x128xf32>
    %139 = arith.addf %137, %138 : vector<8x128xf32>
    %140 = vector.extract_strided_slice %86 {offsets = [216, 0], sizes = [8, 128], strides = [1, 1]} : vector<256x128xf32> to vector<8x128xf32>
    %141 = arith.addf %139, %140 : vector<8x128xf32>
    %142 = vector.extract_strided_slice %86 {offsets = [224, 0], sizes = [8, 128], strides = [1, 1]} : vector<256x128xf32> to vector<8x128xf32>
    %143 = arith.addf %141, %142 : vector<8x128xf32>
    %144 = vector.extract_strided_slice %86 {offsets = [232, 0], sizes = [8, 128], strides = [1, 1]} : vector<256x128xf32> to vector<8x128xf32>
    %145 = arith.addf %143, %144 : vector<8x128xf32>
    %146 = vector.extract_strided_slice %86 {offsets = [240, 0], sizes = [8, 128], strides = [1, 1]} : vector<256x128xf32> to vector<8x128xf32>
    %147 = arith.addf %145, %146 : vector<8x128xf32>
    %148 = vector.extract_strided_slice %86 {offsets = [248, 0], sizes = [8, 128], strides = [1, 1]} : vector<256x128xf32> to vector<8x128xf32>
    %149 = arith.addf %147, %148 : vector<8x128xf32>
    %c0_30 = arith.constant 0 : index
    %c0_31 = arith.constant 0 : index
    %150 = vector.load %arg14[%c0_30, %c0_31] : memref<8x128xf32, #tpu.memory_space<vmem>>, vector<8x128xf32>
    %151 = arith.addf %150, %149 : vector<8x128xf32>
    %c0_32 = arith.constant 0 : index
    %c0_33 = arith.constant 0 : index
    %152 = vector.load %arg14[%c0_32, %c0_33] : memref<8x128xf32, #tpu.memory_space<vmem>>, vector<8x128xf32>
    tpu.vector_store %arg14[%c0_32, %c0_33], %151 {strides = array<i32>} : memref<8x128xf32, #tpu.memory_space<vmem>>, vector<8x128xf32>,
    %c1_i32 = arith.constant 1 : i32
    %153 = arith.cmpi eq, %arg1, %c1_i32 : i32
    %154 = arith.extui %153 : i1 to i32
    %c0_i32_34 = arith.constant 0 : i32
    %155 = arith.cmpi ne, %154, %c0_i32_34 : i32
    scf.if %155 {
      %c0_35 = arith.constant 0 : index
      %c0_36 = arith.constant 0 : index
      %156 = vector.load %arg14[%c0_35, %c0_36] : memref<8x128xf32, #tpu.memory_space<vmem>>, vector<8x128xf32>
      %c0_37 = arith.constant 0 : index
      %c0_38 = arith.constant 0 : index
      %c0_39 = arith.constant 0 : index
      %157 = vector.load %arg13[%c0_37, %c0_38, %c0_39] : memref<1x8x128xf32, #tpu.memory_space<vmem>>, vector<1x8x128xf32>
      %158 = vector.shape_cast %157 : vector<1x8x128xf32> to vector<8x128xf32>
      %159 = vector.shape_cast %156 : vector<8x128xf32> to vector<1x8x128xf32>
      tpu.vector_store %arg13[%c0_37, %c0_38, %c0_39], %159 {strides = array<i32>} : memref<1x8x128xf32, #tpu.memory_space<vmem>>, vector<1x8x128xf32>,
    } else {
    }
    return
  }
  func.func @transform_0(%arg0: i32, %arg1: i32) -> i32 {
    %c0_i32 = arith.constant 0 : i32
    %c0_i32_0 = arith.constant 0 : i32
    return %c0_i32 : i32
  }
  func.func @transform_1(%arg0: i32, %arg1: i32) -> i32 {
    %c0_i32 = arith.constant 0 : i32
    %c0_i32_0 = arith.constant 0 : i32
    return %c0_i32 : i32
  }
  func.func @transform_2(%arg0: i32, %arg1: i32) -> i32 {
    %c0_i32 = arith.constant 0 : i32
    %c0_i32_0 = arith.constant 0 : i32
    return %c0_i32 : i32
  }
  func.func @transform_3(%arg0: i32, %arg1: i32) -> (i32, i32, i32) {
    %c0_i32 = arith.constant 0 : i32
    %c0_i32_0 = arith.constant 0 : i32
    return %arg0, %arg1, %c0_i32 : i32, i32, i32
  }
  func.func @transform_4(%arg0: i32, %arg1: i32) -> (i32, i32, i32) {
    %c0_i32 = arith.constant 0 : i32
    %c0_i32_0 = arith.constant 0 : i32
    return %arg0, %arg1, %c0_i32 : i32, i32, i32
  }
  func.func @transform_5(%arg0: i32, %arg1: i32) -> (i32, i32, i32) {
    %c0_i32 = arith.constant 0 : i32
    %c0_i32_0 = arith.constant 0 : i32
    return %arg0, %arg1, %c0_i32 : i32, i32, i32
  }
  func.func @transform_6(%arg0: i32, %arg1: i32) -> (i32, i32) {
    %c0_i32 = arith.constant 0 : i32
    %c0_i32_0 = arith.constant 0 : i32
    %c0_i32_1 = arith.constant 0 : i32
    return %c0_i32, %c0_i32_0 : i32, i32
  }
  func.func @transform_7(%arg0: i32, %arg1: i32) -> (i32, i32) {
    %c0_i32 = arith.constant 0 : i32
    %c0_i32_0 = arith.constant 0 : i32
    %c0_i32_1 = arith.constant 0 : i32
    return %c0_i32, %c0_i32_0 : i32, i32
  }
  func.func @transform_8(%arg0: i32, %arg1: i32) -> (i32, i32) {
    %c0_i32 = arith.constant 0 : i32
    %c0_i32_0 = arith.constant 0 : i32
    %c0_i32_1 = arith.constant 0 : i32
    return %c0_i32, %c0_i32_0 : i32, i32
  }
  func.func @transform_9(%arg0: i32, %arg1: i32) -> (i32, i32) {
    %c0_i32 = arith.constant 0 : i32
    %c0_i32_0 = arith.constant 0 : i32
    %c0_i32_1 = arith.constant 0 : i32
    return %c0_i32, %c0_i32_0 : i32, i32
  }
  func.func @transform_10(%arg0: i32, %arg1: i32) -> (i32, i32) {
    %c0_i32 = arith.constant 0 : i32
    %c0_i32_0 = arith.constant 0 : i32
    %c0_i32_1 = arith.constant 0 : i32
    return %c0_i32, %c0_i32_0 : i32, i32
  }
  func.func @transform_11(%arg0: i32, %arg1: i32) -> (i32, i32, i32) {
    %c0_i32 = arith.constant 0 : i32
    %c0_i32_0 = arith.constant 0 : i32
    %c0_i32_1 = arith.constant 0 : i32
    return %arg0, %c0_i32, %c0_i32_0 : i32, i32, i32
  }
}

</mosaic_0001>

<bundles_post_ra>
// kernel: tpu_custom_call.1
= control target key start
LH: loop header
LB: loop body
LE: loop exit
PB: predicated region body
PF: predicated region fallthrough
CT: control target
= control target key end

     0   :  { %s5702_s0 = inlined_call_operand.hbm [shape: s32[2], index: 0, kind: input, shape index: {}]   ;;  %s5703_s1 = inlined_call_operand.hbm [shape: f32[2], index: 1, kind: input, shape index: {}]   ;;  %s5704_s2 = inlined_call_operand.vmem [shape: f32[2], index: 2, kind: input, shape index: {}]   ;;  %s5705_s3 = inlined_call_operand.hbm [shape: bf16[2,512,128], index: 3, kind: input, shape index: {}]   ;;  %s5706_s4 = inlined_call_operand.hbm [shape: bf16[2,512,128], index: 4, kind: input, shape index: {}]   ;;  %s5707_s5 = inlined_call_operand.hbm [shape: bf16[2,512,128], index: 5, kind: input, shape index: {}]   ;;  %s5708_s6 = inlined_call_operand.hbm [shape: bf16[128,128], index: 6, kind: input, shape index: {}]   ;;  %s5709_s7 = inlined_call_operand.hbm [shape: bf16[128,128], index: 7, kind: input, shape index: {}]   ;;  %s5710_s8 = inlined_call_operand.hbm [shape: bf16[256,128], index: 8, kind: input, shape index: {}]   ;;  %s5711_s9 = inlined_call_operand.hbm [shape: bf16[128,128], index: 9, kind: input, shape index: {}]   ;;  %s5712_s10 = inlined_call_operand.vmem [shape: f32[8,128], index: 10, kind: input, shape index: {}]   ;;  %s5713_s11 = inlined_call_operand.hbm [shape: f32[2,8,128], index: 11, kind: output, shape index: {}]  }
   0x1   :  { %5811 = sst [smem:[#allocation50_spill]] %s5702_s0 }
   0x2   :  { %5812 = sst [smem:[#allocation51_spill]] %s5706_s4 }
   0x3   :  { %5813 = sst [smem:[#allocation52_spill]] %s5708_s6 }
   0x4   :  { %5814 = sst [smem:[#allocation53_spill]] %s5710_s8 }
   0x5   :  { %5815 = sst [smem:[#allocation54_spill]] %s5712_s10 }
   0x6   :  { %5816 = sst [smem:[#allocation55_spill]] %s5713_s11 }
   0x7   :  { %16 = vsyncpa [#allocation6], 0 }
   0x8   :  { %17 = vsyncpa [#allocation9], 0 }
   0x9   :  { %18 = vsyncpa [#allocation7], 0 }
   0xa   :  { %19 = vsyncpa [#allocation4], 0 }
   0xb   :  { %21 = vsyncpa [#allocation4 + $0x1], 0 }
   0xc   :  { %22 = vsyncpa [#allocation13], 0 }
   0xd   :  { %24 = vsyncpa [#allocation13 + $0x1], 0 }
   0xe   :  { %25 = vsyncpa [#allocation16], 0 }
   0xf   :  { %26 = vsyncpa [#allocation19], 0 }
  0x10   :  { %27 = vsyncpa [#allocation5], 0 }
  0x11   :  { %29 = vsyncpa [#allocation5 + $0x1], 0  ;;  %s4277_s17 = smov 0   ;;  %s4279_s18 = smov 0  }
  0x12   :  { %s4281_s19 = smov 0   ;;  %s4283_s20 = smov 0  }
  0x13   :  { %s4285_s21 = smov 0   ;;  %s4287_s22 = smov 0  }
  0x14   :  { %s4289_s23 = smov 0   ;;  %s4291_s24 = smov 0  }
  0x15   :  { %s4293_s25 = smov 0   ;;  %s4295_s26 = smov 0  }
  0x16   :  { %s4297_s27 = smov 0  }
  0x17 LB: > { %5817 = sst [smem:[#allocation30_spill]] %s4164_s17  ;;  %s4336_s12 = sadd.s32 4294967295, %s4204_s27   ;;  %s4204_s27 = sphi %s4297_s27, %s35_s27   ;;  %s4200_s26 = sphi %s4295_s26, %s5940_s26   ;;  %s4196_s25 = sphi %s4293_s25, %s5939_s25   ;;  %s4192_s24 = sphi %s4291_s24, %s5945_s24   ;;  %s4188_s23 = sphi %s4289_s23, %s5937_s23   ;;  %s4184_s22 = sphi %s4287_s22, %s5944_s22   ;;  %s4180_s21 = sphi %s4285_s21, %s5943_s21   ;;  %s4176_s20 = sphi %s4283_s20, %s5935_s20   ;;  %s4172_s19 = sphi %s4281_s19, %s5934_s19   ;;  %s4168_s18 = sphi %s4279_s18, %s5942_s18   ;;  %s4164_s17 = sphi %s4277_s17, %s5941_s17  }
  0x18   : > { %5818 = sst [smem:[#allocation31_spill]] %s4172_s19  ;;  %p3017_p0 = scmp.ge.s32.totalorder %s4204_s27, 1 }
  0x19   : > { %5819 = sst [smem:[#allocation32_spill]] %s4180_s21  ;;  %p133_p1 = scmp.eq.s32.totalorder %s4336_s12, 0 }
  0x1a   : > { %5820 = sst [smem:[#allocation33_spill]] %s4188_s23  ;;  %p330_p2 = scmp.lt.s32.totalorder %s4204_s27, 5 }
  0x1b   : > { %5821 = sst [smem:[#allocation34_spill]] %s4192_s24  ;;  %s4206_s14 = smov [#allocation15]  }
  0x1c   : > { %5822 = sst [smem:[#allocation35_spill]] %s4196_s25  ;;  %p4341_p3 = pnand %p3017_p0, %p330_p2 }
  0x1d   : > { %5823 = sst [smem:[#allocation36_spill]] %s4200_s26  ;;  %s373_s15 = sshll.u32 %s4206_s14, 4  ;;  %s374_s15 = int_to_ptr.vmem [resolvable:$true] %s373_s15 }
  0x1e   : > { %5824 = sst [smem:[#allocation37_spill]] %s4204_s27  ;;  %p3587_p4 = pneg %p4341_p3 }
  0x1f   : > { %s5825_s6 = sld [smem:[#allocation52_spill]]  ;;  %s4207_s14 = smov [#allocation18]  }
  0x20   : > { %s5827_s8 = sld [smem:[#allocation53_spill]]  ;;  %p4352_p5 = pnand %p3587_p4, %p133_p1 }
  0x21   : > { %s401_s11 = sshll.u32 %s4207_s14, 4  ;;  %s5717_s24 = smov 64   ;;  %s402_s11 = int_to_ptr.vmem [resolvable:$true] %s401_s11 }
  0x22   : > { %s5719_s16 = smov 4   ;;  %s3016_s28 = sadd.s32 4294967294, %s4204_s27  }
  0x23   : > { %s44_s14 = sadd.s32 1, %s4196_s25  ;;  %s119_s10 = sadd.s32 1, %s4184_s22 }
  0x24   : > { %p45_p6 = scmp.ge.s32.totalorder %s44_s14, 2  ;;  %p126_p7 = scmp.ne.s32.totalorder %s4184_s22, %s4180_s21 }
  0x25   : > { %s371_s30 = sshll.u32 %s5825_s6, 4  ;;  %p127_p8 = scmp.eq.s32.totalorder %s4204_s27, 0  ;;  %s372_s30 = int_to_ptr.hbm [resolvable:$true] %s371_s30 }
  0x26   : > { %s399_s29 = sshll.u32 %s5827_s8, 4  ;;  %s47_s8 = sadd.s32 1, %s4200_s26  ;;  %s400_s29 = int_to_ptr.hbm [resolvable:$true] %s399_s29 }
  0x27   : > { %3599 = dma.hbm_to_vmem [thread:$0]  (!%p4352_p5), %s372_s30, 1024, %s374_s15, [#allocation16], %s5717_s24, %s5717_s24, %s5719_s16  }
  0x28   : > { %3605 = dma.hbm_to_vmem [thread:$0]  (!%p4352_p5), %s400_s29, 2048, %s402_s11, [#allocation19], %s5717_s24, %s5717_s24, %s5719_s16  }
  0x29   : > { %s5947_s14 = smov (%p45_p6, %s44_s14), 0  ;;  %s5949_s8 = smov (!%p45_p6, %s47_s8), %s4200_s26 }
  0x2a   : > { %5829 = sst [smem:[#allocation38_spill]] %s5947_s14  ;;  %s115_s30 = ssub.s32 %s4196_s25, %s5947_s14 }
  0x2b   : > { %p49_p9 = scmp.ge.s32.totalorder %s5949_s8, 2  ;;  %p132_p10 = scmp.ne.s32.totalorder %s4180_s21, %s4176_s20 }
  0x2c   : > { %p4380_p11 = por %p127_p8, %p126_p7  ;;  %s306_s15 = sadd.s32 1, %s4172_s19 }
  0x2d   : > { %s5951_s8 = smov (%p49_p9, %s5949_s8), 0  ;;  %p4389_p12 = por %p133_p1, %p132_p10 }
  0x2e   : > { %5831 = sst [smem:[#allocation39_spill]] %s5951_s8  ;;  %p316_p13 = scmp.ne.s32.totalorder %s4172_s19, %s4168_s18 }
  0x2f   : > { %s5832_s29 = scalar_select %p4389_p12, 1, 0 }
  0x30   : > { %s114_s20 = ssub.s32 %s4200_s26, %s5951_s8  ;;  %p317_p0 = scmp.eq.s32.totalorder %s4336_s12, 3 }
  0x31   : > { %5833 = sst [smem:[#allocation40_spill]] %s5832_s29  ;;  %s116_s24 = sor.u32 %s115_s30, %s114_s20 }
  0x32   : > { %p304_p2 = scmp.eq.s32.totalorder %s114_s20, 0  ;;  %p117_p4 = scmp.eq.s32.totalorder %s116_s24, 0 }
  0x33   : > { %p4398_p6 = por %p317_p0, %p316_p13  ;;  %p322_p7 = scmp.ne.s32.totalorder %s4168_s18, %s4164_s17 }
  0x34   : > { %s4403_s14 = scalar_select %p304_p2, %s4172_s19, %s306_s15  }
  0x35   : > { %s4406_s23 = scalar_select %p117_p4, %s4184_s22, %s119_s10  }
  0x36   : > { %5835 = sst [smem:[#allocation41_spill]] %s4403_s14  ;;  %p323_p8 = scmp.eq.s32.totalorder %s3016_s28, 3 }
  0x37   : > { %5836 = sst [smem:[#allocation42_spill]] %s4406_s23  ;;  %p3630_p9 = scmp.lt.s32.totalorder %s4204_s27, 4 }
  0x38   : > { %s5727_s29 = sand.u32 1, %s4184_s22   ;;  %p4412_p10 = por %p323_p8, %p322_p7 }
  0x39   : > { %s4418_s30 = sshll.u32 %s5727_s29, 7  ;;  %s3027_s24 = sshll.u32 %s4196_s25, 5 }
  0x3a   : > { %s5837_s8 = scalar_select %p4412_p10, 1, 0 }
  0x3b   : > { %s3028_s20 = sshll.u32 %s4200_s26, 6  ;;  %p4424_p13 = pnand %p3630_p9, %p4380_p11 }
  0x3c   : > { %5838 = sst [smem:[#allocation43_spill]] %s5837_s8  ;;  %s441_s21 = sadd.s32 %s3028_s20, %s3027_s24 }
  0x3d   : > { %s4428_s28 = sshll.u32 %s441_s21, 2  ;;  %s456_s15 = sand.u32 1, %s4204_s27  }
  0x3e   : > { %s5840_s4 = sld [smem:[#allocation51_spill]]  ;;  %s460_s25 = scalar_lea.vmem [#allocation12], %s4418_s30 }
  0x3f   : > { %s470_s26 = sshll.u32 %s460_s25, 4  ;;  %s4436_s11 = scalar_lea.sflag [#allocation13], %s456_s15  ;;  %s471_s26 = int_to_ptr.vmem [resolvable:$true] %s470_s26 }
  0x40   : > { %s5841_s24 = smov 4   ;;  %s5842_s20 = smov 64  }
  0x41   : > { %s5843_s0 = sld [smem:[#allocation50_spill]]  ;;  %s352_s25 = sshll.u32 %s5703_s1, 4  ;;  %s353_s25 = int_to_ptr.hbm [resolvable:$true] %s352_s25 }
  0x42   : > { %s4211_s15 = smov [#allocation8]   ;;  %s385_s21 = sshll.u32 %s5709_s7, 4  ;;  %s386_s21 = int_to_ptr.hbm [resolvable:$true] %s385_s21 }
  0x43   : > { %3593 = dma.hbm_to_smem (!%p4352_p5), %s353_s25, 16, %s4211_s15, [#allocation9]  }
  0x44   : > { %s467_s29 = scalar_lea.hbm %s5840_s4, %s4428_s28  ;;  %s4210_s4 = smov [#allocation3]  }
  0x45   : > { %s468_s19 = sshll.u32 %s467_s29, 4  ;;  %s4212_s14 = smov [#allocation10]   ;;  %s469_s19 = int_to_ptr.hbm [resolvable:$true] %s468_s19 }
  0x46   : > { %3615 = dma.hbm_to_vmem [thread:$0]  (!%p4424_p13), %s469_s19, 2048, %s471_s26, %s4436_s11, %s5842_s20, %s5842_s20, %s5841_s24  }
  0x47   : > { %s342_s23 = sshll.u32 %s5843_s0, 4  ;;  %s362_s19 = sshll.u32 %s5704_s2, 4  ;;  %s343_s23 = int_to_ptr.hbm [resolvable:$true] %s342_s23  ;;  %s363_s19 = int_to_ptr.vmem [resolvable:$true] %s362_s19 }
  0x48   : > { %3590 = dma.hbm_to_smem (!%p4352_p5), %s343_s23, 16, %s4210_s4, [#allocation6]  }
  0x49   : > { %3596 = dma.vmem_to_smem (!%p4352_p5), %s363_s19, 16, %s4212_s14, [#allocation7]  }
  0x4a   : > { %s4213_s4 = smov [#allocation17]   ;;  %s413_s17 = sshll.u32 %s5711_s9, 4  ;;  %s414_s17 = int_to_ptr.hbm [resolvable:$true] %s413_s17 }
  0x4b   : > { %s387_s23 = sshll.u32 %s4213_s4, 4  ;;  %s4214_s27 = smov [#allocation20]   ;;  %s388_s23 = int_to_ptr.vmem [resolvable:$true] %s387_s23 }
  0x4c   : > { %3602 = dma.hbm_to_vmem [thread:$0]  (!%p4352_p5), %s386_s21, 1024, %s388_s23, [#allocation16], %s5842_s20, %s5842_s20, %s5841_s24  }
  0x4d   : > { %s415_s15 = sshll.u32 %s4214_s27, 4  ;;  %s443_s26 = scalar_lea.hbm %s5705_s3, %s4428_s28  ;;  %s416_s15 = int_to_ptr.vmem [resolvable:$true] %s415_s15 }
  0x4e   : > { %3608 = dma.hbm_to_vmem [thread:$0]  (!%p4352_p5), %s414_s17, 1024, %s416_s15, [#allocation19], %s5842_s20, %s5842_s20, %s5841_s24  }
  0x4f   : > { %s444_s14 = sshll.u32 %s443_s26, 4  ;;  %s436_s4 = scalar_lea.vmem [#allocation11], %s4418_s30  ;;  %s445_s14 = int_to_ptr.hbm [resolvable:$true] %s444_s14 }
  0x50   : > { %s446_s29 = sshll.u32 %s436_s4, 4  ;;  %s5844_s21 = sand.u32 1, %s4184_s22   ;;  %s447_s29 = int_to_ptr.vmem [resolvable:$true] %s446_s29 }
  0x51   : > { %s433_s23 = scalar_lea.sflag [#allocation4], %s5844_s21  ;;  %s491_s6 = scalar_lea.hbm %s5707_s5, %s4428_s28 }
  0x52   : > { %3612 = dma.hbm_to_vmem [thread:$0]  (!%p4424_p13), %s445_s14, 2048, %s447_s29, %s433_s23, %s5842_s20, %s5842_s20, %s5841_s24  }
  0x53   : > { %s492_s19 = sshll.u32 %s491_s6, 4  ;;  %s484_s8 = scalar_lea.vmem [#allocation14], %s4418_s30  ;;  %s493_s19 = int_to_ptr.hbm [resolvable:$true] %s492_s19 }
  0x54   : > { %s494_s0 = sshll.u32 %s484_s8, 4  ;;  %506 = sbr.rel (%p4341_p3) target bundleno = 1029 (0x405), region = 64  ;;  %s495_s0 = int_to_ptr.vmem [resolvable:$true] %s494_s0 }
  0x55   : > { %3618 = dma.hbm_to_vmem [thread:$0]  (!%p4424_p13), %s493_s19, 2048, %s495_s0, %s4436_s11, %s5842_s20, %s5842_s20, %s5841_s24  }
  0x59   : > { %4131 = dma.done.wait (%p133_p1), [#allocation6], 16  }
  0x5a   : > { %4133 = vsyncadd (%p133_p1), [#allocation6], 4294967280 }
  0x5b   : > { %4135 = dma.done.wait (%p133_p1), [#allocation9], 16  }
  0x5c   : > { %4137 = vsyncadd (%p133_p1), [#allocation9], 4294967280 }
  0x5d   : > { %4139 = dma.done.wait (%p133_p1), [#allocation7], 16  }
  0x5e   : > { %4141 = vsyncadd (%p133_p1), [#allocation7], 4294967280  ;;  %s5845_s0 = sld [smem:[#allocation32_spill]] }
  0x64   : > { %s523_s30 = sand.u32 1, %s5845_s0  }
  0x65   : > { %s3042_s10 = sshll.u32 %s523_s30, 7  ;;  %s524_s28 = scalar_lea.sflag [#allocation4], %s523_s30 }
  0x66   : > { %s4513_s11 = scalar_lea.vmem [#allocation11], %s3042_s10 }
  0x67   : > { %4143 = dma.done.wait (%p4389_p12), %s524_s28, 2048  }
  0x68   : > { %4145 = vsyncadd (%p4389_p12), %s524_s28, 4294965248  ;;  %s533_s24 = sand.u32 1, %s4336_s12   ;;  %s4520_s17 = scalar_lea.vmem [#allocation12], %s3042_s10 }
  0x69   : > { %s534_s20 = scalar_lea.sflag [#allocation13], %s533_s24 }
  0x6a   : > { %4147 = dma.done.wait (%p4389_p12), %s534_s20, 4096  }
  0x6b   : > { %4149 = vsyncadd (%p4389_p12), %s534_s20, 4294963200  ;;  %s4526_s15 = scalar_lea.vmem [#allocation14], %s3042_s10 }
  0x6c   : > { %4151 = dma.done.wait (%p133_p1), [#allocation16], 2048  }
  0x6d   : > { %4153 = vsyncadd (%p133_p1), [#allocation16], 4294965248 }
  0x6e   : > { %4155 = dma.done.wait (%p133_p1), [#allocation19], 3072  }
  0x6f   : > { %4157 = vsyncadd (%p133_p1), [#allocation19], 4294964224 }
  0x70   : > { %573 = sfence }
  0x71   : > { %s615_s26 = sand.u32 1, %s4168_s18   ;;  %s5847_s29 = sld [smem:[#allocation33_spill]] }
  0x72   : > { %s4539_s14 = sshll.u32 %s615_s26, 3 }
  0x73   : > { %s617_s4 = scalar_lea.vmem [#allocation21], %s4539_s14 }
  0x77   : > { %p3050_p3 = scmp.ne.s32.totalorder %s5847_s29, 0 }
  0x79   : > { %624 = sbr.rel (%p3050_p3) target bundleno = 128 (0x80), region = 108 }
  0x7e   : > { %v4215_v0 = vmov 0.0  }
  0x7f   : > { %625 = vst [vmem:[#allocation2] sm:$0xff] %v4215_v0 }
  0x80 PF: > { %v3336_v1 = vld [vmem:[#allocation15 + $0x38] sm:$0xff]  ;;  %v3335_v2 = vld [vmem:[#allocation15 + $0x30] sm:$0xff]  ;;  %v3334_v3 = vld [vmem:[#allocation15 + $0x28] sm:$0xff]  ;;  %s5848_s23 = sld [smem:[#allocation54_spill]] }
  0x81   : > { %820 = vmatpush.bf16.msra.mxu0 %v3336_v1  ;;  %3527 = vmatpush.bf16.msra.mxu1 %v3336_v1  ;;  %v3333_v4 = vld [vmem:[#allocation15 + $0x20] sm:$0xff]  ;;  %v3332_v5 = vld [vmem:[#allocation15 + $0x18] sm:$0xff]  ;;  %v3331_v6 = vld [vmem:[#allocation15 + $0x10] sm:$0xff]  ;;  %s5850_s25 = sld [smem:[#allocation34_spill]] }
  0x82   : > { %3528 = vmatpush.bf16.msra.mxu2 %v3336_v1  ;;  %3529 = vmatpush.bf16.msra.mxu3 %v3336_v1  ;;  %v3330_v7 = vld [vmem:[#allocation15 + $0x8] sm:$0xff]  ;;  %v3329_v8 = vld [vmem:[#allocation15] sm:$0xff]  ;;  %v3344_v12 = vld [vmem:[#allocation17 + $0x38] sm:$0xff]  ;;  %s5857_s10 = sld [smem:[#allocation33_spill]] }
  0x83   : > { %v3313_v9 = vld [vmem:[%s4513_s11] sm:$0xff]  ;;  %v3314_v10 = vld [vmem:[%s4513_s11 + $0x8] sm:$0xff]  ;;  %v3343_v13 = vld [vmem:[#allocation17 + $0x30] sm:$0xff] }
  0x84   : > { %v3317_v11 = vld [vmem:[%s4513_s11 + $0x20] sm:$0xff]  ;;  %v3342_v14 = vld [vmem:[#allocation17 + $0x28] sm:$0xff]  ;;  %v3315_v16 = vld [vmem:[%s4513_s11 + $0x10] sm:$0xff] }
  0x85   : > { %821 = vmatpush.bf16.msra.mxu0 %v3335_v2  ;;  %3530 = vmatpush.bf16.msra.mxu1 %v3335_v2  ;;  %v3341_v15 = vld [vmem:[#allocation17 + $0x20] sm:$0xff]  ;;  %v3318_v17 = vld [vmem:[%s4513_s11 + $0x28] sm:$0xff]  ;;  %v3340_v18 = vld [vmem:[#allocation17 + $0x18] sm:$0xff] }
  0x86   : > { %3531 = vmatpush.bf16.msra.mxu2 %v3335_v2  ;;  %3532 = vmatpush.bf16.msra.mxu3 %v3335_v2  ;;  %v3321_v19 = vld [vmem:[%s4513_s11 + $0x40] sm:$0xff]  ;;  %v3339_v20 = vld [vmem:[#allocation17 + $0x10] sm:$0xff]  ;;  %v3338_v21 = vld [vmem:[#allocation17 + $0x8] sm:$0xff]  ;;  %s5849_s6 = smov %s5848_s23 }
  0x87   : > { %v3316_v22 = vld [vmem:[%s4513_s11 + $0x18] sm:$0xff]  ;;  %v3319_v23 = vld [vmem:[%s4513_s11 + $0x30] sm:$0xff]  ;;  %v3322_v25 = vld [vmem:[%s4513_s11 + $0x48] sm:$0xff]  ;;  %s1111_s27 = sld [smem:[#allocation8 + %s5850_s25]] }
  0x88   : > { %v3320_v24 = vld [vmem:[%s4513_s11 + $0x38] sm:$0xff]  ;;  %v3337_v26 = vld [vmem:[#allocation17] sm:$0xff]  ;;  %v3323_v27 = vld [vmem:[%s4513_s11 + $0x50] sm:$0xff]  ;;  %s1112_s0 = sld [smem:[#allocation10 + %s5850_s25]]  ;;  %p3308_p1 = scmp.ne.s32.totalorder %s5857_s10, 1 }
  0x89   : > { %822 = vmatpush.bf16.msra.mxu0 %v3334_v3  ;;  %3533 = vmatpush.bf16.msra.mxu1 %v3334_v3  ;;  %v4557_v28 = vld [vmem:[%s5848_s23] sm:$0xff]  ;;  %v3324_v31 = vld [vmem:[%s4513_s11 + $0x58] sm:$0xff]  ;;  %v3325_v39 = vld [vmem:[%s4513_s11 + $0x60] sm:$0xff]  ;;  %s2560_s28 = sld [smem:[#allocation3 + %s5850_s25]] }
  0x8a   : > { %3534 = vmatpush.bf16.msra.mxu2 %v3334_v3  ;;  %3535 = vmatpush.bf16.msra.mxu3 %v3334_v3  ;;  %v4560_v30 = vperm.slane %v4557_v28, 0  ;;  %v3326_v47 = vld [vmem:[%s4513_s11 + $0x68] sm:$0xff]  ;;  %v3352_v55 = vld [vmem:[#allocation18 + $0x38] sm:$0xff]  ;;  %v3327_v57 = vld [vmem:[%s4513_s11 + $0x70] sm:$0xff] }
  0x8b   : > { %v3360_v2 = vld [vmem:[#allocation18 + $0x78] sm:$0xff]  ;;  %v3351_v3 = vld [vmem:[#allocation18 + $0x30] sm:$0xff] }
  0x8d   : > { %823 = vmatpush.bf16.msra.mxu0 %v3333_v4  ;;  %3536 = vmatpush.bf16.msra.mxu1 %v3333_v4  ;;  %s1274_s19 = smul.f32 0.999999, %s1111_s27 }
  0x8e   : > { %3537 = vmatpush.bf16.msra.mxu2 %v3333_v4  ;;  %3538 = vmatpush.bf16.msra.mxu3 %v3333_v4  ;;  %v3328_v4 = vld [vmem:[%s4513_s11 + $0x78] sm:$0xff]  ;;  %s3275_s11 = sshll.u32 %s5857_s10, 8 }
  0x8f   : > { %s1275_s8 = ssub.f32 1.0, %s1274_s19 }
  0x91   : > { %824 = vmatpush.bf16.msra.mxu0 %v3332_v5  ;;  %3539 = vmatpush.bf16.msra.mxu1 %v3332_v5 }
  0x92   : > { %3540 = vmatpush.bf16.msra.mxu2 %v3332_v5  ;;  %3541 = vmatpush.bf16.msra.mxu3 %v3332_v5  ;;  %v3350_v5 = vld [vmem:[#allocation18 + $0x28] sm:$0xff] }
  0x95   : > { %825 = vmatpush.bf16.msra.mxu0 %v3331_v6  ;;  %3542 = vmatpush.bf16.msra.mxu1 %v3331_v6 }
  0x96   : > { %3543 = vmatpush.bf16.msra.mxu2 %v3331_v6  ;;  %3544 = vmatpush.bf16.msra.mxu3 %v3331_v6  ;;  %v3359_v6 = vld [vmem:[#allocation18 + $0x70] sm:$0xff] }
  0x99   : > { %826 = vmatpush.bf16.msra.mxu0 %v3330_v7  ;;  %3545 = vmatpush.bf16.msra.mxu1 %v3330_v7 }
  0x9a   : > { %3546 = vmatpush.bf16.msra.mxu2 %v3330_v7  ;;  %3547 = vmatpush.bf16.msra.mxu3 %v3330_v7 }
  0x9d   : > { %827 = vmatpush.bf16.msra.mxu0 %v3329_v8  ;;  %3548 = vmatpush.bf16.msra.mxu1 %v3329_v8 }
  0x9e   : > { %3549 = vmatpush.bf16.msra.mxu2 %v3329_v8  ;;  %3550 = vmatpush.bf16.msra.mxu3 %v3329_v8 }
  0xa0   : > { %828 = vmatmul.bf16.vlgmr.msra.gmra.mxu0 %v3313_v9  ;;  %848 = vmatmul.bf16.vlgmr.msra.gmra.mxu1 %v3317_v11 }
  0xa1   : > { %1022 = vmatpush.bf16.msrb.mxu1 %v3344_v12  ;;  %868 = vmatmul.bf16.vlgmr.msra.gmra.mxu2 %v3321_v19 }
  0xa2   : > { %888 = vmatmul.bf16.vlgmr.msra.gmra.mxu3 %v3325_v39  ;;  %1824 = vmatpush.bf16.msrb.mxu2 %v3352_v55 }
  0xa3   : > { %1913 = vmatpush.bf16.msrb.mxu3 %v3360_v2 }
  0xa5   : > { %1023 = vmatpush.bf16.msrb.mxu1 %v3343_v13  ;;  %v3358_v13 = vld [vmem:[#allocation18 + $0x68] sm:$0xff] }
  0xa6   : > { %1825 = vmatpush.bf16.msrb.mxu2 %v3351_v3 }
  0xa7   : > { %1914 = vmatpush.bf16.msrb.mxu3 %v3359_v6  ;;  %v3353_v6 = vld [vmem:[#allocation18 + $0x40] sm:$0xff] }
  0xa9   : > { %1024 = vmatpush.bf16.msrb.mxu1 %v3342_v14  ;;  %v3349_v14 = vld [vmem:[#allocation18 + $0x20] sm:$0xff] }
  0xaa   : > { %1826 = vmatpush.bf16.msrb.mxu2 %v3350_v5 }
  0xab   : > { %1915 = vmatpush.bf16.msrb.mxu3 %v3358_v13 }
  0xad   : > { %1025 = vmatpush.bf16.msrb.mxu1 %v3341_v15  ;;  %v3357_v15 = vld [vmem:[#allocation18 + $0x60] sm:$0xff] }
  0xae   : > { %1827 = vmatpush.bf16.msrb.mxu2 %v3349_v14 }
  0xaf   : > { %1916 = vmatpush.bf16.msrb.mxu3 %v3357_v15 }
  0xb0   : > { %833 = vmatmul.bf16.gmra.mxu0 %v3314_v10  ;;  %853 = vmatmul.bf16.gmra.mxu1 %v3318_v17 }
  0xb1   : > { %1026 = vmatpush.bf16.msrb.mxu1 %v3340_v18  ;;  %873 = vmatmul.bf16.gmra.mxu2 %v3322_v25  ;;  %v3347_v25 = vld [vmem:[#allocation18 + $0x10] sm:$0xff] }
  0xb2   : > { %893 = vmatmul.bf16.gmra.mxu3 %v3326_v47 }
  0xb5   : > { %1027 = vmatpush.bf16.msrb.mxu1 %v3339_v20 }
  0xb9   : > { %1028 = vmatpush.bf16.msrb.mxu1 %v3338_v21 }
  0xbd   : > { %1029 = vmatpush.bf16.msrb.mxu1 %v3337_v26  ;;  %v3355_v26 = vld [vmem:[#allocation18 + $0x50] sm:$0xff] }
  0xc0   : > { %838 = vmatmul.bf16.gmra.mxu0 %v3315_v16  ;;  %858 = vmatmul.bf16.gmra.mxu1 %v3319_v23  ;;  %v3348_v16 = vld [vmem:[#allocation18 + $0x18] sm:$0xff] }
  0xc1   : > { %878 = vmatmul.bf16.gmra.mxu2 %v3323_v27 }
  0xc2   : > { %898 = vmatmul.bf16.gmra.mxu3 %v3327_v57  ;;  %1828 = vmatpush.bf16.msrb.mxu2 %v3348_v16  ;;  %v3354_v57 = vld [vmem:[#allocation18 + $0x48] sm:$0xff] }
  0xc6   : > { %1829 = vmatpush.bf16.msrb.mxu2 %v3347_v25 }
  0xd0   : > { %843 = vmatmul.bf16.gmra.mxu0 %v3316_v22  ;;  %863 = vmatmul.bf16.gmra.mxu1 %v3320_v24  ;;  %v3356_v24 = vld [vmem:[#allocation18 + $0x58] sm:$0xff] }
  0xd1   : > { %883 = vmatmul.bf16.gmra.mxu2 %v3324_v31  ;;  %1917 = vmatpush.bf16.msrb.mxu3 %v3356_v24  ;;  %v4639_v24 = vld [vmem:[%s4526_s15 + $0x10] sm:$0xff]  }
  0xd2   : > { %903 = vmatmul.bf16.gmra.mxu3 %v3328_v4 }
  0xd5   : > { %1918 = vmatpush.bf16.msrb.mxu3 %v3355_v26 }
  0xd9   : > { %1919 = vmatpush.bf16.msrb.mxu3 %v3354_v57 }
  0xdd   : > { %1920 = vmatpush.bf16.msrb.mxu3 %v3353_v6 }
 0x11d   : > { %v829_v29 = vpop.f32.mrf.mxu0  ;;  %v849_v53 = vpop.f32.mrf.mxu1 }
 0x11e   : > { %v830_v32 = vadd.f32 %v829_v29, %v4560_v30  ;;  %v850_v7 = vadd.f32 %v849_v53, %v4560_v30 }
 0x120   : > { %v909_v35 = vmax.f32 %v830_v32, 0.0  ;;  %v917_v9 = vmax.f32 %v850_v7, 0.0 }
 0x125   : > { %v831_v33 = vpop.f32.mrf.mxu0  ;;  %v851_v58 = vpop.f32.mrf.mxu1 }
 0x126   : > { %v832_v34 = vadd.f32 %v831_v33, %v4560_v30  ;;  %v852_v8 = vadd.f32 %v851_v58, %v4560_v30  ;;  %v4583_v33 = vld [vmem:[%s4520_s17] sm:$0xff]  }
 0x128   : > { %v910_v36 = vmax.f32 %v832_v34, 0.0  ;;  %v918_v10 = vmax.f32 %v852_v8, 0.0  ;;  %v4586_v34 = vld [vmem:[%s4526_s15] sm:$0xff]  }
 0x129   : > { %v5784_v39 = vunpack.c.h.bf16 %v4586_v34 }
 0x12a   : > { %v941_v37 = vpack.c.bf16 %v910_v36, %v909_v35  ;;  %v945_v12 = vpack.c.bf16 %v918_v10, %v917_v9  ;;  %v5785_v36 = vunpack.c.l.bf16 %v4583_v33 }
 0x12c   : > { %1030 = vmatmul.bf16.vlgmr.msrb.gmra.mxu1 %v941_v37  ;;  %v5783_v37 = vunpack.c.h.bf16 %v4583_v33 }
 0x12d   : > { %v834_v38 = vpop.f32.mrf.mxu0  ;;  %v854_v1 = vpop.f32.mrf.mxu1 }
 0x12e   : > { %v835_v40 = vadd.f32 %v834_v38, %v4560_v30  ;;  %v855_v18 = vadd.f32 %v854_v1, %v4560_v30  ;;  %v5789_v38 = vunpack.c.l.bf16 %v4586_v34  ;;  %v4614_v1 = vld [vmem:[%s4526_s15 + $0x8] sm:$0xff]  }
 0x12f   : > { %v5782_v4 = vunpack.c.l.bf16 %v4614_v1  ;;  %v5779_v5 = vunpack.c.h.bf16 %v4614_v1 }
 0x130   : > { %v911_v43 = vmax.f32 %v835_v40, 0.0  ;;  %v919_v20 = vmax.f32 %v855_v18, 0.0  ;;  %v4592_v40 = vstv %s1275_s8 }
 0x131   : > { %v1278_v47 = vmul.f32 %v5784_v39, %v4592_v40  ;;  %v1279_v7 = vmul.f32 %v5782_v4, %v4592_v40  ;;  %v1280_v8 = vmul.f32 %v5779_v5, %v4592_v40 }
 0x135   : > { %v836_v41 = vpop.f32.mrf.mxu0  ;;  %v856_v11 = vpop.f32.mrf.mxu1 }
 0x136   : > { %v837_v42 = vadd.f32 %v836_v41, %v4560_v30  ;;  %v857_v19 = vadd.f32 %v856_v11, %v4560_v30  ;;  %v4594_v41 = vstv %s1111_s27 }
 0x138   : > { %v912_v44 = vmax.f32 %v837_v42, 0.0  ;;  %v920_v21 = vmax.f32 %v857_v19, 0.0  ;;  %v1277_v42 = vmul.f32 %v5789_v38, %v4592_v40 }
 0x13a   : > { %v942_v45 = vpack.c.bf16 %v912_v44, %v911_v43  ;;  %v946_v22 = vpack.c.bf16 %v920_v21, %v919_v20  ;;  %v1310_v43 = vmul.f32 %v5785_v36, %v4594_v41  ;;  %v1311_v44 = vmul.f32 %v5783_v37, %v4594_v41 }
 0x13c   : > { %1035 = vmatmul.bf16.gmra.mxu1 %v942_v45  ;;  %v869_v45 = vpop.f32.mrf.mxu2 }
 0x13d   : > { %v839_v46 = vpop.f32.mrf.mxu0  ;;  %v859_v17 = vpop.f32.mrf.mxu1  ;;  %v870_v19 = vadd.f32 %v869_v45, %v4560_v30 }
 0x13e   : > { %v840_v48 = vadd.f32 %v839_v46, %v4560_v30  ;;  %v860_v27 = vadd.f32 %v859_v17, %v4560_v30  ;;  %v3346_v46 = vld [vmem:[#allocation18 + $0x8] sm:$0xff] }
 0x13f   : > { %1830 = vmatpush.bf16.msrb.mxu2 %v3346_v46 }
 0x140   : > { %v913_v51 = vmax.f32 %v840_v48, 0.0  ;;  %v921_v32 = vmax.f32 %v860_v27, 0.0 }
 0x145   : > { %v841_v49 = vpop.f32.mrf.mxu0  ;;  %v861_v23 = vpop.f32.mrf.mxu1 }
 0x146   : > { %v842_v50 = vadd.f32 %v841_v49, %v4560_v30  ;;  %v862_v29 = vadd.f32 %v861_v23, %v4560_v30  ;;  %v1342_v49 = vadd.f32 %v1310_v43, %v1277_v42  ;;  %v4636_v23 = vld [vmem:[%s4520_s17 + $0x10] sm:$0xff]  }
 0x147   : > { %v5773_v26 = vunpack.c.l.bf16 %v4636_v23  ;;  %v5771_v27 = vunpack.c.h.bf16 %v4636_v23 }
 0x148   : > { %v914_v52 = vmax.f32 %v842_v50, 0.0  ;;  %v922_v35 = vmax.f32 %v862_v29, 0.0  ;;  %v1343_v50 = vadd.f32 %v1311_v44, %v1278_v47  ;;  %v5774_v29 = vunpack.c.l.bf16 %v4639_v24 }
 0x149   : > { %v1314_v43 = vmul.f32 %v5773_v26, %v4594_v41  ;;  %v1315_v44 = vmul.f32 %v5771_v27, %v4594_v41 }
 0x14a   : > { %v943_v54 = vpack.c.bf16 %v914_v52, %v913_v51  ;;  %v947_v48 = vpack.c.bf16 %v922_v35, %v921_v32  ;;  %v1438_v51 = vpack.c.bf16 %v1342_v49, %v1342_v49  ;;  %v3345_v52 = vld [vmem:[#allocation18] sm:$0xff]  ;;  %v1439_v53 = vpack.c.bf16 %v1343_v50, %v1343_v50 }
 0x14b   : > { %1831 = vmatpush.bf16.msrb.mxu2 %v3345_v52  ;;  %v5772_v32 = vunpack.c.h.bf16 %v4639_v24  ;;  %v4646_v35 = vperm.slane %v4557_v28, 1  ;;  %v1281_v42 = vmul.f32 %v5774_v29, %v4592_v40  ;;  %v4661_v52 = vstv %s1112_s0 }
 0x14c   : > { %1040 = vmatmul.bf16.gmra.mxu1 %v943_v54  ;;  %v1534_v55 = vunpack.c.l.b16 %v1438_v51 }
 0x14d   : > { %v844_v56 = vpop.f32.mrf.mxu0  ;;  %v864_v31 = vpop.f32.mrf.mxu1  ;;  %v1282_v46 = vmul.f32 %v5772_v32, %v4592_v40 }
 0x14e   : > { %v845_v59 = vadd.f32 %v844_v56, %v4560_v30  ;;  %v1535_v56 = vunpack.c.l.b16 %v1439_v53  ;;  %v865_v58 = vadd.f32 %v864_v31, %v4560_v30 }
 0x14f   : > { %v1347_v49 = vadd.f32 %v1315_v44, %v1282_v46 }
 0x150   : > { %v915_v62 = vmax.f32 %v845_v59, 0.0 }
 0x151   : > { %v1443_v53 = vpack.c.bf16 %v1347_v49, %v1347_v49 }
 0x155   : > { %v846_v60 = vpop.f32.mrf.mxu0  ;;  %v866_v54 = vpop.f32.mrf.mxu1 }
 0x156   : > { %v847_v61 = vadd.f32 %v846_v60, %v4560_v30  ;;  %v867_v59 = vadd.f32 %v866_v54, %v4560_v30  ;;  %v1566_v60 = vpack.c.b16 %v1535_v56, %v1534_v55  ;;  %v1539_v55 = vunpack.c.l.b16 %v1443_v53 }
 0x158   : > { %v916_v63 = vmax.f32 %v847_v61, 0.0  ;;  %v871_v61 = vpop.f32.mrf.mxu2  ;;  %1832 = vmatmul.bf16.vlgmr.msrb.gmra.mxu2 %v1566_v60 }
 0x159   : > { %v872_v21 = vadd.f32 %v871_v61, %v4560_v30 }
 0x15a   : > { %v944_v0 = vpack.c.bf16 %v916_v63, %v915_v62  ;;  %v923_v62 = vmax.f32 %v865_v58, 0.0  ;;  %v924_v63 = vmax.f32 %v867_v59, 0.0 }
 0x15b   : > { %v926_v25 = vmax.f32 %v872_v21, 0.0 }
 0x15c   : > { %1045 = vmatmul.bf16.gmra.mxu1 %v944_v0  ;;  %v4611_v0 = vld [vmem:[%s4520_s17 + $0x8] sm:$0xff]   ;;  %v948_v11 = vpack.c.bf16 %v924_v63, %v923_v62 }
 0x15d   : > { %v5780_v2 = vunpack.c.l.bf16 %v4611_v0  ;;  %v5776_v3 = vunpack.c.h.bf16 %v4611_v0 }
 0x15f   : > { %v1312_v9 = vmul.f32 %v5780_v2, %v4594_v41  ;;  %v1313_v10 = vmul.f32 %v5776_v3, %v4594_v41 }
 0x160   : > { %v874_v15 = vpop.f32.mrf.mxu2 }
 0x161   : > { %v1345_v13 = vadd.f32 %v1313_v10, %v1280_v8  ;;  %v875_v57 = vadd.f32 %v874_v15, %v4560_v30  ;;  %v4669_v8 = vld [vmem:[%s4520_s17 + $0x18] sm:$0xff]  }
 0x163   : > { %v1441_v16 = vpack.c.bf16 %v1345_v13, %v1345_v13  ;;  %v5762_v13 = vunpack.c.h.bf16 %v4669_v8 }
 0x165   : > { %v1537_v18 = vunpack.c.l.b16 %v1441_v16 }
 0x168   : > { %v876_v31 = vpop.f32.mrf.mxu2 }
 0x169   : > { %v877_v61 = vadd.f32 %v876_v31, %v4560_v30 }
 0x16b   : > { %v928_v10 = vmax.f32 %v877_v61, 0.0 }
 0x16c   : > { %1050 = vmatmul.bf16.gmra.mxu1 %v945_v12  ;;  %v1344_v12 = vadd.f32 %v1312_v9, %v1279_v7  ;;  %v927_v7 = vmax.f32 %v875_v57, 0.0  ;;  %v4672_v9 = vld [vmem:[%s4526_s15 + $0x18] sm:$0xff]  }
 0x16d   : > { %v5763_v15 = vunpack.c.h.bf16 %v4672_v9 }
 0x16e   : > { %v1440_v14 = vpack.c.bf16 %v1344_v12, %v1344_v12  ;;  %v5767_v12 = vunpack.c.l.bf16 %v4669_v8 }
 0x170   : > { %v1536_v17 = vunpack.c.l.b16 %v1440_v14  ;;  %v879_v59 = vpop.f32.mrf.mxu2  ;;  %v5769_v14 = vunpack.c.l.bf16 %v4672_v9 }
 0x172   : > { %v1567_v20 = vpack.c.b16 %v1537_v18, %v1536_v17  ;;  %v1316_v18 = vmul.f32 %v5767_v12, %v4594_v41  ;;  %v1283_v21 = vmul.f32 %v5769_v14, %v4592_v40 }
 0x174   : > { %1837 = vmatmul.bf16.gmra.mxu2 %v1567_v20 }
 0x17c   : > { %1055 = vmatmul.bf16.gmra.mxu1 %v946_v22  ;;  %v925_v22 = vmax.f32 %v870_v19, 0.0  ;;  %v1317_v19 = vmul.f32 %v5762_v13, %v4594_v41 }
 0x17e   : > { %v949_v47 = vpack.c.bf16 %v926_v25, %v925_v22  ;;  %v1284_v22 = vmul.f32 %v5763_v15, %v4592_v40  ;;  %v950_v25 = vpack.c.bf16 %v928_v10, %v927_v7  ;;  %v3363_v15 = vld [vmem:[#allocation20 + $0x10] sm:$0xff] }
 0x180   : > { %v1349_v44 = vadd.f32 %v1317_v19, %v1284_v22  ;;  %v889_v19 = vpop.f32.mrf.mxu3 }
 0x18c   : > { %1060 = vmatmul.bf16.gmra.mxu1 %v947_v48  ;;  %v1346_v48 = vadd.f32 %v1314_v43, %v1281_v42  ;;  %v881_v42 = vpop.f32.mrf.mxu2  ;;  %v1348_v43 = vadd.f32 %v1316_v18, %v1283_v21 }
 0x18e   : > { %v1442_v51 = vpack.c.bf16 %v1346_v48, %v1346_v48  ;;  %v1444_v46 = vpack.c.bf16 %v1348_v43, %v1348_v43 }
 0x190   : > { %v1538_v54 = vunpack.c.l.b16 %v1442_v51  ;;  %v1540_v48 = vunpack.c.l.b16 %v1444_v46  ;;  %v880_v51 = vadd.f32 %v879_v59, %v4560_v30 }
 0x192   : > { %v1568_v60 = vpack.c.b16 %v1539_v55, %v1538_v54  ;;  %v882_v55 = vadd.f32 %v881_v42, %v4560_v30 }
 0x194   : > { %1842 = vmatmul.bf16.gmra.mxu2 %v1568_v60  ;;  %v929_v60 = vmax.f32 %v880_v51, 0.0  ;;  %v884_v61 = vpop.f32.mrf.mxu2 }
 0x19c   : > { %1065 = vmatmul.bf16.gmra.mxu1 %v948_v11 }
 0x1a9   : > { %v1031_v45 = vpop.f32.mrf.mxu1 }
 0x1aa   : > { %v1032_v50 = vadd.f32 %v1031_v45, %v4646_v35 }
 0x1ac   : > { %1070 = vmatmul.bf16.gmra.mxu1 %v949_v47  ;;  %v1114_v56 = vmul.f32 %v4661_v52, %v1032_v50  ;;  %v1445_v47 = vpack.c.bf16 %v1349_v44, %v1349_v44 }
 0x1ae   : > { %v1470_v63 = vpack.c.bf16 %v1114_v56, %v1114_v56  ;;  %v1541_v49 = vunpack.c.l.b16 %v1445_v47 }
 0x1b0   : > { %v1630_v16 = vunpack.c.l.b16 %v1470_v63  ;;  %v1569_v54 = vpack.c.b16 %v1541_v49, %v1540_v48  ;;  %v4700_v63 = vld [vmem:[%s4526_s15 + $0x20] sm:$0xff]   ;;  %v886_v49 = vpop.f32.mrf.mxu2 }
 0x1b1   : > { %v1033_v58 = vpop.f32.mrf.mxu1 }
 0x1b2   : > { %v1034_v62 = vadd.f32 %v1033_v58, %v4646_v35  ;;  %1847 = vmatmul.bf16.gmra.mxu2 %v1569_v54  ;;  %v885_v54 = vadd.f32 %v884_v61, %v4560_v30 }
 0x1b4   : > { %v1115_v6 = vmul.f32 %v4661_v52, %v1034_v62  ;;  %v4697_v62 = vld [vmem:[%s4520_s17 + $0x20] sm:$0xff]  }
 0x1b5   : > { %v5752_v59 = vunpack.c.l.bf16 %v4697_v62  ;;  %v5746_v10 = vunpack.c.h.bf16 %v4697_v62 }
 0x1b6   : > { %v1471_v11 = vpack.c.bf16 %v1115_v6, %v1115_v6  ;;  %v930_v6 = vmax.f32 %v882_v55, 0.0 }
 0x1b7   : > { %v1319_v21 = vmul.f32 %v5746_v10, %v4594_v41 }
 0x1b8   : > { %v1631_v17 = vunpack.c.l.b16 %v1471_v11  ;;  %v5757_v11 = vunpack.c.l.bf16 %v4700_v63  ;;  %v951_v42 = vpack.c.bf16 %v930_v6, %v929_v60  ;;  %v891_v60 = vpop.f32.mrf.mxu3 }
 0x1b9   : > { %v1036_v20 = vpop.f32.mrf.mxu1 }
 0x1ba   : > { %v1662_v31 = vpack.c.b16 %v1631_v17, %v1630_v16  ;;  %v1037_v45 = vadd.f32 %v1036_v20, %v4646_v35  ;;  %v5751_v16 = vunpack.c.h.bf16 %v4700_v63  ;;  %v1318_v20 = vmul.f32 %v5752_v59, %v4594_v41  ;;  %v3367_v59 = vld [vmem:[#allocation20 + $0x30] sm:$0xff] }
 0x1bc   : > { %1075 = vmatmul.bf16.gmra.mxu1 %v950_v25  ;;  %1921 = vmatmul.bf16.vlgmr.msrb.gmra.mxu3 %v1662_v31  ;;  %v1116_v50 = vmul.f32 %v4661_v52, %v1037_v45  ;;  %v1285_v25 = vmul.f32 %v5757_v11, %v4592_v40  ;;  %v1286_v31 = vmul.f32 %v5751_v16, %v4592_v40 }
 0x1be   : > { %v1472_v57 = vpack.c.bf16 %v1116_v50, %v1116_v50  ;;  %v1350_v44 = vadd.f32 %v1318_v20, %v1285_v25  ;;  %v1351_v45 = vadd.f32 %v1319_v21, %v1286_v31  ;;  %v4728_v20 = vld [vmem:[%s4526_s15 + $0x28] sm:$0xff]  }
 0x1bf   : > { %v5741_v31 = vunpack.c.l.bf16 %v4728_v20 }
 0x1c0   : > { %v1632_v17 = vunpack.c.l.b16 %v1472_v57  ;;  %v1446_v47 = vpack.c.bf16 %v1350_v44, %v1350_v44  ;;  %v1447_v48 = vpack.c.bf16 %v1351_v45, %v1351_v45  ;;  %v887_v57 = vadd.f32 %v886_v49, %v4560_v30 }
 0x1c1   : > { %v1038_v53 = vpop.f32.mrf.mxu1 }
 0x1c2   : > { %v1039_v56 = vadd.f32 %v1038_v53, %v4646_v35  ;;  %v1542_v50 = vunpack.c.l.b16 %v1446_v47  ;;  %v1543_v51 = vunpack.c.l.b16 %v1447_v48  ;;  %v932_v21 = vmax.f32 %v887_v57, 0.0 }
 0x1c3   : > { %v1287_v48 = vmul.f32 %v5741_v31, %v4592_v40 }
 0x1c4   : > { %v1117_v58 = vmul.f32 %v4661_v52, %v1039_v56  ;;  %v1570_v56 = vpack.c.b16 %v1543_v51, %v1542_v50 }
 0x1c6   : > { %v1473_v7 = vpack.c.bf16 %v1117_v58, %v1117_v58  ;;  %1852 = vmatmul.bf16.gmra.mxu2 %v1570_v56  ;;  %v894_v56 = vpop.f32.mrf.mxu3 }
 0x1c7   : > { %v895_v31 = vadd.f32 %v894_v56, %v4560_v30 }
 0x1c8   : > { %v1633_v18 = vunpack.c.l.b16 %v1473_v7 }
 0x1c9   : > { %v1041_v22 = vpop.f32.mrf.mxu1 }
 0x1ca   : > { %v1663_v43 = vpack.c.b16 %v1633_v18, %v1632_v17  ;;  %v1042_v46 = vadd.f32 %v1041_v22, %v4646_v35  ;;  %v931_v17 = vmax.f32 %v885_v54, 0.0  ;;  %v4725_v18 = vld [vmem:[%s4520_s17 + $0x28] sm:$0xff]  }
 0x1cb   : > { %v5740_v61 = vunpack.c.l.bf16 %v4725_v18  ;;  %v5735_v25 = vunpack.c.h.bf16 %v4725_v18 }
 0x1cc   : > { %1080 = vmatmul.bf16.gmra.mxu1 %v951_v42  ;;  %1926 = vmatmul.bf16.gmra.mxu3 %v1663_v43  ;;  %v1118_v53 = vmul.f32 %v4661_v52, %v1042_v46  ;;  %v5736_v42 = vunpack.c.h.bf16 %v4728_v20  ;;  %v952_v50 = vpack.c.bf16 %v932_v21, %v931_v17  ;;  %v892_v21 = vadd.f32 %v891_v60, %v4560_v30 }
 0x1cd   : > { %v1320_v45 = vmul.f32 %v5740_v61, %v4594_v41  ;;  %v1321_v46 = vmul.f32 %v5735_v25, %v4594_v41  ;;  %v890_v25 = vadd.f32 %v889_v19, %v4560_v30 }
 0x1ce   : > { %v1474_v6 = vpack.c.bf16 %v1118_v53, %v1118_v53  ;;  %v1288_v49 = vmul.f32 %v5736_v42, %v4592_v40 }
 0x1cf   : > { %v1352_v53 = vadd.f32 %v1320_v45, %v1287_v48  ;;  %v4756_v48 = vld [vmem:[%s4526_s15 + $0x30] sm:$0xff]  }
 0x1d0   : > { %v1634_v43 = vunpack.c.l.b16 %v1474_v6  ;;  %v1353_v54 = vadd.f32 %v1321_v46, %v1288_v49  ;;  %v933_v46 = vmax.f32 %v890_v25, 0.0  ;;  %v934_v49 = vmax.f32 %v892_v21, 0.0 }
 0x1d1   : > { %v1043_v55 = vpop.f32.mrf.mxu1  ;;  %v1448_v57 = vpack.c.bf16 %v1352_v53, %v1352_v53  ;;  %v5739_v60 = vunpack.c.l.bf16 %v4756_v48 }
 0x1d2   : > { %v1044_v58 = vadd.f32 %v1043_v55, %v4646_v35 }
 0x1d3   : > { %v1544_v6 = vunpack.c.l.b16 %v1448_v57 }
 0x1d4   : > { %v1119_v7 = vmul.f32 %v4661_v52, %v1044_v58  ;;  %v1449_v58 = vpack.c.bf16 %v1353_v54, %v1353_v54 }
 0x1d6   : > { %v1475_v22 = vpack.c.bf16 %v1119_v7, %v1119_v7  ;;  %v1545_v7 = vunpack.c.l.b16 %v1449_v58 }
 0x1d8   : > { %v1635_v44 = vunpack.c.l.b16 %v1475_v22  ;;  %v1571_v17 = vpack.c.b16 %v1545_v7, %v1544_v6  ;;  %v1289_v6 = vmul.f32 %v5739_v60, %v4592_v40 }
 0x1d9   : > { %v1046_v47 = vpop.f32.mrf.mxu1 }
 0x1da   : > { %v1664_v51 = vpack.c.b16 %v1635_v44, %v1634_v43  ;;  %v1047_v55 = vadd.f32 %v1046_v47, %v4646_v35  ;;  %1857 = vmatmul.bf16.gmra.mxu2 %v1571_v17  ;;  %v4753_v47 = vld [vmem:[%s4520_s17 + $0x30] sm:$0xff]  }
 0x1db   : > { %v5738_v19 = vunpack.c.l.bf16 %v4753_v47  ;;  %v5737_v53 = vunpack.c.h.bf16 %v4753_v47 }
 0x1dc   : > { %1085 = vmatmul.bf16.gmra.mxu1 %v952_v50  ;;  %1931 = vmatmul.bf16.gmra.mxu3 %v1664_v51  ;;  %v1120_v22 = vmul.f32 %v4661_v52, %v1047_v55  ;;  %v896_v51 = vpop.f32.mrf.mxu3 }
 0x1dd   : > { %v1322_v25 = vmul.f32 %v5738_v19, %v4594_v41  ;;  %v1323_v57 = vmul.f32 %v5737_v53, %v4594_v41 }
 0x1de   : > { %v1476_v44 = vpack.c.bf16 %v1120_v22, %v1120_v22  ;;  %v953_v22 = vpack.c.bf16 %v934_v49, %v933_v46  ;;  %v897_v46 = vadd.f32 %v896_v51, %v4560_v30 }
 0x1e0   : > { %v1636_v54 = vunpack.c.l.b16 %v1476_v44 }
 0x1e1   : > { %v1048_v42 = vpop.f32.mrf.mxu1 }
 0x1e2   : > { %v1049_v43 = vadd.f32 %v1048_v42, %v4646_v35  ;;  %v5745_v42 = vunpack.c.h.bf16 %v4756_v48 }
 0x1e4   : > { %v1121_v45 = vmul.f32 %v4661_v52, %v1049_v43  ;;  %v1290_v7 = vmul.f32 %v5745_v42, %v4592_v40  ;;  %v1354_v43 = vadd.f32 %v1322_v25, %v1289_v6  ;;  %v899_v61 = vpop.f32.mrf.mxu3  ;;  %v936_v6 = vmax.f32 %v897_v46, 0.0 }
 0x1e5   : > { %v900_v10 = vadd.f32 %v899_v61, %v4560_v30 }
 0x1e6   : > { %v1477_v50 = vpack.c.bf16 %v1121_v45, %v1121_v45  ;;  %v1355_v44 = vadd.f32 %v1323_v57, %v1290_v7  ;;  %v1450_v45 = vpack.c.bf16 %v1354_v43, %v1354_v43  ;;  %v4781_v7 = vld [vmem:[%s4520_s17 + $0x38] sm:$0xff]  }
 0x1e7   : > { %v5744_v56 = vunpack.c.h.bf16 %v4781_v7 }
 0x1e8   : > { %v1637_v55 = vunpack.c.l.b16 %v1477_v50  ;;  %v1451_v50 = vpack.c.bf16 %v1355_v44, %v1355_v44  ;;  %v1546_v19 = vunpack.c.l.b16 %v1450_v45 }
 0x1e9   : > { %v1051_v58 = vpop.f32.mrf.mxu1  ;;  %v1325_v44 = vmul.f32 %v5744_v56, %v4594_v41 }
 0x1ea   : > { %v1665_v17 = vpack.c.b16 %v1637_v55, %v1636_v54  ;;  %v1052_v21 = vadd.f32 %v1051_v58, %v4646_v35  ;;  %v1547_v60 = vunpack.c.l.b16 %v1451_v50  ;;  %v935_v58 = vmax.f32 %v895_v31, 0.0 }
 0x1ec   : > { %1090 = vmatmul.bf16.gmra.mxu1 %v953_v22  ;;  %1936 = vmatmul.bf16.gmra.mxu3 %v1665_v17  ;;  %v1122_v53 = vmul.f32 %v4661_v52, %v1052_v21  ;;  %v1572_v54 = vpack.c.b16 %v1547_v60, %v1546_v19  ;;  %v4784_v22 = vld [vmem:[%s4526_s15 + $0x38] sm:$0xff]   ;;  %v5742_v21 = vunpack.c.l.bf16 %v4781_v7  ;;  %v954_v46 = vpack.c.bf16 %v936_v6, %v935_v58 }
 0x1ed   : > { %v5743_v51 = vunpack.c.l.bf16 %v4784_v22  ;;  %v5749_v60 = vunpack.c.h.bf16 %v4784_v22 }
 0x1ee   : > { %v1478_v25 = vpack.c.bf16 %v1122_v53, %v1122_v53  ;;  %1862 = vmatmul.bf16.gmra.mxu2 %v1572_v54  ;;  %v1324_v43 = vmul.f32 %v5742_v21, %v4594_v41  ;;  %v901_v54 = vpop.f32.mrf.mxu3 }
 0x1ef   : > { %v1291_v31 = vmul.f32 %v5743_v51, %v4592_v40  ;;  %v1292_v50 = vmul.f32 %v5749_v60, %v4592_v40  ;;  %v902_v58 = vadd.f32 %v901_v54, %v4560_v30 }
 0x1f0   : > { %v1638_v19 = vunpack.c.l.b16 %v1478_v25 }
 0x1f1   : > { %v1053_v49 = vpop.f32.mrf.mxu1 }
 0x1f2   : > { %v1054_v55 = vadd.f32 %v1053_v49, %v4646_v35 }
 0x1f4   : > { %v1123_v57 = vmul.f32 %v4661_v52, %v1054_v55  ;;  %v1356_v55 = vadd.f32 %v1324_v43, %v1291_v31 }
 0x1f6   : > { %v1479_v17 = vpack.c.bf16 %v1123_v57, %v1123_v57  ;;  %v1357_v57 = vadd.f32 %v1325_v44, %v1292_v50  ;;  %v904_v44 = vpop.f32.mrf.mxu3  ;;  %v938_v50 = vmax.f32 %v902_v58, 0.0 }
 0x1f8   : > { %v1639_v53 = vunpack.c.l.b16 %v1479_v17  ;;  %v1452_v17 = vpack.c.bf16 %v1356_v55, %v1356_v55  ;;  %v1453_v21 = vpack.c.bf16 %v1357_v57, %v1357_v57  ;;  %v3368_v55 = vld [vmem:[#allocation20 + $0x38] sm:$0xff] }
 0x1f9   : > { %v1056_v45 = vpop.f32.mrf.mxu1  ;;  %2404 = vmatpush.bf16.msrb.mxu0 %v3368_v55 }
 0x1fa   : > { %v1666_v49 = vpack.c.b16 %v1639_v53, %v1638_v19  ;;  %v1057_v25 = vadd.f32 %v1056_v45, %v4646_v35  ;;  %v1548_v51 = vunpack.c.l.b16 %v1452_v17  ;;  %v1549_v42 = vunpack.c.l.b16 %v1453_v21 }
 0x1fb   : > { %v937_v45 = vmax.f32 %v900_v10, 0.0 }
 0x1fc   : > { %1095 = vmatmul.bf16.gmra.mxu1 %v954_v46  ;;  %1941 = vmatmul.bf16.gmra.mxu3 %v1666_v49  ;;  %v1124_v56 = vmul.f32 %v4661_v52, %v1057_v25  ;;  %v1573_v19 = vpack.c.b16 %v1549_v42, %v1548_v51  ;;  %v4809_v46 = vld [vmem:[%s4520_s17 + $0x40] sm:$0xff]  }
 0x1fd   : > { %v4812_v49 = vld [vmem:[%s4526_s15 + $0x40] sm:$0xff]   ;;  %v5748_v61 = vunpack.c.l.bf16 %v4809_v46  ;;  %v5750_v54 = vunpack.c.h.bf16 %v4809_v46  ;;  %2405 = vmatpush.bf16.msrb.mxu0 %v3367_v59 }
 0x1fe   : > { %v1480_v31 = vpack.c.bf16 %v1124_v56, %v1124_v56  ;;  %1867 = vmatmul.bf16.gmra.mxu2 %v1573_v19  ;;  %v5747_v42 = vunpack.c.l.bf16 %v4812_v49  ;;  %v5753_v56 = vunpack.c.h.bf16 %v4812_v49  ;;  %v955_v19 = vpack.c.bf16 %v938_v50, %v937_v45 }
 0x1ff   : > { %v1326_v57 = vmul.f32 %v5748_v61, %v4594_v41  ;;  %v1327_v17 = vmul.f32 %v5750_v54, %v4594_v41  ;;  %v906_v61 = vpop.f32.mrf.mxu3 }
 0x200   : > { %v1640_v51 = vunpack.c.l.b16 %v1480_v31  ;;  %v1293_v10 = vmul.f32 %v5747_v42, %v4592_v40  ;;  %v907_v45 = vadd.f32 %v906_v61, %v4560_v30 }
 0x201   : > { %v1058_v6 = vpop.f32.mrf.mxu1 }
 0x202   : > { %v1059_v53 = vadd.f32 %v1058_v6, %v4646_v35  ;;  %v1294_v6 = vmul.f32 %v5753_v56, %v4592_v40  ;;  %v1358_v31 = vadd.f32 %v1326_v57, %v1293_v10  ;;  %v905_v56 = vadd.f32 %v904_v44, %v4560_v30 }
 0x204   : > { %v1125_v43 = vmul.f32 %v4661_v52, %v1059_v53  ;;  %v1454_v55 = vpack.c.bf16 %v1358_v31, %v1358_v31 }
 0x206   : > { %v1481_v21 = vpack.c.bf16 %v1125_v43, %v1125_v43  ;;  %v1359_v43 = vadd.f32 %v1327_v17, %v1294_v6  ;;  %v1550_v60 = vunpack.c.l.b16 %v1454_v55  ;;  %v939_v17 = vmax.f32 %v905_v56, 0.0  ;;  %v4837_v6 = vld [vmem:[%s4520_s17 + $0x48] sm:$0xff]  }
 0x207   : > { %v5754_v30 = vunpack.c.l.bf16 %v4837_v6 }
 0x208   : > { %v1641_v25 = vunpack.c.l.b16 %v1481_v21  ;;  %v1455_v42 = vpack.c.bf16 %v1359_v43, %v1359_v43 }
 0x209   : > { %v1061_v58 = vpop.f32.mrf.mxu1  ;;  %v1328_v31 = vmul.f32 %v5754_v30, %v4594_v41 }
 0x20a   : > { %v1667_v53 = vpack.c.b16 %v1641_v25, %v1640_v51  ;;  %v1062_v21 = vadd.f32 %v1061_v58, %v4646_v35  ;;  %v1551_v54 = vunpack.c.l.b16 %v1455_v42  ;;  %v940_v58 = vmax.f32 %v907_v45, 0.0  ;;  %v4840_v42 = vld [vmem:[%s4526_s15 + $0x48] sm:$0xff]  }
 0x20b   : > { %v5756_v44 = vunpack.c.l.bf16 %v4840_v42  ;;  %v5755_v59 = vunpack.c.h.bf16 %v4840_v42 }
 0x20c   : > { %1100 = vmatmul.bf16.gmra.mxu1 %v955_v19  ;;  %1946 = vmatmul.bf16.gmra.mxu3 %v1667_v53  ;;  %v1126_v16 = vmul.f32 %v4661_v52, %v1062_v21  ;;  %v1574_v51 = vpack.c.b16 %v1551_v54, %v1550_v60  ;;  %v4842_v53 = vpop.f32.mrf.mxu2  ;;  %v5758_v60 = vunpack.c.h.bf16 %v4837_v6  ;;  %v3366_v54 = vld [vmem:[#allocation20 + $0x28] sm:$0xff]  ;;  %v956_v45 = vpack.c.bf16 %v940_v58, %v939_v17 }
 0x20d   : > { %v1295_v56 = vmul.f32 %v5756_v44, %v4592_v40  ;;  %v1296_v21 = vmul.f32 %v5755_v59, %v4592_v40  ;;  %2406 = vmatpush.bf16.msrb.mxu0 %v3366_v54 }
 0x20e   : > { %1872 = vmatmul.bf16.gmra.mxu2 %v1574_v51  ;;  %v1482_v10 = vpack.c.bf16 %v1126_v16, %v1126_v16  ;;  %v1329_v55 = vmul.f32 %v5758_v60, %v4594_v41  ;;  %v3365_v60 = vld [vmem:[#allocation20 + $0x20] sm:$0xff] }
 0x20f   : > { %v1360_v51 = vadd.f32 %v1328_v31, %v1295_v56  ;;  %v4867_v56 = vld [vmem:[%s4520_s17 + $0x50] sm:$0xff]  }
 0x210   : > { %v1642_v16 = vunpack.c.l.b16 %v1482_v10  ;;  %v1361_v10 = vadd.f32 %v1329_v55, %v1296_v21  ;;  %v4870_v31 = vld [vmem:[%s4526_s15 + $0x50] sm:$0xff]   ;;  %v5759_v55 = vunpack.c.l.bf16 %v4867_v56 }
 0x211   : > { %v1063_v50 = vpop.f32.mrf.mxu1  ;;  %2407 = vmatpush.bf16.msrb.mxu0 %v3365_v60  ;;  %v5764_v60 = vunpack.c.h.bf16 %v4870_v31 }
 0x212   : > { %v1064_v25 = vadd.f32 %v1063_v50, %v4646_v35 }
 0x214   : > { %v1127_v57 = vmul.f32 %v4661_v52, %v1064_v25  ;;  %v4861_v30 = vpop.f32.mrf.mxu2 }
 0x216   : > { %v1483_v19 = vpack.c.bf16 %v1127_v57, %v1127_v57  ;;  %v1456_v57 = vpack.c.bf16 %v1360_v51, %v1360_v51  ;;  %v1330_v51 = vmul.f32 %v5759_v55, %v4594_v41 }
 0x218   : > { %v1643_v61 = vunpack.c.l.b16 %v1483_v19  ;;  %v1457_v19 = vpack.c.bf16 %v1361_v10, %v1361_v10  ;;  %v1552_v59 = vunpack.c.l.b16 %v1456_v57  ;;  %v1298_v57 = vmul.f32 %v5764_v60, %v4592_v40 }
 0x219   : > { %v1066_v43 = vpop.f32.mrf.mxu1 }
 0x21a   : > { %v1668_v50 = vpack.c.b16 %v1643_v61, %v1642_v16  ;;  %v1067_v25 = vadd.f32 %v1066_v43, %v4646_v35  ;;  %v1553_v11 = vunpack.c.l.b16 %v1457_v19 }
 0x21c   : > { %1105 = vmatmul.bf16.gmra.mxu1 %v956_v45  ;;  %1951 = vmatmul.bf16.gmra.mxu3 %v1668_v50  ;;  %v1128_v44 = vmul.f32 %v4661_v52, %v1067_v25  ;;  %v1575_v58 = vpack.c.b16 %v1553_v11, %v1552_v59  ;;  %v4872_v21 = vpop.f32.mrf.mxu2  ;;  %v5760_v45 = vunpack.c.h.bf16 %v4867_v56  ;;  %v5761_v11 = vunpack.c.l.bf16 %v4870_v31 }
 0x21e   : > { %v1484_v61 = vpack.c.bf16 %v1128_v44, %v1128_v44  ;;  %1877 = vmatmul.bf16.gmra.mxu2 %v1575_v58  ;;  %v1297_v50 = vmul.f32 %v5761_v11, %v4592_v40  ;;  %v1331_v25 = vmul.f32 %v5760_v45, %v4594_v41 }
 0x220   : > { %v1644_v59 = vunpack.c.l.b16 %v1484_v61  ;;  %v1362_v58 = vadd.f32 %v1330_v51, %v1297_v50  ;;  %v1726_v50 = vmul.f32 %v4594_v41, %v4557_v28 }
 0x221   : > { %v1068_v17 = vpop.f32.mrf.mxu1 }
 0x222   : > { %v1069_v16 = vadd.f32 %v1068_v17, %v4646_v35  ;;  %v3364_v17 = vld [vmem:[#allocation20 + $0x18] sm:$0xff] }
 0x223   : > { %2408 = vmatpush.bf16.msrb.mxu0 %v3364_v17 }
 0x224   : > { %v1129_v54 = vmul.f32 %v4661_v52, %v1069_v16  ;;  %v1363_v16 = vadd.f32 %v1331_v25, %v1298_v57  ;;  %v4891_v55 = vpop.f32.mrf.mxu2  ;;  %v4902_v57 = vld [vmem:[%s4526_s15 + $0x58] sm:$0xff]  }
 0x225   : > { %v5768_v28 = vunpack.c.h.bf16 %v4902_v57 }
 0x226   : > { %v1485_v43 = vpack.c.bf16 %v1129_v54, %v1129_v54  ;;  %v1458_v54 = vpack.c.bf16 %v1362_v58, %v1362_v58 }
 0x227   : > { %2409 = vmatpush.bf16.msrb.mxu0 %v3363_v15  ;;  %v5765_v15 = vunpack.c.l.bf16 %v4902_v57 }
 0x228   : > { %v1645_v44 = vunpack.c.l.b16 %v1485_v43  ;;  %v1459_v43 = vpack.c.bf16 %v1363_v16, %v1363_v16  ;;  %v1554_v45 = vunpack.c.l.b16 %v1458_v54  ;;  %v3362_v16 = vld [vmem:[#allocation20 + $0x8] sm:$0xff] }
 0x229   : > { %v1071_v10 = vpop.f32.mrf.mxu1 }
 0x22a   : > { %v1669_v19 = vpack.c.b16 %v1645_v44, %v1644_v59  ;;  %v1072_v61 = vadd.f32 %v1071_v10, %v4646_v35  ;;  %v1555_v11 = vunpack.c.l.b16 %v1459_v43  ;;  %v4899_v10 = vld [vmem:[%s4520_s17 + $0x58] sm:$0xff]  }
 0x22b   : > { %v5766_v58 = vunpack.c.l.bf16 %v4899_v10  ;;  %2410 = vmatpush.bf16.msrb.mxu0 %v3362_v16 }
 0x22c   : > { %1956 = vmatmul.bf16.gmra.mxu3 %v1669_v19  ;;  %v1130_v13 = vmul.f32 %v4661_v52, %v1072_v61  ;;  %v1576_v59 = vpack.c.b16 %v1555_v11, %v1554_v45  ;;  %v4904_v17 = vpop.f32.mrf.mxu2  ;;  %v5770_v45 = vunpack.c.h.bf16 %v4899_v10  ;;  %v4909_v11 = vperm.slane %v1726_v50, 2 }
 0x22d   : > { %v1299_v61 = vmul.f32 %v5765_v15, %v4592_v40  ;;  %v1332_v54 = vmul.f32 %v5766_v58, %v4594_v41 }
 0x22e   : > { %1882 = vmatmul.bf16.gmra.mxu2 %v1576_v59  ;;  %v1486_v51 = vpack.c.bf16 %v1130_v13, %v1130_v13  ;;  %v1300_v59 = vmul.f32 %v5768_v28, %v4592_v40  ;;  %v4930_v28 = vld [vmem:[%s5849_s6] sm:$0xff]  ;;  %v1839_v3 = vadd.f32 %v4872_v21, %v4909_v11 }
 0x22f   : > { %v4933_v14 = vperm.slane %v4930_v28, 3 }
 0x230   : > { %v1646_v13 = vunpack.c.l.b16 %v1486_v51  ;;  %v1364_v51 = vadd.f32 %v1332_v54, %v1299_v61 }
 0x231   : > { %v1073_v60 = vpop.f32.mrf.mxu1 }
 0x232   : > { %v1074_v44 = vadd.f32 %v1073_v60, %v4646_v35  ;;  %v1460_v58 = vpack.c.bf16 %v1364_v51, %v1364_v51 }
 0x234   : > { %v1131_v25 = vmul.f32 %v4661_v52, %v1074_v44  ;;  %v1333_v44 = vmul.f32 %v5770_v45, %v4594_v41 }
 0x236   : > { %v1487_v19 = vpack.c.bf16 %v1131_v25, %v1131_v25  ;;  %v1365_v25 = vadd.f32 %v1333_v44, %v1300_v59 }
 0x238   : > { %v1647_v60 = vunpack.c.l.b16 %v1487_v19  ;;  %v1834_v19 = vadd.f32 %v4842_v53, %v4909_v11  ;;  %v1461_v12 = vpack.c.bf16 %v1365_v25, %v1365_v25 }
 0x239   : > { %v1076_v43 = vpop.f32.mrf.mxu1 }
 0x23a   : > { %v1670_v50 = vpack.c.b16 %v1647_v60, %v1646_v13  ;;  %v1077_v15 = vadd.f32 %v1076_v43, %v4646_v35  ;;  %v4935_v13 = vpop.f32.mrf.mxu2  ;;  %v1556_v60 = vunpack.c.l.b16 %v1460_v58  ;;  %v1557_v53 = vunpack.c.l.b16 %v1461_v12  ;;  %v3361_v43 = vld [vmem:[#allocation20] sm:$0xff] }
 0x23b   : > { %2411 = vmatpush.bf16.msrb.mxu0 %v3361_v43  ;;  %v1836_v12 = vadd.f32 %v4861_v30, %v4909_v11 }
 0x23c   : > { %1961 = vmatmul.bf16.gmra.mxu3 %v1670_v50  ;;  %v1132_v61 = vmul.f32 %v4661_v52, %v1077_v15  ;;  %v1577_v44 = vpack.c.b16 %v1557_v53, %v1556_v60  ;;  %v4948_v15 = vld [vmem:[%s4520_s17 + $0x60] sm:$0xff]  }
 0x23d   : > { %5851 = vst [vmem:[#allocation44_spill] sm:$0xff] %v4948_v15 }
 0x23e   : > { %1887 = vmatmul.bf16.gmra.mxu2 %v1577_v44  ;;  %v1488_v25 = vpack.c.bf16 %v1132_v61, %v1132_v61  ;;  %v5781_v61 = vunpack.c.h.bf16 %v4948_v15 }
 0x23f   : > { %v1922_v16 = vpop.f32.mrf.mxu3 }
 0x240   : > { %v1923_v54 = vadd.f32 %v1922_v16, %v1834_v19  ;;  %v4951_v19 = vld [vmem:[%s4526_s15 + $0x60] sm:$0xff]  }
 0x241   : > { %v1078_v59 = vpop.f32.mrf.mxu1  ;;  %5852 = vst [vmem:[#allocation45_spill] sm:$0xff] %v4951_v19  ;;  %v5777_v44 = vunpack.c.h.bf16 %v4951_v19 }
 0x242   : > { %v4939_v50 = vadd.f32 %v4933_v14, %v1923_v54  ;;  %v1079_v51 = vadd.f32 %v1078_v59, %v4646_v35  ;;  %v4954_v53 = vpop.f32.mrf.mxu2  ;;  %v5778_v54 = vunpack.c.l.bf16 %v4948_v15  ;;  %v5775_v59 = vunpack.c.l.bf16 %v4951_v19 }
 0x244   : > { %v2035_v58 = vmul.f32 %v4939_v50, %v4939_v50  ;;  %v1133_v45 = vmul.f32 %v4661_v52, %v1079_v51  ;;  %v1648_v51 = vunpack.c.l.b16 %v1488_v25  ;;  %v1334_v29 = vmul.f32 %v5778_v54, %v4594_v41 }
 0x245   : > { %v1335_v25 = vmul.f32 %v5781_v61, %v4594_v41 }
 0x246   : > { %v2067_v60 = vmul.f32 %v2035_v58, %v4939_v50  ;;  %v1489_v16 = vpack.c.bf16 %v1133_v45, %v1133_v45  ;;  %v1301_v45 = vmul.f32 %v5775_v59, %v4592_v40  ;;  %v1302_v58 = vmul.f32 %v5777_v44, %v4592_v40 }
 0x247   : > { %v1924_v43 = vpop.f32.mrf.mxu3 }
 0x248   : > { %v2099_v30 = vmul.f32 0.044715, %v2067_v60  ;;  %v1649_v27 = vunpack.c.l.b16 %v1489_v16  ;;  %v1925_v32 = vadd.f32 %v1924_v43, %v1836_v12  ;;  %v1366_v43 = vadd.f32 %v1334_v29, %v1301_v45 }
 0x249   : > { %v1081_v26 = vpop.f32.mrf.mxu1  ;;  %v1367_v59 = vadd.f32 %v1335_v25, %v1302_v58 }
 0x24a   : > { %v2131_v60 = vadd.f32 %v2099_v30, %v4939_v50  ;;  %v4974_v12 = vadd.f32 %v4933_v14, %v1925_v32  ;;  %v1671_v16 = vpack.c.b16 %v1649_v27, %v1648_v51  ;;  %v1082_v54 = vadd.f32 %v1081_v26, %v4646_v35  ;;  %v4982_v4 = vpop.f32.mrf.mxu2 }
 0x24b   : > { %v1462_v2 = vpack.c.bf16 %v1366_v43, %v1366_v43  ;;  %v1463_v61 = vpack.c.bf16 %v1367_v59, %v1367_v59 }
 0x24c   : > { %v2036_v44 = vmul.f32 %v4974_v12, %v4974_v12  ;;  %1966 = vmatmul.bf16.gmra.mxu3 %v1671_v16  ;;  %v2163_v5 = vmul.f32 0.7978846, %v2131_v60  ;;  %v1134_v21 = vmul.f32 %v4661_v52, %v1082_v54  ;;  %v4999_v54 = vld [vmem:[%s4526_s15 + $0x68] sm:$0xff]  }
 0x24d   : > { %v1558_v27 = vunpack.c.l.b16 %v1462_v2  ;;  %v1559_v29 = vunpack.c.l.b16 %v1463_v61  ;;  %5854 = vst [vmem:[#allocation47_spill] sm:$0xff] %v4999_v54 }
 0x24e   : > { %v2068_v30 = vmul.f32 %v2036_v44, %v4974_v12  ;;  %3738 = vtanh.f32 %v2163_v5  ;;  %v1490_v60 = vpack.c.bf16 %v1134_v21, %v1134_v21  ;;  %v4996_v5 = vld [vmem:[%s4520_s17 + $0x68] sm:$0xff]  }
 0x24f   : > { %v1927_v32 = vpop.f32.mrf.mxu3  ;;  %v1578_v26 = vpack.c.b16 %v1559_v29, %v1558_v27  ;;  %5853 = vst [vmem:[#allocation46_spill] sm:$0xff] %v4996_v5  ;;  %v5787_v29 = vunpack.c.l.bf16 %v4996_v5  ;;  %v5792_v21 = vunpack.c.h.bf16 %v4996_v5 }
 0x250   : > { %v2100_v51 = vmul.f32 0.044715, %v2068_v30  ;;  %v1928_v45 = vadd.f32 %v1927_v32, %v1839_v3  ;;  %v1841_v3 = vadd.f32 %v4891_v55, %v4909_v11  ;;  %v5786_v55 = vunpack.c.h.bf16 %v4999_v54 }
 0x251   : > { %v1083_v58 = vpop.f32.mrf.mxu1  ;;  %1892 = vmatmul.bf16.gmra.mxu2 %v1578_v26 }
 0x252   : > { %v4986_v25 = vadd.f32 %v4933_v14, %v1928_v45  ;;  %v1084_v59 = vadd.f32 %v1083_v58, %v4646_v35  ;;  %v2132_v44 = vadd.f32 %v2100_v51, %v4974_v12  ;;  %v5002_v27 = vpop.f32.mrf.mxu2  ;;  %v5788_v45 = vunpack.c.l.bf16 %v4999_v54 }
 0x253   : > { %v1650_v58 = vunpack.c.l.b16 %v1490_v60 }
 0x254   : > { %v2037_v2 = vmul.f32 %v4986_v25, %v4986_v25  ;;  %v1135_v61 = vmul.f32 %v4661_v52, %v1084_v59  ;;  %v2164_v16 = vmul.f32 0.7978846, %v2132_v44  ;;  %v3739_v43 = vpop.eup %3738 }
 0x255   : > { %v2227_v39 = vadd.f32 1.0, %v3739_v43  ;;  %v1337_v43 = vmul.f32 %v5792_v21, %v4594_v41 }
 0x256   : > { %v2069_v30 = vmul.f32 %v2037_v2, %v4986_v25  ;;  %v1491_v32 = vpack.c.bf16 %v1135_v61, %v1135_v61  ;;  %3740 = vtanh.f32 %v2164_v16  ;;  %v1303_v2 = vmul.f32 %v5788_v45, %v4592_v40 }
 0x257   : > { %v1929_v51 = vpop.f32.mrf.mxu3  ;;  %v1304_v61 = vmul.f32 %v5786_v55, %v4592_v40  ;;  %v1336_v16 = vmul.f32 %v5787_v29, %v4594_v41 }
 0x258   : > { %v1651_v26 = vunpack.c.l.b16 %v1491_v32  ;;  %v1930_v59 = vadd.f32 %v1929_v51, %v1841_v3  ;;  %v2101_v44 = vmul.f32 0.044715, %v2069_v30  ;;  %v1844_v51 = vadd.f32 %v4904_v17, %v4909_v11 }
 0x259   : > { %v1086_v37 = vpop.f32.mrf.mxu1  ;;  %v1368_v30 = vadd.f32 %v1336_v16, %v1303_v2 }
 0x25a   : > { %v5018_v36 = vadd.f32 %v4933_v14, %v1930_v59  ;;  %v1672_v60 = vpack.c.b16 %v1651_v26, %v1650_v58  ;;  %v2133_v3 = vadd.f32 %v2101_v44, %v4986_v25  ;;  %v1087_v29 = vadd.f32 %v1086_v37, %v4646_v35  ;;  %v5030_v5 = vpop.f32.mrf.mxu2 }
 0x25b   : > { %v2259_v58 = vmul.f32 0.5, %v2227_v39  ;;  %v1369_v26 = vadd.f32 %v1337_v43, %v1304_v61  ;;  %v1464_v44 = vpack.c.bf16 %v1368_v30, %v1368_v30 }
 0x25c   : > { %v3741_v32 = vpop.eup %3740  ;;  %v2038_v55 = vmul.f32 %v5018_v36, %v5018_v36  ;;  %1971 = vmatmul.bf16.gmra.mxu3 %v1672_v60  ;;  %v2165_v59 = vmul.f32 0.7978846, %v2133_v3  ;;  %v1136_v17 = vmul.f32 %v4661_v52, %v1087_v29 }
 0x25d   : > { %v2228_v45 = vadd.f32 1.0, %v3741_v32  ;;  %v1465_v21 = vpack.c.bf16 %v1369_v26, %v1369_v26  ;;  %v1560_v54 = vunpack.c.l.b16 %v1464_v44  ;;  %v2291_v60 = vmul.f32 %v2259_v58, %v4939_v50 }
 0x25e   : > { %v2070_v38 = vmul.f32 %v2038_v55, %v5018_v36  ;;  %3742 = vtanh.f32 %v2165_v59  ;;  %v1492_v30 = vpack.c.bf16 %v1136_v17, %v1136_v17 }
 0x25f   : > { %v1932_v2 = vpop.f32.mrf.mxu3  ;;  %v2260_v16 = vmul.f32 0.5, %v2228_v45  ;;  %v1561_v61 = vunpack.c.l.b16 %v1465_v21  ;;  %v5049_v21 = vld [vmem:[%s4526_s15 + $0x70] sm:$0xff]  }
 0x260   : > { %v1933_v15 = vadd.f32 %v1932_v2, %v1844_v51  ;;  %v2102_v19 = vmul.f32 0.044715, %v2070_v38  ;;  %5856 = vst [vmem:[#allocation49_spill] sm:$0xff] %v5049_v21  ;;  %v5800_v2 = vunpack.c.h.bf16 %v5049_v21 }
 0x261   : > { %v1088_v37 = vpop.f32.mrf.mxu1  ;;  %v2292_v39 = vmul.f32 %v2260_v16, %v4974_v12  ;;  %v1579_v29 = vpack.c.b16 %v1561_v61, %v1560_v54  ;;  %v1846_v12 = vadd.f32 %v4935_v13, %v4909_v11  ;;  %v5802_v13 = vunpack.c.l.bf16 %v5049_v21 }
 0x262   : > { %v5036_v55 = vadd.f32 %v4933_v14, %v1933_v15  ;;  %v1089_v45 = vadd.f32 %v1088_v37, %v4646_v35  ;;  %v2134_v3 = vadd.f32 %v2102_v19, %v5018_v36  ;;  %v5046_v15 = vld [vmem:[%s4520_s17 + $0x70] sm:$0xff]   ;;  %v5052_v59 = vpop.f32.mrf.mxu2  ;;  %v1652_v16 = vunpack.c.l.b16 %v1492_v30 }
 0x263   : > { %v2323_v43 = vpack.c.bf16 %v2292_v39, %v2291_v60  ;;  %1897 = vmatmul.bf16.gmra.mxu2 %v1579_v29  ;;  %5855 = vst [vmem:[#allocation48_spill] sm:$0xff] %v5046_v15  ;;  %v5799_v58 = vunpack.c.l.bf16 %v5046_v15  ;;  %v5801_v44 = vunpack.c.h.bf16 %v5046_v15 }
 0x264   : > { %v2039_v38 = vmul.f32 %v5036_v55, %v5036_v55  ;;  %v1137_v32 = vmul.f32 %v4661_v52, %v1089_v45  ;;  %v2166_v50 = vmul.f32 0.7978846, %v2134_v3  ;;  %v3743_v51 = vpop.eup %3742  ;;  %v1305_v45 = vmul.f32 %v5802_v13, %v4592_v40 }
 0x265   : > { %2412 = vmatmul.bf16.vlgmr.msrb.gmra.mxu0 %v2323_v43  ;;  %v2229_v61 = vadd.f32 1.0, %v3743_v51  ;;  %v1306_v3 = vmul.f32 %v5800_v2, %v4592_v40  ;;  %v1338_v43 = vmul.f32 %v5799_v58, %v4594_v41  ;;  %v1849_v51 = vadd.f32 %v4954_v53, %v4909_v11 }
 0x266   : > { %v2071_v19 = vmul.f32 %v2039_v38, %v5036_v55  ;;  %v1493_v54 = vpack.c.bf16 %v1137_v32, %v1137_v32  ;;  %3744 = vtanh.f32 %v2166_v50  ;;  %v1339_v32 = vmul.f32 %v5801_v44, %v4594_v41 }
 0x267   : > { %v1934_v26 = vpop.f32.mrf.mxu3  ;;  %v1370_v50 = vadd.f32 %v1338_v43, %v1305_v45 }
 0x268   : > { %v1653_v17 = vunpack.c.l.b16 %v1493_v54  ;;  %v1935_v37 = vadd.f32 %v1934_v26, %v1846_v12  ;;  %v2103_v60 = vmul.f32 0.044715, %v2071_v19 }
 0x269   : > { %v1091_v39 = vpop.f32.mrf.mxu1 }
 0x26a   : > { %v5068_v29 = vadd.f32 %v4933_v14, %v1935_v37  ;;  %v1673_v30 = vpack.c.b16 %v1653_v17, %v1652_v16  ;;  %v2135_v38 = vadd.f32 %v2103_v60, %v5036_v55  ;;  %v1092_v54 = vadd.f32 %v1091_v39, %v4646_v35  ;;  %v5080_v2 = vpop.f32.mrf.mxu2 }
 0x26b   : > { %v2261_v16 = vmul.f32 0.5, %v2229_v61  ;;  %v1371_v17 = vadd.f32 %v1339_v32, %v1306_v3  ;;  %v1466_v60 = vpack.c.bf16 %v1370_v50, %v1370_v50 }
 0x26c   : > { %v3745_v12 = vpop.eup %3744  ;;  %v2040_v19 = vmul.f32 %v5068_v29, %v5068_v29  ;;  %1976 = vmatmul.bf16.gmra.mxu3 %v1673_v30  ;;  %v2167_v26 = vmul.f32 0.7978846, %v2135_v38  ;;  %v1138_v53 = vmul.f32 %v4661_v52, %v1092_v54 }
 0x26d   : > { %v2230_v37 = vadd.f32 1.0, %v3745_v12  ;;  %v1467_v44 = vpack.c.bf16 %v1371_v17, %v1371_v17  ;;  %v1562_v13 = vunpack.c.l.b16 %v1466_v60  ;;  %v2293_v30 = vmul.f32 %v2261_v16, %v4986_v25 }
 0x26e   : > { %v2072_v58 = vmul.f32 %v2040_v19, %v5068_v29  ;;  %3746 = vtanh.f32 %v2167_v26 }
 0x26f   : > { %v1937_v45 = vpop.f32.mrf.mxu3  ;;  %v2262_v43 = vmul.f32 0.5, %v2230_v37  ;;  %v1563_v3 = vunpack.c.l.b16 %v1467_v44  ;;  %v5099_v44 = vld [vmem:[%s4526_s15 + $0x78] sm:$0xff]  }
 0x270   : > { %v1938_v15 = vadd.f32 %v1937_v45, %v1849_v51  ;;  %v2104_v21 = vmul.f32 0.044715, %v2072_v58  ;;  %v1494_v51 = vpack.c.bf16 %v1138_v53, %v1138_v53  ;;  %v5807_v45 = vunpack.c.h.bf16 %v5099_v44 }
 0x271   : > { %v1093_v39 = vpop.f32.mrf.mxu1  ;;  %v2294_v61 = vmul.f32 %v2262_v43, %v5018_v36  ;;  %v1580_v19 = vpack.c.b16 %v1563_v3, %v1562_v13  ;;  %v1851_v36 = vadd.f32 %v4982_v4, %v4909_v11  ;;  %v5810_v4 = vunpack.c.l.bf16 %v5099_v44 }
 0x272   : > { %v5086_v38 = vadd.f32 %v4933_v14, %v1938_v15  ;;  %v1094_v32 = vadd.f32 %v1093_v39, %v4646_v35  ;;  %v2136_v50 = vadd.f32 %v2104_v21, %v5068_v29  ;;  %v5096_v15 = vld [vmem:[%s4520_s17 + $0x78] sm:$0xff]   ;;  %v5102_v37 = vpop.f32.mrf.mxu2  ;;  %v1654_v43 = vunpack.c.l.b16 %v1494_v51 }
 0x273   : > { %v2324_v12 = vpack.c.bf16 %v2294_v61, %v2293_v30  ;;  %1902 = vmatmul.bf16.gmra.mxu2 %v1580_v19  ;;  %v5809_v16 = vunpack.c.l.bf16 %v5096_v15  ;;  %v5808_v60 = vunpack.c.h.bf16 %v5096_v15 }
 0x274   : > { %v2041_v58 = vmul.f32 %v5086_v38, %v5086_v38  ;;  %v1139_v54 = vmul.f32 %v4661_v52, %v1094_v32  ;;  %v2168_v25 = vmul.f32 0.7978846, %v2136_v50  ;;  %v3747_v26 = vpop.eup %3746  ;;  %v1307_v32 = vmul.f32 %v5810_v4, %v4592_v40 }
 0x275   : > { %2417 = vmatmul.bf16.gmra.mxu0 %v2324_v12  ;;  %v2231_v3 = vadd.f32 1.0, %v3747_v26  ;;  %v1308_v50 = vmul.f32 %v5807_v45, %v4592_v40  ;;  %v1340_v12 = vmul.f32 %v5809_v16, %v4594_v41  ;;  %v1854_v26 = vadd.f32 %v5002_v27, %v4909_v11 }
 0x276   : > { %v2073_v21 = vmul.f32 %v2041_v58, %v5086_v38  ;;  %v1495_v13 = vpack.c.bf16 %v1139_v54, %v1139_v54  ;;  %3748 = vtanh.f32 %v2168_v25  ;;  %v1341_v54 = vmul.f32 %v5808_v60, %v4594_v41 }
 0x277   : > { %v1939_v17 = vpop.f32.mrf.mxu3  ;;  %v1372_v25 = vadd.f32 %v1340_v12, %v1307_v32 }
 0x278   : > { %v1655_v53 = vunpack.c.l.b16 %v1495_v13  ;;  %v1940_v39 = vadd.f32 %v1939_v17, %v1851_v36  ;;  %v2105_v30 = vmul.f32 0.044715, %v2073_v21 }
 0x279   : > { %v1096_v61 = vpop.f32.mrf.mxu1 }
 0x27a   : > { %v5118_v19 = vadd.f32 %v4933_v14, %v1940_v39  ;;  %v1674_v51 = vpack.c.b16 %v1655_v53, %v1654_v43  ;;  %v2137_v58 = vadd.f32 %v2105_v30, %v5086_v38  ;;  %v1097_v21 = vadd.f32 %v1096_v61, %v4646_v35  ;;  %v5130_v32 = vpop.f32.mrf.mxu2 }
 0x27b   : > { %v2263_v43 = vmul.f32 0.5, %v2231_v3  ;;  %v1373_v53 = vadd.f32 %v1341_v54, %v1308_v50  ;;  %v1468_v39 = vpack.c.bf16 %v1372_v25, %v1372_v25 }
 0x27c   : > { %v3749_v36 = vpop.eup %3748  ;;  %v2042_v40 = vmul.f32 %v5118_v19, %v5118_v19  ;;  %1981 = vmatmul.bf16.gmra.mxu3 %v1674_v51  ;;  %v2169_v13 = vmul.f32 0.7978846, %v2137_v58  ;;  %v1140_v27 = vmul.f32 %v4661_v52, %v1097_v21 }
 0x27d   : > { %v2232_v17 = vadd.f32 1.0, %v3749_v36  ;;  %v1469_v12 = vpack.c.bf16 %v1373_v53, %v1373_v53  ;;  %v1564_v60 = vunpack.c.l.b16 %v1468_v39  ;;  %v2295_v51 = vmul.f32 %v2263_v43, %v5036_v55 }
 0x27e   : > { %v2074_v30 = vmul.f32 %v2042_v40, %v5118_v19  ;;  %3750 = vtanh.f32 %v2169_v13 }
 0x27f   : > { %v1942_v45 = vpop.f32.mrf.mxu3  ;;  %v2264_v41 = vmul.f32 0.5, %v2232_v17  ;;  %v1565_v50 = vunpack.c.l.b16 %v1469_v12  ;;  %v1496_v17 = vpack.c.bf16 %v1140_v27, %v1140_v27 }
 0x280   : > { %v1943_v16 = vadd.f32 %v1942_v45, %v1854_v26  ;;  %v2106_v4 = vmul.f32 0.044715, %v2074_v30 }
 0x281   : > { %v1098_v61 = vpop.f32.mrf.mxu1  ;;  %v2296_v3 = vmul.f32 %v2264_v41, %v5068_v29  ;;  %v1581_v40 = vpack.c.b16 %v1565_v50, %v1564_v60  ;;  %v1856_v29 = vadd.f32 %v5030_v5, %v4909_v11  ;;  %v1656_v43 = vunpack.c.l.b16 %v1496_v17 }
 0x282   : > { %v5136_v58 = vadd.f32 %v4933_v14, %v1943_v16  ;;  %v1099_v54 = vadd.f32 %v1098_v61, %v4646_v35  ;;  %v2138_v25 = vadd.f32 %v2106_v4, %v5118_v19  ;;  %v5146_v12 = vpop.f32.mrf.mxu2 }
 0x283   : > { %v2325_v36 = vpack.c.bf16 %v2296_v3, %v2295_v51  ;;  %1907 = vmatmul.bf16.gmra.mxu2 %v1581_v40  ;;  %v1859_v3 = vadd.f32 %v5052_v59, %v4909_v11 }
 0x284   : > { %v2043_v45 = vmul.f32 %v5136_v58, %v5136_v58  ;;  %v1141_v26 = vmul.f32 %v4661_v52, %v1099_v54  ;;  %v2170_v21 = vmul.f32 0.7978846, %v2138_v25  ;;  %v3751_v55 = vpop.eup %3750 }
 0x285   : > { %2422 = vmatmul.bf16.gmra.mxu0 %v2325_v36  ;;  %v2233_v41 = vadd.f32 1.0, %v3751_v55 }
 0x286   : > { %v2075_v16 = vmul.f32 %v2043_v45, %v5136_v58  ;;  %v1497_v13 = vpack.c.bf16 %v1141_v26, %v1141_v26  ;;  %3752 = vtanh.f32 %v2170_v21 }
 0x287   : > { %v1944_v4 = vpop.f32.mrf.mxu3  ;;  %v2265_v40 = vmul.f32 0.5, %v2233_v41 }
 0x288   : > { %v1657_v60 = vunpack.c.l.b16 %v1497_v13  ;;  %v1945_v53 = vadd.f32 %v1944_v4, %v1856_v29  ;;  %v2107_v39 = vmul.f32 0.044715, %v2075_v16 }
 0x289   : > { %v1101_v30 = vpop.f32.mrf.mxu1  ;;  %v2297_v59 = vmul.f32 %v2265_v40, %v5086_v38 }
 0x28a   : > { %v5149_v27 = vadd.f32 %v4933_v14, %v1945_v53  ;;  %v1675_v61 = vpack.c.b16 %v1657_v60, %v1656_v43  ;;  %v2139_v51 = vadd.f32 %v2107_v39, %v5136_v58  ;;  %v1102_v54 = vadd.f32 %v1101_v30, %v4646_v35  ;;  %v5166_v39 = vpop.f32.mrf.mxu2 }
 0x28c   : > { %v3753_v5 = vpop.eup %3752  ;;  %v2044_v50 = vmul.f32 %v5149_v27, %v5149_v27  ;;  %1986 = vmatmul.bf16.gmra.mxu3 %v1675_v61  ;;  %v2171_v25 = vmul.f32 0.7978846, %v2139_v51  ;;  %v1142_v21 = vmul.f32 %v4661_v52, %v1102_v54 }
 0x28d   : > { %v2234_v36 = vadd.f32 1.0, %v3753_v5 }
 0x28e   : > { %v2076_v17 = vmul.f32 %v2044_v50, %v5149_v27  ;;  %3754 = vtanh.f32 %v2171_v25  ;;  %v1498_v30 = vpack.c.bf16 %v1142_v21, %v1142_v21 }
 0x28f   : > { %v1947_v45 = vpop.f32.mrf.mxu3  ;;  %v2266_v26 = vmul.f32 0.5, %v2234_v36 }
 0x290   : > { %v1948_v55 = vadd.f32 %v1947_v45, %v1859_v3  ;;  %v2108_v29 = vmul.f32 0.044715, %v2076_v17  ;;  %v1658_v54 = vunpack.c.l.b16 %v1498_v30 }
 0x291   : > { %v1103_v16 = vpop.f32.mrf.mxu1  ;;  %v2298_v13 = vmul.f32 %v2266_v26, %v5118_v19  ;;  %v1861_v19 = vadd.f32 %v5080_v2, %v4909_v11  ;;  %v1864_v2 = vadd.f32 %v5102_v37, %v4909_v11 }
 0x292   : > { %v5162_v4 = vadd.f32 %v4933_v14, %v1948_v55  ;;  %v1104_v43 = vadd.f32 %v1103_v16, %v4646_v35  ;;  %v2140_v60 = vadd.f32 %v2108_v29, %v5149_v27 }
 0x293   : > { %v2326_v53 = vpack.c.bf16 %v2298_v13, %v2297_v59 }
 0x294   : > { %v2045_v41 = vmul.f32 %v5162_v4, %v5162_v4  ;;  %v1143_v61 = vmul.f32 %v4661_v52, %v1104_v43  ;;  %v2172_v51 = vmul.f32 0.7978846, %v2140_v60  ;;  %v3755_v38 = vpop.eup %3754 }
 0x295   : > { %2427 = vmatmul.bf16.gmra.mxu0 %v2326_v53  ;;  %v2235_v45 = vadd.f32 1.0, %v3755_v38  ;;  %v5179_v53 = vpop.f32.mrf.mxu2 }
 0x296   : > { %v2077_v5 = vmul.f32 %v2045_v41, %v5162_v4  ;;  %v1499_v3 = vpack.c.bf16 %v1143_v61, %v1143_v61  ;;  %3756 = vtanh.f32 %v2172_v51 }
 0x297   : > { %v1949_v50 = vpop.f32.mrf.mxu3  ;;  %v2267_v60 = vmul.f32 0.5, %v2235_v45 }
 0x298   : > { %v1659_v25 = vunpack.c.l.b16 %v1499_v3  ;;  %v1950_v36 = vadd.f32 %v1949_v50, %v1861_v19  ;;  %v2109_v40 = vmul.f32 0.044715, %v2077_v5 }
 0x299   : > { %v1106_v17 = vpop.f32.mrf.mxu1  ;;  %v2299_v37 = vmul.f32 %v2267_v60, %v5136_v58  ;;  %v1866_v58 = vadd.f32 %v5130_v32, %v4909_v11  ;;  %v1869_v32 = vadd.f32 %v5146_v12, %v4909_v11 }
 0x29a   : > { %v2014_v26 = vadd.f32 %v4933_v14, %v1950_v36  ;;  %v1676_v21 = vpack.c.b16 %v1659_v25, %v1658_v54  ;;  %v2141_v55 = vadd.f32 %v2109_v40, %v5162_v4  ;;  %v1107_v59 = vadd.f32 %v1106_v17, %v4646_v35 }
 0x29c   : > { %v3757_v29 = vpop.eup %3756  ;;  %v2046_v16 = vmul.f32 %v2014_v26, %v2014_v26  ;;  %1991 = vmatmul.bf16.gmra.mxu3 %v1676_v21  ;;  %v2173_v13 = vmul.f32 0.7978846, %v2141_v55  ;;  %v1144_v51 = vmul.f32 %v4661_v52, %v1107_v59 }
 0x29d   : > { %v2236_v43 = vadd.f32 1.0, %v3757_v29 }
 0x29e   : > { %v2078_v30 = vmul.f32 %v2046_v16, %v2014_v26  ;;  %3758 = vtanh.f32 %v2173_v13  ;;  %v1500_v40 = vpack.c.bf16 %v1144_v51, %v1144_v51 }
 0x29f   : > { %v1952_v41 = vpop.f32.mrf.mxu3  ;;  %v2268_v61 = vmul.f32 0.5, %v2236_v43 }
 0x2a0   : > { %v1953_v38 = vadd.f32 %v1952_v41, %v1864_v2  ;;  %v2110_v19 = vmul.f32 0.044715, %v2078_v30  ;;  %v1660_v16 = vunpack.c.l.b16 %v1500_v40 }
 0x2a1   : > { %v1108_v5 = vpop.f32.mrf.mxu1  ;;  %v2300_v3 = vmul.f32 %v2268_v61, %v5149_v27 }
 0x2a2   : > { %v5185_v50 = vadd.f32 %v4933_v14, %v1953_v38  ;;  %v1109_v54 = vadd.f32 %v1108_v5, %v4646_v35  ;;  %v2142_v25 = vadd.f32 %v2110_v19, %v2014_v26  ;;  %v5194_v35 = vpop.f32.mrf.mxu2 }
 0x2a3   : > { %v2327_v36 = vpack.c.bf16 %v2300_v3, %v2299_v37 }
 0x2a4   : > { %v2047_v17 = vmul.f32 %v5185_v50, %v5185_v50  ;;  %v1145_v45 = vmul.f32 %v4661_v52, %v1109_v54  ;;  %v2174_v21 = vmul.f32 0.7978846, %v2142_v25  ;;  %v3759_v55 = vpop.eup %3758 }
 0x2a5   : > { %2432 = vmatmul.bf16.gmra.mxu0 %v2327_v36  ;;  %v2237_v60 = vadd.f32 1.0, %v3759_v55 }
 0x2a6   : > { %v2079_v27 = vmul.f32 %v2047_v17, %v5185_v50  ;;  %v1501_v29 = vpack.c.bf16 %v1145_v45, %v1145_v45  ;;  %3760 = vtanh.f32 %v2174_v21 }
 0x2a7   : > { %v1954_v2 = vpop.f32.mrf.mxu3  ;;  %v2269_v5 = vmul.f32 0.5, %v2237_v60 }
 0x2a8   : > { %v1661_v59 = vunpack.c.l.b16 %v1501_v29  ;;  %v1955_v13 = vadd.f32 %v1954_v2, %v1866_v58  ;;  %v2111_v43 = vmul.f32 0.044715, %v2079_v27  ;;  %v1871_v2 = vadd.f32 %v5166_v39, %v4909_v11 }
 0x2a9   : > { %v2301_v40 = vmul.f32 %v2269_v5, %v5162_v4 }
 0x2aa   : > { %v2016_v52 = vadd.f32 %v4933_v14, %v1955_v13  ;;  %v1677_v30 = vpack.c.b16 %v1661_v59, %v1660_v16  ;;  %v2143_v41 = vadd.f32 %v2111_v43, %v5185_v50  ;;  %v1878_v45 = vpop.f32.mrf.mxu2 }
 0x2ac   : > { %v3761_v61 = vpop.eup %3760  ;;  %v2048_v51 = vmul.f32 %v2016_v52, %v2016_v52  ;;  %1996 = vmatmul.bf16.gmra.mxu3 %v1677_v30  ;;  %v2175_v38 = vmul.f32 0.7978846, %v2143_v41 }
 0x2ad   : > { %v2238_v19 = vadd.f32 1.0, %v3761_v61  ;;  %v1874_v61 = vadd.f32 %v5179_v53, %v4909_v11 }
 0x2ae   : > { %v2080_v37 = vmul.f32 %v2048_v51, %v2016_v52  ;;  %3762 = vtanh.f32 %v2175_v38 }
 0x2af   : > { %v1957_v3 = vpop.f32.mrf.mxu3  ;;  %v2270_v54 = vmul.f32 0.5, %v2238_v19 }
 0x2b0   : > { %v1958_v25 = vadd.f32 %v1957_v3, %v1869_v32  ;;  %v2112_v36 = vmul.f32 0.044715, %v2080_v37 }
 0x2b1   : > { %v2302_v17 = vmul.f32 %v2270_v54, %v2014_v26 }
 0x2b2   : > { %v2017_v21 = vadd.f32 %v4933_v14, %v1958_v25  ;;  %v2144_v55 = vadd.f32 %v2112_v36, %v2016_v52  ;;  %v1880_v30 = vpop.f32.mrf.mxu2 }
 0x2b3   : > { %v2328_v58 = vpack.c.bf16 %v2302_v17, %v2301_v40 }
 0x2b4   : > { %v2049_v12 = vmul.f32 %v2017_v21, %v2017_v21  ;;  %v2176_v27 = vmul.f32 0.7978846, %v2144_v55  ;;  %v3763_v29 = vpop.eup %3762 }
 0x2b5   : > { %2437 = vmatmul.bf16.gmra.mxu0 %v2328_v58  ;;  %v2239_v60 = vadd.f32 1.0, %v3763_v29  ;;  %v1876_v29 = vadd.f32 %v5194_v35, %v4909_v11 }
 0x2b6   : > { %v2081_v16 = vmul.f32 %v2049_v12, %v2017_v21  ;;  %3764 = vtanh.f32 %v2176_v27 }
 0x2b7   : > { %v1959_v59 = vpop.f32.mrf.mxu3  ;;  %v2271_v19 = vmul.f32 0.5, %v2239_v60 }
 0x2b8   : > { %v1960_v13 = vadd.f32 %v1959_v59, %v1871_v2  ;;  %v2113_v43 = vmul.f32 0.044715, %v2081_v16 }
 0x2b9   : > { %v2303_v25 = vmul.f32 %v2271_v19, %v5185_v50 }
 0x2ba   : > { %v2018_v4 = vadd.f32 %v4933_v14, %v1960_v13  ;;  %v2145_v26 = vadd.f32 %v2113_v43, %v2017_v21  ;;  %v1883_v12 = vpop.f32.mrf.mxu2 }
 0x2bc   : > { %v3765_v41 = vpop.eup %3764  ;;  %v2050_v32 = vmul.f32 %v2018_v4, %v2018_v4  ;;  %v2177_v51 = vmul.f32 0.7978846, %v2145_v26  ;;  %v1879_v26 = vadd.f32 %v1878_v45, %v4909_v11 }
 0x2bd   : > { %v2240_v38 = vadd.f32 1.0, %v3765_v41 }
 0x2be   : > { %v2082_v5 = vmul.f32 %v2050_v32, %v2018_v4  ;;  %3766 = vtanh.f32 %v2177_v51 }
 0x2bf   : > { %v1962_v39 = vpop.f32.mrf.mxu3  ;;  %v2272_v37 = vmul.f32 0.5, %v2240_v38 }
 0x2c0   : > { %v1963_v3 = vadd.f32 %v1962_v39, %v1874_v61  ;;  %v2114_v54 = vmul.f32 0.044715, %v2082_v5 }
 0x2c1   : > { %v2304_v36 = vmul.f32 %v2272_v37, %v2016_v52 }
 0x2c2   : > { %v5209_v40 = vadd.f32 %v4933_v14, %v1963_v3  ;;  %v2146_v17 = vadd.f32 %v2114_v54, %v2018_v4  ;;  %v1885_v5 = vpop.f32.mrf.mxu2 }
 0x2c3   : > { %v2329_v55 = vpack.c.bf16 %v2304_v36, %v2303_v25 }
 0x2c4   : > { %v2051_v53 = vmul.f32 %v5209_v40, %v5209_v40  ;;  %v2178_v58 = vmul.f32 0.7978846, %v2146_v17  ;;  %v3767_v27 = vpop.eup %3766 }
 0x2c5   : > { %2442 = vmatmul.bf16.gmra.mxu0 %v2329_v55  ;;  %v2241_v59 = vadd.f32 1.0, %v3767_v27 }
 0x2c6   : > { %v2083_v2 = vmul.f32 %v2051_v53, %v5209_v40  ;;  %3768 = vtanh.f32 %v2178_v58  ;;  %v1881_v58 = vadd.f32 %v1880_v30, %v4909_v11 }
 0x2c7   : > { %v1964_v50 = vpop.f32.mrf.mxu3  ;;  %v2273_v51 = vmul.f32 0.5, %v2241_v59 }
 0x2c8   : > { %v2115_v52 = vmul.f32 0.044715, %v2083_v2  ;;  %v1965_v16 = vadd.f32 %v1964_v50, %v1876_v29 }
 0x2c9   : > { %v2305_v3 = vmul.f32 %v2273_v51, %v2017_v21 }
 0x2ca   : > { %v2147_v13 = vadd.f32 %v2115_v52, %v5209_v40  ;;  %v2020_v43 = vadd.f32 %v4933_v14, %v1965_v16 }
 0x2cc   : > { %v3769_v60 = vpop.eup %3768  ;;  %v2052_v41 = vmul.f32 %v2020_v43, %v2020_v43  ;;  %v2179_v61 = vmul.f32 0.7978846, %v2147_v13  ;;  %v1884_v13 = vadd.f32 %v1883_v12, %v4909_v11  ;;  %v5238_v12 = vperm.slane %v4930_v28, 4 }
 0x2cd   : > { %v2242_v32 = vadd.f32 1.0, %v3769_v60 }
 0x2ce   : > { %v2084_v38 = vmul.f32 %v2052_v41, %v2020_v43  ;;  %3770 = vtanh.f32 %v2179_v61 }
 0x2cf   : > { %v1967_v35 = vpop.f32.mrf.mxu3  ;;  %v2274_v19 = vmul.f32 0.5, %v2242_v32 }
 0x2d0   : > { %v2116_v39 = vmul.f32 0.044715, %v2084_v38  ;;  %v1968_v37 = vadd.f32 %v1967_v35, %v1879_v26  ;;  %v2494_v26 = vlaneseq }
 0x2d1   : > { %v2306_v54 = vmul.f32 %v2274_v19, %v2018_v4  ;;  %v1888_v4 = vpop.f32.mrf.mxu2 }
 0x2d2   : > { %v2148_v25 = vadd.f32 %v2116_v39, %v2020_v43  ;;  %v5220_v36 = vadd.f32 %v4933_v14, %v1968_v37  ;;  %v5858_v39 = vunpack.c.l.bf16 %v4586_v34 }
 0x2d3   : > { %v2330_v17 = vpack.c.bf16 %v2306_v54, %v2305_v3  ;;  %v5241_v3 = vshrl.u32 %v2494_v26, 7 }
 0x2d4   : > { %v2053_v45 = vmul.f32 %v5220_v36, %v5220_v36  ;;  %v2180_v55 = vmul.f32 0.7978846, %v2148_v25  ;;  %v3771_v53 = vpop.eup %3770  ;;  %v1374_v37 = vmul.f32 0.999999, %v5858_v39 }
 0x2d5   : > { %2447 = vmatmul.bf16.gmra.mxu0 %v2330_v17  ;;  %v2243_v50 = vadd.f32 1.0, %v3771_v53 }
 0x2d6   : > { %v2085_v27 = vmul.f32 %v2053_v45, %v5220_v36  ;;  %3772 = vtanh.f32 %v2180_v55 }
 0x2d7   : > { %v1969_v29 = vpop.f32.mrf.mxu3  ;;  %v2275_v61 = vmul.f32 0.5, %v2243_v50  ;;  %v5860_v50 = vunpack.c.h.bf16 %v4586_v34  ;;  %v5861_v34 = vunpack.c.h.bf16 %v4583_v33 }
 0x2d8   : > { %v2117_v2 = vmul.f32 0.044715, %v2085_v27  ;;  %v1970_v21 = vadd.f32 %v1969_v29, %v1881_v58  ;;  %v2496_v58 = vadd.s32 8, %v5241_v3  ;;  %v5253_v29 = vstv %s3275_s11 }
 0x2d9   : > { %v2307_v54 = vmul.f32 %v2275_v61, %v5209_v40  ;;  %v5249_v27 = vpop.f32.mrf.mxu2  ;;  %v5859_v40 = vunpack.c.l.bf16 %v4583_v33 }
 0x2da   : > { %v2149_v52 = vadd.f32 %v2117_v2, %v5220_v36  ;;  %v5228_v16 = vadd.f32 %v4933_v14, %v1970_v21 }
 0x2dc   : > { %v3773_v59 = vpop.eup %3772  ;;  %v2054_v30 = vmul.f32 %v5228_v16, %v5228_v16  ;;  %v2181_v60 = vmul.f32 0.7978846, %v2149_v52  ;;  %v1375_v52 = vmul.f32 0.999999, %v5860_v50 }
 0x2dd   : > { %v2244_v41 = vadd.f32 1.0, %v3773_v59 }
 0x2de   : > { %v2086_v32 = vmul.f32 %v2054_v30, %v5228_v16  ;;  %3774 = vtanh.f32 %v2181_v60  ;;  %v2528_v60 = vadd.s32 %v5253_v29, %v5241_v3 }
 0x2df   : > { %v1972_v51 = vpop.f32.mrf.mxu3  ;;  %v2276_v38 = vmul.f32 0.5, %v2244_v41  ;;  %v2529_v41 = vadd.s32 %v5253_v29, %v2496_v58 }
 0x2e0   : > { %v2118_v35 = vmul.f32 0.044715, %v2086_v32  ;;  %v1973_v19 = vadd.f32 %v1972_v51, %v1884_v13  ;;  %v1886_v13 = vadd.f32 %v1885_v5, %v4909_v11  ;;  %v5265_v32 = vstv %s2560_s28 }
 0x2e1   : > { %v2308_v25 = vmul.f32 %v2276_v38, %v2020_v43  ;;  %v1406_v43 = vsub.f32 %v5859_v40, %v1374_v37  ;;  %vm2562_vm0 = vcmp.lt.s32.totalorder %v2528_v60, %v5265_v32  ;;  %vm2563_vm1 = vcmp.lt.s32.totalorder %v2529_v41, %v5265_v32 }
 0x2e2   : > { %v2150_v17 = vadd.f32 %v2118_v35, %v5228_v16  ;;  %v5246_v45 = vadd.f32 %v4933_v14, %v1973_v19  ;;  %v2413_v55 = vpop.f32.mrf.mxu0  ;;  %v1407_v35 = vsub.f32 %v5861_v34, %v1375_v52  ;;  %v4216_v52 = vmov 0.0  }
 0x2e3   : > { %v2331_v53 = vpack.c.bf16 %v2308_v25, %v2307_v54  ;;  %v2414_v21 = vadd.f32 %v2413_v55, %v5238_v12  ;;  %v2497_v54 = vadd.s32 16, %v5241_v3  ;;  %v1889_v55 = vadd.f32 %v1888_v4, %v4909_v11 }
 0x2e4   : > { %v2055_v28 = vmul.f32 %v5246_v45, %v5246_v45  ;;  %v2182_v2 = vmul.f32 0.7978846, %v2150_v17  ;;  %v3775_v59 = vpop.eup %3774 }
 0x2e5   : > { %2452 = vmatmul.bf16.gmra.mxu0 %v2331_v53  ;;  %v2658_v38 = vsub.f32 %v2414_v21, %v1406_v43  ;;  %v2245_v19 = vadd.f32 1.0, %v3775_v59  ;;  %v5862_v53 = vunpack.c.l.bf16 %v4614_v1  ;;  %v1893_v43 = vpop.f32.mrf.mxu2  ;;  %v3276_v59 = vsel %vm2562_vm0, 1.0, %v4216_v52 }
 0x2e6   : > { %v2087_v30 = vmul.f32 %v2055_v28, %v5246_v45  ;;  %3776 = vtanh.f32 %v2182_v2  ;;  %v2530_v4 = vadd.s32 %v5253_v29, %v2497_v54 }
 0x2e7   : > { %v1974_v26 = vpop.f32.mrf.mxu3  ;;  %v1376_v58 = vmul.f32 0.999999, %v5862_v53  ;;  %v2690_v2 = vand.u32 2147483647, %v2658_v38  ;;  %v2277_v50 = vmul.f32 0.5, %v2245_v19  ;;  %v5863_v38 = vunpack.c.l.bf16 %v4611_v0 }
 0x2e8   : > { %v2119_v61 = vmul.f32 0.044715, %v2087_v30  ;;  %v1975_v51 = vadd.f32 %v1974_v26, %v1886_v13  ;;  %v3277_v30 = vsel %vm2563_vm1, 1.0, %v4216_v52  ;;  %vm2564_vm2 = vcmp.lt.s32.totalorder %v2530_v4, %v5265_v32 }
 0x2e9   : > { %v1408_v34 = vsub.f32 %v5863_v38, %v1376_v58  ;;  %v2498_v58 = vadd.s32 24, %v5241_v3 }
 0x2ea   : > { %v2151_v5 = vadd.f32 %v2119_v61, %v5246_v45  ;;  %v5271_v39 = vadd.f32 %v4933_v14, %v1975_v51  ;;  %v2415_v37 = vpop.f32.mrf.mxu0 }
 0x2eb   : > { %v2416_v25 = vadd.f32 %v2415_v37, %v5238_v12 }
 0x2ec   : > { %v3777_v17 = vpop.eup %3776  ;;  %v2056_v33 = vmul.f32 %v5271_v39, %v5271_v39  ;;  %v2183_v28 = vmul.f32 0.7978846, %v2151_v5  ;;  %v2309_v5 = vmul.f32 %v2277_v50, %v5220_v36  ;;  %v1891_v50 = vadd.f32 %v5249_v27, %v4909_v11 }
 0x2ed   : > { %v2659_v40 = vsub.f32 %v2416_v25, %v1407_v35  ;;  %v2246_v21 = vadd.f32 1.0, %v3777_v17  ;;  %v2722_v35 = vmul.f32 %v3276_v59, %v2690_v2 }
 0x2ee   : > { %v2088_v13 = vmul.f32 %v2056_v33, %v5271_v39  ;;  %3778 = vtanh.f32 %v2183_v28 }
 0x2ef   : > { %v2691_v60 = vand.u32 2147483647, %v2659_v40  ;;  %v1977_v26 = vpop.f32.mrf.mxu3  ;;  %v2278_v41 = vmul.f32 0.5, %v2246_v21 }
 0x2f0   : > { %v2120_v61 = vmul.f32 0.044715, %v2088_v13  ;;  %v1978_v51 = vadd.f32 %v1977_v26, %v1889_v55  ;;  %v3278_v13 = vsel %vm2564_vm2, 1.0, %v4216_v52  ;;  %v1895_v26 = vpop.f32.mrf.mxu2 }
 0x2f1   : > { %v2723_v19 = vmul.f32 %v3277_v30, %v2691_v60  ;;  %v2310_v37 = vmul.f32 %v2278_v41, %v5228_v16  ;;  %v5864_v16 = vunpack.c.h.bf16 %v4614_v1  ;;  %v2531_v60 = vadd.s32 %v5253_v29, %v2498_v58 }
 0x2f2   : > { %v2152_v25 = vadd.f32 %v2120_v61, %v5271_v39  ;;  %v5292_v17 = vadd.f32 %v4933_v14, %v1978_v51  ;;  %v2418_v54 = vpop.f32.mrf.mxu0  ;;  %v5865_v1 = vunpack.c.h.bf16 %v4611_v0 }
 0x2f3   : > { %v2754_v33 = vadd.f32 %v2723_v19, %v2722_v35  ;;  %v2419_v55 = vadd.f32 %v2418_v54, %v5238_v12  ;;  %v2332_v53 = vpack.c.bf16 %v2310_v37, %v2309_v5  ;;  %v1377_v40 = vmul.f32 0.999999, %v5864_v16 }
 0x2f4   : > { %v2057_v28 = vmul.f32 %v5292_v17, %v5292_v17  ;;  %v2184_v36 = vmul.f32 0.7978846, %v2152_v25  ;;  %v3779_v21 = vpop.eup %3778  ;;  %v2499_v5 = vadd.s32 32, %v5241_v3  ;;  %vm2565_vm3 = vcmp.lt.s32.totalorder %v2531_v60, %v5265_v32 }
 0x2f5   : > { %v2660_v2 = vsub.f32 %v2419_v55, %v1408_v34  ;;  %2457 = vmatmul.bf16.gmra.mxu0 %v2332_v53  ;;  %v1409_v38 = vsub.f32 %v5865_v1, %v1377_v40  ;;  %v2247_v34 = vadd.f32 1.0, %v3779_v21  ;;  %v1894_v55 = vadd.f32 %v1893_v43, %v4909_v11 }
 0x2f6   : > { %v2089_v59 = vmul.f32 %v2057_v28, %v5292_v17  ;;  %3780 = vtanh.f32 %v2184_v36  ;;  %v5866_v28 = vunpack.c.l.bf16 %v4639_v24  ;;  %v2532_v21 = vadd.s32 %v5253_v29, %v2499_v5 }
 0x2f7   : > { %v2692_v30 = vand.u32 2147483647, %v2660_v2  ;;  %v1979_v4 = vpop.f32.mrf.mxu3  ;;  %v2279_v16 = vmul.f32 0.5, %v2247_v34  ;;  %v5867_v60 = vunpack.c.l.bf16 %v4636_v23 }
 0x2f8   : > { %v2121_v41 = vmul.f32 0.044715, %v2089_v59  ;;  %v1980_v61 = vadd.f32 %v1979_v4, %v1891_v50  ;;  %v1378_v36 = vmul.f32 0.999999, %v5866_v28  ;;  %vm2566_vm4 = vcmp.lt.s32.totalorder %v2532_v21, %v5265_v32 }
 0x2f9   : > { %v2724_v51 = vmul.f32 %v3278_v13, %v2692_v30  ;;  %v1896_v28 = vadd.f32 %v1895_v26, %v4909_v11 }
 0x2fa   : > { %v2153_v35 = vadd.f32 %v2121_v41, %v5292_v17  ;;  %v5310_v27 = vadd.f32 %v4933_v14, %v1980_v61  ;;  %v2420_v19 = vpop.f32.mrf.mxu0  ;;  %v1410_v41 = vsub.f32 %v5867_v60, %v1378_v36  ;;  %v1898_v61 = vpop.f32.mrf.mxu2 }
 0x2fb   : > { %v2755_v37 = vadd.f32 %v2754_v33, %v2724_v51  ;;  %v2421_v25 = vadd.f32 %v2420_v19, %v5238_v12  ;;  %v3279_v33 = vsel %vm2565_vm3, 1.0, %v4216_v52  ;;  %v2311_v51 = vmul.f32 %v2279_v16, %v5246_v45 }
 0x2fc   : > { %v3781_v54 = vpop.eup %3780  ;;  %v2058_v0 = vmul.f32 %v5310_v27, %v5310_v27  ;;  %v2185_v53 = vmul.f32 0.7978846, %v2153_v35 }
 0x2fd   : > { %v2661_v58 = vsub.f32 %v2421_v25, %v1409_v38  ;;  %v2248_v2 = vadd.f32 1.0, %v3781_v54  ;;  %v2500_v54 = vadd.s32 40, %v5241_v3 }
 0x2fe   : > { %v2090_v40 = vmul.f32 %v2058_v0, %v5310_v27  ;;  %3782 = vtanh.f32 %v2185_v53 }
 0x2ff   : > { %v2693_v50 = vand.u32 2147483647, %v2661_v58  ;;  %v1982_v59 = vpop.f32.mrf.mxu3  ;;  %v2280_v13 = vmul.f32 0.5, %v2248_v2 }
 0x300   : > { %v2122_v43 = vmul.f32 0.044715, %v2090_v40  ;;  %v1983_v30 = vadd.f32 %v1982_v59, %v1894_v55  ;;  %v2533_v40 = vadd.s32 %v5253_v29, %v2500_v54  ;;  %v5869_v59 = vunpack.c.h.bf16 %v4636_v23 }
 0x301   : > { %v2725_v4 = vmul.f32 %v3279_v33, %v2693_v50  ;;  %v2312_v1 = vmul.f32 %v2280_v13, %v5271_v39  ;;  %v5868_v39 = vunpack.c.h.bf16 %v4639_v24 }
 0x302   : > { %v2154_v38 = vadd.f32 %v2122_v43, %v5310_v27  ;;  %v5329_v34 = vadd.f32 %v4933_v14, %v1983_v30  ;;  %v2423_v35 = vpop.f32.mrf.mxu0  ;;  %vm2567_vm5 = vcmp.lt.s32.totalorder %v2533_v40, %v5265_v32 }
 0x303   : > { %v2756_v19 = vadd.f32 %v2755_v37, %v2725_v4  ;;  %v2424_v5 = vadd.f32 %v2423_v35, %v5238_v12  ;;  %v2333_v25 = vpack.c.bf16 %v2312_v1, %v2311_v51  ;;  %v1379_v53 = vmul.f32 0.999999, %v5868_v39  ;;  %v1900_v51 = vpop.f32.mrf.mxu2 }
 0x304   : > { %v2059_v55 = vmul.f32 %v5329_v34, %v5329_v34  ;;  %v2186_v45 = vmul.f32 0.7978846, %v2154_v38  ;;  %v3783_v58 = vpop.eup %3782  ;;  %v3280_v37 = vsel %vm2566_vm4, 1.0, %v4216_v52  ;;  %v2501_v4 = vadd.s32 48, %v5241_v3 }
 0x305   : > { %v2662_v0 = vsub.f32 %v2424_v5, %v1410_v41  ;;  %2462 = vmatmul.bf16.gmra.mxu0 %v2333_v25  ;;  %v1411_v13 = vsub.f32 %v5869_v59, %v1379_v53  ;;  %v2249_v24 = vadd.f32 1.0, %v3783_v58  ;;  %v1899_v38 = vadd.f32 %v1898_v61, %v4909_v11 }
 0x306   : > { %v2091_v36 = vmul.f32 %v2059_v55, %v5329_v34  ;;  %3784 = vtanh.f32 %v2186_v45  ;;  %v5870_v25 = vunpack.c.l.bf16 %v4672_v9  ;;  %v2534_v39 = vadd.s32 %v5253_v29, %v2501_v4 }
 0x307   : > { %v2694_v2 = vand.u32 2147483647, %v2662_v0  ;;  %v1984_v16 = vpop.f32.mrf.mxu3  ;;  %v2281_v45 = vmul.f32 0.5, %v2249_v24  ;;  %v3281_v0 = vsel %vm2567_vm5, 1.0, %v4216_v52 }
 0x308   : > { %v2123_v33 = vmul.f32 0.044715, %v2091_v36  ;;  %v1985_v21 = vadd.f32 %v1984_v16, %v1896_v28  ;;  %v1380_v54 = vmul.f32 0.999999, %v5870_v25  ;;  %vm2568_vm6 = vcmp.lt.s32.totalorder %v2534_v39, %v5265_v32 }
 0x309   : > { %v2726_v50 = vmul.f32 %v3280_v37, %v2694_v2  ;;  %v5871_v2 = vunpack.c.l.bf16 %v4669_v8  ;;  %v2313_v40 = vmul.f32 %v2281_v45, %v5292_v17  ;;  %v5873_v39 = vunpack.c.h.bf16 %v4669_v8 }
 0x30a   : > { %v2155_v43 = vadd.f32 %v2123_v33, %v5329_v34  ;;  %v5346_v26 = vadd.f32 %v4933_v14, %v1985_v21  ;;  %v2425_v30 = vpop.f32.mrf.mxu0 }
 0x30b   : > { %v2757_v60 = vadd.f32 %v2756_v19, %v2726_v50  ;;  %v2426_v41 = vadd.f32 %v2425_v30, %v5238_v12  ;;  %v1412_v16 = vsub.f32 %v5871_v2, %v1380_v54  ;;  %v2502_v30 = vadd.s32 56, %v5241_v3 }
 0x30c   : > { %v3785_v1 = vpop.eup %3784  ;;  %v2060_v23 = vmul.f32 %v5346_v26, %v5346_v26  ;;  %v2187_v35 = vmul.f32 0.7978846, %v2155_v43 }
 0x30d   : > { %v2663_v5 = vsub.f32 %v2426_v41, %v1411_v13  ;;  %v2250_v55 = vadd.f32 1.0, %v3785_v1  ;;  %v5872_v1 = vunpack.c.h.bf16 %v4672_v9 }
 0x30e   : > { %v2092_v19 = vmul.f32 %v2060_v23, %v5346_v26  ;;  %3786 = vtanh.f32 %v2187_v35  ;;  %v1901_v35 = vadd.f32 %v1900_v51, %v4909_v11 }
 0x30f   : > { %v2695_v53 = vand.u32 2147483647, %v2663_v5  ;;  %v1987_v58 = vpop.f32.mrf.mxu3  ;;  %v2282_v28 = vmul.f32 0.5, %v2250_v55  ;;  %v3282_v5 = vsel %vm2568_vm6, 1.0, %v4216_v52  ;;  %v2535_v55 = vadd.s32 %v5253_v29, %v2502_v30 }
 0x310   : > { %v2124_v61 = vmul.f32 0.044715, %v2092_v19  ;;  %v1988_v36 = vadd.f32 %v1987_v58, %v1899_v38  ;;  %v1381_v38 = vmul.f32 0.999999, %v5872_v1 }
 0x311   : > { %v2727_v37 = vmul.f32 %v3281_v0, %v2695_v53  ;;  %v2314_v33 = vmul.f32 %v2282_v28, %v5310_v27  ;;  %v1903_v27 = vpop.f32.mrf.mxu2  ;;  %vm2569_vm7 = vcmp.lt.s32.totalorder %v2535_v55, %v5265_v32 }
 0x312   : > { %v2156_v21 = vadd.f32 %v2124_v61, %v5346_v26  ;;  %v5365_v50 = vadd.f32 %v4933_v14, %v1988_v36  ;;  %v2428_v59 = vpop.f32.mrf.mxu0  ;;  %v1413_v53 = vsub.f32 %v5873_v39, %v1381_v38  ;;  %v2503_v61 = vadd.s32 64, %v5241_v3 }
 0x313   : > { %v2758_v13 = vadd.f32 %v2757_v60, %v2727_v37  ;;  %v2429_v24 = vadd.f32 %v2428_v59, %v5238_v12  ;;  %v2334_v43 = vpack.c.bf16 %v2314_v33, %v2313_v40 }
 0x314   : > { %v2061_v4 = vmul.f32 %v5365_v50, %v5365_v50  ;;  %v2188_v17 = vmul.f32 0.7978846, %v2156_v21  ;;  %v3787_v23 = vpop.eup %3786  ;;  %v5874_v21 = vunpack.c.l.bf16 %v4700_v63 }
 0x315   : > { %v2664_v41 = vsub.f32 %v2429_v24, %v1412_v16  ;;  %2467 = vmatmul.bf16.gmra.mxu0 %v2334_v43  ;;  %v2251_v9 = vadd.f32 1.0, %v3787_v23  ;;  %v1904_v16 = vadd.f32 %v1903_v27, %v4909_v11 }
 0x316   : > { %v2093_v60 = vmul.f32 %v2061_v4, %v5365_v50  ;;  %3788 = vtanh.f32 %v2188_v17  ;;  %v1382_v59 = vmul.f32 0.999999, %v5874_v21  ;;  %v2536_v4 = vadd.s32 %v5253_v29, %v2503_v61 }
 0x317   : > { %v2696_v25 = vand.u32 2147483647, %v2664_v41  ;;  %v1989_v54 = vpop.f32.mrf.mxu3  ;;  %v2283_v43 = vmul.f32 0.5, %v2251_v9  ;;  %v2504_v9 = vadd.s32 72, %v5241_v3 }
 0x318   : > { %v2125_v45 = vmul.f32 0.044715, %v2093_v60  ;;  %v1990_v19 = vadd.f32 %v1989_v54, %v1901_v35  ;;  %v5875_v60 = vunpack.c.l.bf16 %v4697_v62  ;;  %vm2570_vm8 = vcmp.lt.s32.totalorder %v2536_v4, %v5265_v32 }
 0x319   : > { %v2728_v0 = vmul.f32 %v3282_v5, %v2696_v25  ;;  %v1905_v41 = vpop.f32.mrf.mxu2  ;;  %v2315_v25 = vmul.f32 %v2283_v43, %v5329_v34 }
 0x31a   : > { %v2157_v58 = vadd.f32 %v2125_v45, %v5365_v50  ;;  %v5382_v51 = vadd.f32 %v4933_v14, %v1990_v19  ;;  %v2430_v28 = vpop.f32.mrf.mxu0  ;;  %v1414_v5 = vsub.f32 %v5875_v60, %v1382_v59 }
 0x31b   : > { %v2759_v36 = vadd.f32 %v2758_v13, %v2728_v0  ;;  %v2431_v37 = vadd.f32 %v2430_v28, %v5238_v12  ;;  %v3283_v13 = vsel %vm2569_vm7, 1.0, %v4216_v52 }
 0x31c   : > { %v3789_v2 = vpop.eup %3788  ;;  %v2062_v8 = vmul.f32 %v5382_v51, %v5382_v51  ;;  %v2189_v40 = vmul.f32 0.7978846, %v2157_v58 }
 0x31d   : > { %v2665_v33 = vsub.f32 %v2431_v37, %v1413_v53  ;;  %v2252_v24 = vadd.f32 1.0, %v3789_v2  ;;  %v1906_v2 = vadd.f32 %v1905_v41, %v4909_v11 }
 0x31e   : > { %v2094_v30 = vmul.f32 %v2062_v8, %v5382_v51  ;;  %3790 = vtanh.f32 %v2189_v40 }
 0x31f   : > { %v2697_v17 = vand.u32 2147483647, %v2665_v33  ;;  %v1992_v1 = vpop.f32.mrf.mxu3  ;;  %v2284_v27 = vmul.f32 0.5, %v2252_v24  ;;  %v2537_v33 = vadd.s32 %v5253_v29, %v2504_v9 }
 0x320   : > { %v2126_v38 = vmul.f32 0.044715, %v2094_v30  ;;  %v1993_v23 = vadd.f32 %v1992_v1, %v1904_v16  ;;  %v5877_v30 = vunpack.c.h.bf16 %v4697_v62  ;;  %v2505_v1 = vadd.s32 80, %v5241_v3 }
 0x321   : > { %v2729_v35 = vmul.f32 %v3283_v13, %v2697_v17  ;;  %v2316_v54 = vmul.f32 %v2284_v27, %v5346_v26  ;;  %v5876_v26 = vunpack.c.h.bf16 %v4700_v63  ;;  %v1908_v43 = vpop.f32.mrf.mxu2  ;;  %vm2571_vm9 = vcmp.lt.s32.totalorder %v2537_v33, %v5265_v32 }
 0x322   : > { %v2158_v55 = vadd.f32 %v2126_v38, %v5382_v51  ;;  %v5401_v45 = vadd.f32 %v4933_v14, %v1993_v23  ;;  %v2433_v19 = vpop.f32.mrf.mxu0 }
 0x323   : > { %v2760_v0 = vadd.f32 %v2759_v36, %v2729_v35  ;;  %v2434_v39 = vadd.f32 %v2433_v19, %v5238_v12  ;;  %v2335_v53 = vpack.c.bf16 %v2316_v54, %v2315_v25  ;;  %v1383_v61 = vmul.f32 0.999999, %v5876_v26 }
 0x324   : > { %v2063_v58 = vmul.f32 %v5401_v45, %v5401_v45  ;;  %v2190_v34 = vmul.f32 0.7978846, %v2158_v55  ;;  %v3791_v37 = vpop.eup %3790  ;;  %v3284_v36 = vsel %vm2570_vm8, 1.0, %v4216_v52  ;;  %v1909_v35 = vadd.f32 %v1908_v43, %v4909_v11 }
 0x325   : > { %v2666_v28 = vsub.f32 %v2434_v39, %v1414_v5  ;;  %2472 = vmatmul.bf16.gmra.mxu0 %v2335_v53  ;;  %v1415_v63 = vsub.f32 %v5877_v30, %v1383_v61  ;;  %v2253_v13 = vadd.f32 1.0, %v3791_v37  ;;  %v5878_v25 = vunpack.c.l.bf16 %v4728_v20 }
 0x326   : > { %v2095_v16 = vmul.f32 %v2063_v58, %v5401_v45  ;;  %3792 = vtanh.f32 %v2190_v34  ;;  %v2538_v53 = vadd.s32 %v5253_v29, %v2505_v1  ;;  %v5879_v37 = vunpack.c.l.bf16 %v4725_v18 }
 0x327   : > { %v2698_v8 = vand.u32 2147483647, %v2666_v28  ;;  %v1994_v40 = vpop.f32.mrf.mxu3  ;;  %v1384_v54 = vmul.f32 0.999999, %v5878_v25  ;;  %v2285_v19 = vmul.f32 0.5, %v2253_v13  ;;  %v2506_v30 = vadd.s32 88, %v5241_v3 }
 0x328   : > { %v2127_v21 = vmul.f32 0.044715, %v2095_v16  ;;  %v1995_v59 = vadd.f32 %v1994_v40, %v1906_v2  ;;  %vm2572_vm10 = vcmp.lt.s32.totalorder %v2538_v53, %v5265_v32  ;;  %v5880_v13 = vunpack.c.h.bf16 %v4728_v20 }
 0x329   : > { %v2730_v24 = vmul.f32 %v3284_v36, %v2698_v8  ;;  %v1416_v2 = vsub.f32 %v5879_v37, %v1384_v54  ;;  %v2317_v16 = vmul.f32 %v2285_v19, %v5365_v50  ;;  %v5881_v54 = vunpack.c.h.bf16 %v4725_v18 }
 0x32a   : > { %v2159_v4 = vadd.f32 %v2127_v21, %v5401_v45  ;;  %v5418_v17 = vadd.f32 %v4933_v14, %v1995_v59  ;;  %v2435_v41 = vpop.f32.mrf.mxu0  ;;  %v1910_v59 = vpop.f32.mrf.mxu2  ;;  %v5882_v18 = vunpack.c.l.bf16 %v4756_v48 }
 0x32b   : > { %v2761_v27 = vadd.f32 %v2760_v0, %v2730_v24  ;;  %v2436_v38 = vadd.f32 %v2435_v41, %v5238_v12  ;;  %v3285_v0 = vsel %vm2571_vm9, 1.0, %v4216_v52  ;;  %v1911_v1 = vadd.f32 %v1910_v59, %v4909_v11 }
 0x32c   : > { %v3793_v23 = vpop.eup %3792  ;;  %v2064_v62 = vmul.f32 %v5418_v17, %v5418_v17  ;;  %v2191_v60 = vmul.f32 0.7978846, %v2159_v4  ;;  %v1385_v4 = vmul.f32 0.999999, %v5880_v13 }
 0x32d   : > { %v2667_v5 = vsub.f32 %v2436_v38, %v1415_v63  ;;  %v2254_v55 = vadd.f32 1.0, %v3793_v23  ;;  %v3286_v38 = vsel %vm2572_vm10, 1.0, %v4216_v52 }
 0x32e   : > { %v2096_v39 = vmul.f32 %v2064_v62, %v5418_v17  ;;  %3794 = vtanh.f32 %v2191_v60  ;;  %v2539_v62 = vadd.s32 %v5253_v29, %v2506_v30 }
 0x32f   : > { %v2699_v9 = vand.u32 2147483647, %v2667_v5  ;;  %v1997_v58 = vpop.f32.mrf.mxu3  ;;  %v2286_v34 = vmul.f32 0.5, %v2254_v55  ;;  %v1417_v55 = vsub.f32 %v5881_v54, %v1385_v4 }
 0x330   : > { %v2128_v28 = vmul.f32 0.044715, %v2096_v39  ;;  %v1998_v26 = vadd.f32 %v1997_v58, %v1909_v35  ;;  %vm2573_vm11 = vcmp.lt.s32.totalorder %v2539_v62, %v5265_v32 }
 0x331   : > { %v2731_v61 = vmul.f32 %v3285_v0, %v2699_v9  ;;  %v2318_v36 = vmul.f32 %v2286_v34, %v5382_v51  ;;  %v2507_v0 = vadd.s32 96, %v5241_v3 }
 0x332   : > { %v2160_v8 = vadd.f32 %v2128_v28, %v5418_v17  ;;  %v5437_v40 = vadd.f32 %v4933_v14, %v1998_v26  ;;  %v2438_v33 = vpop.f32.mrf.mxu0 }
 0x333   : > { %v2762_v21 = vadd.f32 %v2761_v27, %v2731_v61  ;;  %v2439_v24 = vadd.f32 %v2438_v33, %v5238_v12  ;;  %v2336_v43 = vpack.c.bf16 %v2318_v36, %v2317_v16  ;;  %v1386_v61 = vmul.f32 0.999999, %v5882_v18 }
 0x334   : > { %v2065_v50 = vmul.f32 %v5437_v40, %v5437_v40  ;;  %v2192_v63 = vmul.f32 0.7978846, %v2160_v8  ;;  %v3795_v41 = vpop.eup %3794  ;;  %v2540_v36 = vadd.s32 %v5253_v29, %v2507_v0 }
 0x335   : > { %v2668_v51 = vsub.f32 %v2439_v24, %v1416_v2  ;;  %2477 = vmatmul.bf16.gmra.mxu0 %v2336_v43  ;;  %v2255_v20 = vadd.f32 1.0, %v3795_v41  ;;  %v5883_v24 = vunpack.c.l.bf16 %v4753_v47 }
 0x336   : > { %v2097_v27 = vmul.f32 %v2065_v50, %v5437_v40  ;;  %3796 = vtanh.f32 %v2192_v63  ;;  %vm2574_vm12 = vcmp.lt.s32.totalorder %v2540_v36, %v5265_v32 }
 0x337   : > { %v2700_v23 = vand.u32 2147483647, %v2668_v51  ;;  %v1999_v35 = vpop.f32.mrf.mxu3  ;;  %v2287_v2 = vmul.f32 0.5, %v2255_v20  ;;  %v1418_v43 = vsub.f32 %v5883_v24, %v1386_v61  ;;  %v2510_v24 = vadd.s32 120, %v5241_v3 }
 0x338   : > { %v2129_v60 = vmul.f32 0.044715, %v2097_v27  ;;  %v2000_v5 = vadd.f32 %v1999_v35, %v1911_v1  ;;  %v2508_v1 = vadd.s32 104, %v5241_v3 }
 0x339   : > { %v2732_v25 = vmul.f32 %v3286_v38, %v2700_v23  ;;  %v2319_v30 = vmul.f32 %v2287_v2, %v5401_v45  ;;  %v5884_v23 = vunpack.c.h.bf16 %v4756_v48  ;;  %v3288_v45 = vsel %vm2574_vm12, 1.0, %v4216_v52 }
 0x33a   : > { %v2161_v19 = vadd.f32 %v2129_v60, %v5437_v40  ;;  %v2034_v11 = vadd.f32 %v4933_v14, %v2000_v5  ;;  %v2440_v39 = vpop.f32.mrf.mxu0  ;;  %v3287_v14 = vsel %vm2573_vm11, 1.0, %v4216_v52  ;;  %v2541_v60 = vadd.s32 %v5253_v29, %v2508_v1 }
 0x33b   : > { %v2763_v53 = vadd.f32 %v2762_v21, %v2732_v25  ;;  %v2441_v9 = vadd.f32 %v2440_v39, %v5238_v12  ;;  %v1387_v35 = vmul.f32 0.999999, %v5884_v23  ;;  %v5885_v25 = vunpack.c.h.bf16 %v4753_v47 }
 0x33c   : > { %v3797_v58 = vpop.eup %3796  ;;  %v2066_v34 = vmul.f32 %v2034_v11, %v2034_v11  ;;  %v2193_v28 = vmul.f32 0.7978846, %v2161_v19  ;;  %v2509_v19 = vadd.s32 112, %v5241_v3  ;;  %vm2575_vm13 = vcmp.lt.s32.totalorder %v2541_v60, %v5265_v32 }
 0x33d   : > { %v2669_v26 = vsub.f32 %v2441_v9, %v1417_v55  ;;  %v2256_v37 = vadd.f32 1.0, %v3797_v58  ;;  %v1419_v54 = vsub.f32 %v5885_v25, %v1387_v35  ;;  %v5886_v9 = vunpack.c.l.bf16 %v4784_v22 }
 0x33e   : > { %v2098_v16 = vmul.f32 %v2066_v34, %v2034_v11  ;;  %3798 = vtanh.f32 %v2193_v28  ;;  %v2542_v47 = vadd.s32 %v5253_v29, %v2509_v19  ;;  %v5887_v2 = vunpack.c.l.bf16 %v4781_v7 }
 0x33f   : > { %v2701_v8 = vand.u32 2147483647, %v2669_v26  ;;  %v2288_v33 = vmul.f32 0.5, %v2256_v37  ;;  %v1388_v58 = vmul.f32 0.999999, %v5886_v9  ;;  %v3289_v26 = vsel %vm2575_vm13, 1.0, %v4216_v52 }
 0x340   : > { %v2130_v21 = vmul.f32 0.044715, %v2098_v16  ;;  %vm2576_vm14 = vcmp.lt.s32.totalorder %v2542_v47, %v5265_v32 }
 0x341   : > { %v2733_v59 = vmul.f32 %v3287_v14, %v2701_v8  ;;  %v2320_v50 = vmul.f32 %v2288_v33, %v5418_v17  ;;  %v1420_v16 = vsub.f32 %v5887_v2, %v1388_v58 }
 0x342   : > { %v2162_v63 = vadd.f32 %v2130_v21, %v2034_v11  ;;  %v2443_v51 = vpop.f32.mrf.mxu0 }
 0x343   : > { %v2764_v13 = vadd.f32 %v2763_v53, %v2733_v59  ;;  %v2444_v4 = vadd.f32 %v2443_v51, %v5238_v12  ;;  %v2337_v41 = vpack.c.bf16 %v2320_v50, %v2319_v30  ;;  %v5888_v30 = vunpack.c.h.bf16 %v4784_v22 }
 0x344   : > { %v2194_v27 = vmul.f32 0.7978846, %v2162_v63  ;;  %v3799_v62 = vpop.eup %3798  ;;  %v3290_v63 = vsel %vm2576_vm14, 1.0, %v4216_v52  ;;  %v5890_v22 = vunpack.c.l.bf16 %v4812_v49 }
 0x345   : > { %v2670_v38 = vsub.f32 %v2444_v4, %v1418_v43  ;;  %2482 = vmatmul.bf16.gmra.mxu0 %v2337_v41  ;;  %v2257_v55 = vadd.f32 1.0, %v3799_v62  ;;  %v1389_v50 = vmul.f32 0.999999, %v5888_v30 }
 0x346   : > { %3800 = vtanh.f32 %v2194_v27  ;;  %v1390_v35 = vmul.f32 0.999999, %v5890_v22 }
 0x347   : > { %v2702_v17 = vand.u32 2147483647, %v2670_v38  ;;  %v2289_v28 = vmul.f32 0.5, %v2257_v55  ;;  %v2511_v38 = vadd.s32 128, %v5241_v3 }
 0x349   : > { %v2734_v5 = vmul.f32 %v3288_v45, %v2702_v17  ;;  %v2321_v14 = vmul.f32 %v2289_v28, %v5437_v40  ;;  %v2543_v40 = vadd.s32 %v5253_v29, %v2510_v24  ;;  %v2544_v17 = vadd.s32 %v5253_v29, %v2511_v38 }
 0x34a   : > { %v2445_v20 = vpop.f32.mrf.mxu0 }
 0x34b   : > { %v2765_v39 = vadd.f32 %v2764_v13, %v2734_v5  ;;  %v2446_v0 = vadd.f32 %v2445_v20, %v5238_v12  ;;  %v5889_v13 = vunpack.c.h.bf16 %v4781_v7  ;;  %vm2577_vm15 = vcmp.lt.s32.totalorder %v2543_v40, %v5265_v32 }
 0x34c   : > { %v3801_v48 = vpop.eup %3800  ;;  %v3291_v62 = vsel %vm2577_vm15, 1.0, %v4216_v52  ;;  %v5891_v7 = vunpack.c.l.bf16 %v4809_v46  ;;  %vm2578_vm0 = vcmp.lt.s32.totalorder %v2544_v17, %v5265_v32  ;;  %v2512_v20 = vadd.s32 136, %v5241_v3 }
 0x34d   : > { %v2671_v53 = vsub.f32 %v2446_v0, %v1419_v54  ;;  %v2258_v34 = vadd.f32 1.0, %v3801_v48  ;;  %v1421_v4 = vsub.f32 %v5889_v13, %v1389_v50  ;;  %v3292_v48 = vsel %vm2578_vm0, 1.0, %v4216_v52 }
 0x34e   : > { %v1422_v5 = vsub.f32 %v5891_v7, %v1390_v35  ;;  %v2545_v9 = vadd.s32 %v5253_v29, %v2512_v20  ;;  %v5896_v50 = vunpack.c.h.bf16 %v4840_v42 }
 0x34f   : > { %v2703_v18 = vand.u32 2147483647, %v2671_v53  ;;  %v2290_v61 = vmul.f32 0.5, %v2258_v34  ;;  %v5893_v34 = vunpack.c.h.bf16 %v4809_v46  ;;  %v5895_v46 = vunpack.c.l.bf16 %v4837_v6 }
 0x350   : > { %vm2579_vm1 = vcmp.lt.s32.totalorder %v2545_v9, %v5265_v32 }
 0x351   : > { %v2735_v37 = vmul.f32 %v3289_v26, %v2703_v18  ;;  %v2322_v36 = vmul.f32 %v2290_v61, %v2034_v11  ;;  %v2513_v61 = vadd.s32 144, %v5241_v3 }
 0x352   : > { %v2448_v8 = vpop.f32.mrf.mxu0 }
 0x353   : > { %v2766_v33 = vadd.f32 %v2765_v39, %v2735_v37  ;;  %v2449_v21 = vadd.f32 %v2448_v8, %v5238_v12  ;;  %v2338_v59 = vpack.c.bf16 %v2322_v36, %v2321_v14  ;;  %v5892_v39 = vunpack.c.h.bf16 %v4812_v49 }
 0x354   : > { %v5894_v49 = vunpack.c.l.bf16 %v4840_v42  ;;  %v2546_v36 = vadd.s32 %v5253_v29, %v2513_v61  ;;  %v5898_v42 = vunpack.c.l.bf16 %v4870_v31  ;;  %v5901_v61 = vunpack.c.h.bf16 %v4867_v56 }
 0x355   : > { %v2672_v43 = vsub.f32 %v2449_v21, %v1420_v16  ;;  %2487 = vmatmul.bf16.gmra.mxu0 %v2338_v59  ;;  %v1391_v0 = vmul.f32 0.999999, %v5892_v39  ;;  %v3293_v16 = vsel %vm2579_vm1, 1.0, %v4216_v52 }
 0x356   : > { %v1392_v2 = vmul.f32 0.999999, %v5894_v49  ;;  %vm2580_vm2 = vcmp.lt.s32.totalorder %v2546_v36, %v5265_v32  ;;  %v1394_v35 = vmul.f32 0.999999, %v5898_v42  ;;  %v5902_v36 = vunpack.c.l.bf16 %v4902_v57 }
 0x357   : > { %v2704_v51 = vand.u32 2147483647, %v2672_v43  ;;  %v1423_v28 = vsub.f32 %v5893_v34, %v1391_v0  ;;  %v2514_v43 = vadd.s32 152, %v5241_v3  ;;  %v2521_v42 = vadd.s32 208, %v5241_v3 }
 0x359   : > { %v2736_v11 = vmul.f32 %v3290_v63, %v2704_v51  ;;  %v1393_v63 = vmul.f32 0.999999, %v5896_v50  ;;  %v3294_v51 = vsel %vm2580_vm2, 1.0, %v4216_v52 }
 0x35a   : > { %v2450_v41 = vpop.f32.mrf.mxu0 }
 0x35b   : > { %v2767_v1 = vadd.f32 %v2766_v33, %v2736_v11  ;;  %v2451_v27 = vadd.f32 %v2450_v41, %v5238_v12  ;;  %v1424_v33 = vsub.f32 %v5895_v46, %v1392_v2  ;;  %v2547_v11 = vadd.s32 %v5253_v29, %v2514_v43 }
 0x35c   : > { %v2518_v46 = vadd.s32 184, %v5241_v3 }
 0x35d   : > { %v2673_v23 = vsub.f32 %v2451_v27, %v1421_v4  ;;  %v5897_v4 = vunpack.c.h.bf16 %v4837_v6  ;;  %vm2581_vm3 = vcmp.lt.s32.totalorder %v2547_v11, %v5265_v32  ;;  %v5899_v6 = vunpack.c.l.bf16 %v4867_v56 }
 0x35e   : > { %v2551_v50 = vadd.s32 %v5253_v29, %v2518_v46 }
 0x35f   : > { %v2705_v45 = vand.u32 2147483647, %v2673_v23  ;;  %v1425_v41 = vsub.f32 %v5897_v4, %v1393_v63  ;;  %v2515_v23 = vadd.s32 160, %v5241_v3  ;;  %v1426_v7 = vsub.f32 %v5899_v6, %v1394_v35  ;;  %v5905_v63 = vld [vmem:[#allocation45_spill] sm:$0xff]  ;;  %v5911_v6 = vld [vmem:[#allocation47_spill] sm:$0xff] }
 0x360   : > { %v5907_v4 = vunpack.c.h.bf16 %v4899_v10  ;;  %vm2585_vm7 = vcmp.lt.s32.totalorder %v2551_v50, %v5265_v32 }
 0x361   : > { %v2737_v60 = vmul.f32 %v3291_v62, %v2705_v45  ;;  %v3295_v62 = vsel %vm2581_vm3, 1.0, %v4216_v52  ;;  %v2548_v17 = vadd.s32 %v5253_v29, %v2515_v23 }
 0x362   : > { %v2453_v25 = vpop.f32.mrf.mxu0 }
 0x363   : > { %v2768_v54 = vadd.f32 %v2767_v1, %v2737_v60  ;;  %v2454_v55 = vadd.f32 %v2453_v25, %v5238_v12  ;;  %vm2582_vm4 = vcmp.lt.s32.totalorder %v2548_v17, %v5265_v32 }
 0x364   : > { %v3296_v20 = vsel %vm2582_vm4, 1.0, %v4216_v52 }
 0x365   : > { %v2674_v19 = vsub.f32 %v2454_v55, %v1422_v5 }
 0x367   : > { %v2706_v53 = vand.u32 2147483647, %v2674_v19 }
 0x369   : > { %v2738_v58 = vmul.f32 %v3292_v48, %v2706_v53 }
 0x36a   : > { %v2455_v26 = vpop.f32.mrf.mxu0 }
 0x36b   : > { %v2769_v47 = vadd.f32 %v2768_v54, %v2738_v58  ;;  %v2456_v18 = vadd.f32 %v2455_v26, %v5238_v12  ;;  %v5900_v26 = vunpack.c.h.bf16 %v4870_v31  ;;  %v2519_v31 = vadd.s32 192, %v5241_v3 }
 0x36d   : > { %v2675_v37 = vsub.f32 %v2456_v18, %v1423_v28  ;;  %v2516_v18 = vadd.s32 168, %v5241_v3  ;;  %v2552_v11 = vadd.s32 %v5253_v29, %v2519_v31 }
 0x36f   : > { %v2707_v14 = vand.u32 2147483647, %v2675_v37  ;;  %vm2586_vm8 = vcmp.lt.s32.totalorder %v2552_v11, %v5265_v32  ;;  %v5921_v11 = vld [vmem:[#allocation48_spill] sm:$0xff] }
 0x371   : > { %v2739_v8 = vmul.f32 %v3293_v16, %v2707_v14  ;;  %v2549_v16 = vadd.s32 %v5253_v29, %v2516_v18  ;;  %v2517_v14 = vadd.s32 176, %v5241_v3 }
 0x372   : > { %v2458_v21 = vpop.f32.mrf.mxu0 }
 0x373   : > { %v2770_v59 = vadd.f32 %v2769_v47, %v2739_v8  ;;  %v2459_v24 = vadd.f32 %v2458_v21, %v5238_v12  ;;  %v1395_v47 = vmul.f32 0.999999, %v5900_v26  ;;  %v1396_v8 = vmul.f32 0.999999, %v5902_v36 }
 0x374   : > { %v5903_v21 = vunpack.c.h.bf16 %v4902_v57  ;;  %vm2583_vm5 = vcmp.lt.s32.totalorder %v2549_v16, %v5265_v32  ;;  %v2550_v56 = vadd.s32 %v5253_v29, %v2517_v14  ;;  %v5917_v14 = vld [vmem:[#allocation49_spill] sm:$0xff] }
 0x375   : > { %v2676_v30 = vsub.f32 %v2459_v24, %v1424_v33  ;;  %v1427_v37 = vsub.f32 %v5901_v61, %v1395_v47  ;;  %v5904_v24 = vunpack.c.l.bf16 %v4899_v10  ;;  %v3300_v47 = vsel %vm2586_vm8, 1.0, %v4216_v52 }
 0x376   : > { %vm2584_vm6 = vcmp.lt.s32.totalorder %v2550_v56, %v5265_v32  ;;  %v2522_v61 = vadd.s32 216, %v5241_v3  ;;  %v5918_v36 = vunpack.c.l.bf16 %v5917_v14 }
 0x377   : > { %v2708_v40 = vand.u32 2147483647, %v2676_v30  ;;  %v1428_v43 = vsub.f32 %v5904_v24, %v1396_v8 }
 0x378   : > { %v1402_v8 = vmul.f32 0.999999, %v5918_v36 }
 0x379   : > { %v2740_v13 = vmul.f32 %v3294_v51, %v2708_v40  ;;  %v5906_v51 = vunpack.c.l.bf16 %v5905_v63 }
 0x37a   : > { %v2460_v1 = vpop.f32.mrf.mxu0 }
 0x37b   : > { %v2771_v27 = vadd.f32 %v2770_v59, %v2740_v13  ;;  %v2461_v38 = vadd.f32 %v2460_v1, %v5238_v12  ;;  %v1397_v59 = vmul.f32 0.999999, %v5903_v21  ;;  %v1398_v40 = vmul.f32 0.999999, %v5906_v51 }
 0x37c   : > { %v2520_v13 = vadd.s32 200, %v5241_v3  ;;  %v2523_v21 = vadd.s32 224, %v5241_v3  ;;  %v2555_v51 = vadd.s32 %v5253_v29, %v2522_v61 }
 0x37d   : > { %v2677_v22 = vsub.f32 %v2461_v38, %v1425_v41  ;;  %v1429_v41 = vsub.f32 %v5907_v4, %v1397_v59 }
 0x37e   : > { %vm2589_vm11 = vcmp.lt.s32.totalorder %v2555_v51, %v5265_v32 }
 0x37f   : > { %v2709_v45 = vand.u32 2147483647, %v2677_v22  ;;  %v3297_v22 = vsel %vm2583_vm5, 1.0, %v4216_v52 }
 0x381   : > { %v2741_v60 = vmul.f32 %v3295_v62, %v2709_v45  ;;  %v5909_v62 = vld [vmem:[#allocation44_spill] sm:$0xff] }
 0x382   : > { %v2463_v5 = vpop.f32.mrf.mxu0  ;;  %v5910_v45 = vunpack.c.l.bf16 %v5909_v62 }
 0x383   : > { %v2772_v25 = vadd.f32 %v2771_v27, %v2741_v60  ;;  %v2464_v54 = vadd.f32 %v2463_v5, %v5238_v12  ;;  %v5908_v27 = vunpack.c.h.bf16 %v5905_v63  ;;  %v2553_v60 = vadd.s32 %v5253_v29, %v2520_v13 }
 0x384   : > { %v1430_v17 = vsub.f32 %v5910_v45, %v1398_v40  ;;  %v5922_v13 = vunpack.c.l.bf16 %v5921_v11 }
 0x385   : > { %v2678_v55 = vsub.f32 %v2464_v54, %v1426_v7  ;;  %v1399_v38 = vmul.f32 0.999999, %v5908_v27  ;;  %v5912_v7 = vunpack.c.l.bf16 %v5911_v6  ;;  %vm2587_vm9 = vcmp.lt.s32.totalorder %v2553_v60, %v5265_v32 }
 0x386   : > { %v5925_v60 = vunpack.c.l.bf16 %v5096_v15 }
 0x387   : > { %v2710_v19 = vand.u32 2147483647, %v2678_v55  ;;  %v1400_v5 = vmul.f32 0.999999, %v5912_v7  ;;  %v5913_v55 = vunpack.c.h.bf16 %v5909_v62  ;;  %v5924_v62 = vunpack.c.h.bf16 %v5921_v11 }
 0x389   : > { %v2742_v39 = vmul.f32 %v3296_v20, %v2710_v19  ;;  %v1431_v20 = vsub.f32 %v5913_v55, %v1399_v38  ;;  %v2556_v38 = vadd.s32 %v5253_v29, %v2523_v21 }
 0x38a   : > { %v2465_v0 = vpop.f32.mrf.mxu0 }
 0x38b   : > { %v2773_v48 = vadd.f32 %v2772_v25, %v2742_v39  ;;  %v2466_v49 = vadd.f32 %v2465_v0, %v5238_v12  ;;  %v3298_v39 = vsel %vm2584_vm6, 1.0, %v4216_v52  ;;  %v3299_v0 = vsel %vm2585_vm7, 1.0, %v4216_v52 }
 0x38c   : > { %vm2590_vm12 = vcmp.lt.s32.totalorder %v2556_v38, %v5265_v32 }
 0x38d   : > { %v2679_v33 = vsub.f32 %v2466_v49, %v1427_v37  ;;  %v5915_v37 = vld [vmem:[#allocation46_spill] sm:$0xff] }
 0x38e   : > { %v5916_v49 = vunpack.c.l.bf16 %v5915_v37  ;;  %v5919_v56 = vunpack.c.h.bf16 %v5915_v37 }
 0x38f   : > { %v2711_v57 = vand.u32 2147483647, %v2679_v33 }
 0x391   : > { %v2743_v25 = vmul.f32 %v3297_v22, %v2711_v57  ;;  %v1434_v57 = vsub.f32 %v5922_v13, %v1402_v8  ;;  %v2525_v22 = vadd.s32 240, %v5241_v3 }
 0x392   : > { %v2468_v53 = vpop.f32.mrf.mxu0 }
 0x393   : > { %v2469_v30 = vadd.f32 %v2468_v53, %v5238_v12  ;;  %v2554_v53 = vadd.s32 %v5253_v29, %v2521_v42  ;;  %v2774_v46 = vadd.f32 %v2773_v48, %v2743_v25  ;;  %v2524_v48 = vadd.s32 232, %v5241_v3 }
 0x394   : > { %v3301_v42 = vsel %vm2587_vm9, 1.0, %v4216_v52 }
 0x395   : > { %v2680_v35 = vsub.f32 %v2469_v30, %v1428_v43  ;;  %vm2588_vm10 = vcmp.lt.s32.totalorder %v2554_v53, %v5265_v32  ;;  %v5920_v30 = vunpack.c.h.bf16 %v5917_v14  ;;  %v2557_v7 = vadd.s32 %v5253_v29, %v2524_v48 }
 0x396   : > { %v3304_v14 = vsel %vm2590_vm12, 1.0, %v4216_v52 }
 0x397   : > { %v2712_v26 = vand.u32 2147483647, %v2680_v35  ;;  %v1403_v50 = vmul.f32 0.999999, %v5920_v30  ;;  %vm2591_vm13 = vcmp.lt.s32.totalorder %v2557_v7, %v5265_v32 }
 0x399   : > { %v1435_v45 = vsub.f32 %v5924_v62, %v1403_v50 }
 0x39a   : > { %v2470_v9 = vpop.f32.mrf.mxu0 }
 0x39b   : > { %v2471_v1 = vadd.f32 %v2470_v9, %v5238_v12  ;;  %v5914_v9 = vunpack.c.h.bf16 %v5911_v6  ;;  %v3302_v6 = vsel %vm2588_vm10, 1.0, %v4216_v52 }
 0x39d   : > { %v2681_v54 = vsub.f32 %v2471_v1, %v1429_v41  ;;  %v5923_v41 = vunpack.c.l.bf16 %v5099_v44 }
 0x39f   : > { %v2713_v31 = vand.u32 2147483647, %v2681_v54  ;;  %v1404_v1 = vmul.f32 0.999999, %v5923_v41 }
 0x3a1   : > { %v2745_v27 = vmul.f32 %v3299_v0, %v2713_v31  ;;  %v1436_v54 = vsub.f32 %v5925_v60, %v1404_v1 }
 0x3a2   : > { %v2473_v58 = vpop.f32.mrf.mxu0 }
 0x3a3   : > { %v2474_v10 = vadd.f32 %v2473_v58, %v5238_v12  ;;  %v1401_v58 = vmul.f32 0.999999, %v5914_v9 }
 0x3a5   : > { %v2682_v18 = vsub.f32 %v2474_v10, %v1430_v17  ;;  %v1433_v24 = vsub.f32 %v5919_v56, %v1401_v58  ;;  %v2526_v58 = vadd.s32 248, %v5241_v3 }
 0x3a7   : > { %v2714_v63 = vand.u32 2147483647, %v2682_v18  ;;  %v2559_v3 = vadd.s32 %v5253_v29, %v2526_v58 }
 0x3a9   : > { %v2746_v10 = vmul.f32 %v3300_v47, %v2714_v63  ;;  %v3303_v47 = vsel %vm2589_vm11, 1.0, %v4216_v52  ;;  %vm2593_vm15 = vcmp.lt.s32.totalorder %v2559_v3, %v5265_v32 }
 0x3aa   : > { %v2475_v34 = vpop.f32.mrf.mxu0  ;;  %v3307_v51 = vsel %vm2593_vm15, 1.0, %v4216_v52 }
 0x3ab   : > { %v2476_v19 = vadd.f32 %v2475_v34, %v5238_v12  ;;  %v1432_v34 = vsub.f32 %v5916_v49, %v1400_v5  ;;  %v5926_v49 = vunpack.c.h.bf16 %v5099_v44 }
 0x3ad   : > { %v2683_v33 = vsub.f32 %v2476_v19, %v1431_v20 }
 0x3b2   : > { %v2478_v28 = vpop.f32.mrf.mxu0 }
 0x3b3   : > { %v2479_v16 = vadd.f32 %v2478_v28, %v5238_v12  ;;  %v2744_v28 = vmul.f32 %v3298_v39, %v2712_v26  ;;  %v2558_v39 = vadd.s32 %v5253_v29, %v2525_v22 }
 0x3b5   : > { %v2684_v40 = vsub.f32 %v2479_v16, %v1432_v34  ;;  %v1405_v34 = vmul.f32 0.999999, %v5926_v49  ;;  %vm2592_vm14 = vcmp.lt.s32.totalorder %v2558_v39, %v5265_v32 }
 0x3b6   : > { %v3306_v44 = vsel %vm2592_vm14, 1.0, %v4216_v52 }
 0x3b7   : > { %v2716_v5 = vand.u32 2147483647, %v2684_v40 }
 0x3b9   : > { %v2748_v18 = vmul.f32 %v3302_v6, %v2716_v5 }
 0x3ba   : > { %v2480_v2 = vpop.f32.mrf.mxu0 }
 0x3bb   : > { %v2481_v43 = vadd.f32 %v2480_v2, %v5238_v12  ;;  %v2715_v2 = vand.u32 2147483647, %v2683_v33 }
 0x3bd   : > { %v2685_v35 = vsub.f32 %v2481_v43, %v1433_v24  ;;  %v2747_v20 = vmul.f32 %v3301_v42, %v2715_v2 }
 0x3bf   : > { %v2717_v0 = vand.u32 2147483647, %v2685_v35 }
 0x3c1   : > { %v2749_v36 = vmul.f32 %v3303_v47, %v2717_v0 }
 0x3c2   : > { %v2483_v23 = vpop.f32.mrf.mxu0 }
 0x3c3   : > { %v2484_v4 = vadd.f32 %v2483_v23, %v5238_v12  ;;  %v2775_v23 = vadd.f32 %v2774_v46, %v2744_v28  ;;  %v3305_v46 = vsel %vm2591_vm13, 1.0, %v4216_v52 }
 0x3c5   : > { %v2686_v25 = vsub.f32 %v2484_v4, %v1434_v57  ;;  %v2776_v55 = vadd.f32 %v2775_v23, %v2745_v27 }
 0x3c7   : > { %v2777_v26 = vadd.f32 %v2776_v55, %v2746_v10  ;;  %v2718_v61 = vand.u32 2147483647, %v2686_v25 }
 0x3c9   : > { %v2778_v16 = vadd.f32 %v2777_v26, %v2747_v20  ;;  %v2750_v33 = vmul.f32 %v3304_v14, %v2718_v61 }
 0x3ca   : > { %v2485_v59 = vpop.f32.mrf.mxu0 }
 0x3cb   : > { %v2486_v17 = vadd.f32 %v2485_v59, %v5238_v12  ;;  %v2779_v31 = vadd.f32 %v2778_v16, %v2748_v18  ;;  %v5927_v59 = vunpack.c.h.bf16 %v5096_v15  ;;  %v2785_v15 = vld [vmem:[#allocation2] sm:$0xff] }
 0x3cd   : > { %v2687_v9 = vsub.f32 %v2486_v17, %v1435_v45  ;;  %v1437_v56 = vsub.f32 %v5927_v59, %v1405_v34  ;;  %v2780_v43 = vadd.f32 %v2779_v31, %v2749_v36 }
 0x3cf   : > { %v2719_v8 = vand.u32 2147483647, %v2687_v9  ;;  %v2781_v28 = vadd.f32 %v2780_v43, %v2750_v33 }
 0x3d1   : > { %v2751_v30 = vmul.f32 %v3305_v46, %v2719_v8 }
 0x3d2   : > { %v2488_v19 = vpop.f32.mrf.mxu0 }
 0x3d3   : > { %v2489_v53 = vadd.f32 %v2488_v19, %v5238_v12  ;;  %v2782_v48 = vadd.f32 %v2781_v28, %v2751_v30 }
 0x3d5   : > { %v2688_v37 = vsub.f32 %v2489_v53, %v1436_v54 }
 0x3d7   : > { %v2720_v21 = vand.u32 2147483647, %v2688_v37 }
 0x3d9   : > { %v2752_v63 = vmul.f32 %v3306_v44, %v2720_v21 }
 0x3da   : > { %v2490_v24 = vpop.f32.mrf.mxu0 }
 0x3db   : > { %v2491_v50 = vadd.f32 %v2490_v24, %v5238_v12  ;;  %v2783_v11 = vadd.f32 %v2782_v48, %v2752_v63 }
 0x3dd   : > { %v2689_v29 = vsub.f32 %v2491_v50, %v1437_v56 }
 0x3df   : > { %v2721_v40 = vand.u32 2147483647, %v2689_v29 }
 0x3e1   : > { %v2753_v13 = vmul.f32 %v3307_v51, %v2721_v40 }
 0x3e3   : > { %v2784_v57 = vadd.f32 %v2783_v11, %v2753_v13  ;;  %2791 = sbr.rel (%p3308_p1) target bundleno = 1008 (0x3f0), region = 112 }
 0x3e5   : > { %v2786_v4 = vadd.f32 %v2785_v15, %v2784_v57 }
 0x3e7   : > { %2787 = vst [vmem:[#allocation2] sm:$0xff] %v2786_v4 }
 0x3ee   : > { %v2792_v41 = vld [vmem:[#allocation2] sm:$0xff] }
 0x3ef   : > { %2793 = vst [vmem:[%s617_s4] sm:$0xff] %v2792_v41 }
 0x3f0 PF: > { %s5928_s24 = sld [smem:[#allocation34_spill]]  ;;  %s2807_s21 = sshll.u32 %s617_s4, 4  ;;  %s2808_s21 = int_to_ptr.vmem [resolvable:$true] %s2807_s21 }
 0x3f1   : > { %s5929_s29 = sld [smem:[#allocation55_spill]]  ;;  %s2795_s25 = scalar_lea.sflag [#allocation5], %s615_s26 }
 0x3f6   : > { %s3310_s20 = sshll.u32 %s5928_s24, 3 }
 0x3f7   : > { %s2805_s12 = scalar_lea.hbm %s5929_s29, %s3310_s20  ;;  %s4078_s13 = scalar_lea.hbm %s5929_s29, 16 }
 0x3f8   : > { %s2809_s23 = sshll.u32 %s2805_s12, 4  ;;  %s2810_s23 = int_to_ptr.hbm [resolvable:$true] %s2809_s23 }
 0x3f9   : > { %s4072_s27 = sshra.s32 %s2810_s23, 4  ;;  %s4073_s27 = int_to_ptr.hbm [resolvable:$true] %s4072_s27 }
 0x3fa   : > { %s4074_s19 = scalar_lea.hbm %s4073_s27, 8  ;;  %p4079_p0 = scmp.lt.s32.totalorder %s4073_s27, %s5929_s29 }
 0x3fb   : > { %p4075_p5 = scmp.ne.s32.totalorder %s4073_s27, %s4074_s19  ;;  %p4080_p2 = scmp.lt.s32.totalorder %s4078_s13, %s4074_s19 }
 0x3fd   : > { %p4076_p11 = pnand %p4075_p5, %p4398_p6  ;;  %p4081_p4 = por %p4080_p2, %p4079_p0 }
 0x3ff   : > { %p4077_p12 = pneg %p4076_p11 }
 0x401   : > { %p4082_p7 = pnand %p4081_p4, %p4077_p12 }
 0x403   : > { %4085 = shalt.err (!%p4082_p7)
}
 0x404   : > { %3585 = dma.vmem_to_hbm [thread:$0]  (%p4398_p6), %s2808_s21, 128, %s2810_s23, %s2795_s25  }
 0x405 PF: > { %s5930_s26 = sld [smem:[#allocation37_spill]] }
 0x406   : > { %s5931_s14 = sld [smem:[#allocation30_spill]] }
 0x40b   : > { %p3638_p8 = scmp.ge.s32.totalorder %s5930_s26, 2 }
 0x40c   : > { %s2821_s28 = sand.u32 1, %s5931_s14  }
 0x40d   : > { %p3620_p9 = pnand %p3638_p8, %p4412_p10  ;;  %s2822_s11 = scalar_lea.sflag [#allocation5], %s2821_s28 }
 0x40f   : > { %p3621_p13 = pneg %p3620_p9 }
 0x411   : > { %4159 = dma.done.wait (%p3621_p13), %s2822_s11, 128  }
 0x412   : > { %4161 = vsyncadd (%p3621_p13), %s2822_s11, 4294967168  ;;  %s35_s27 = sadd.s32 1, %s5930_s26   ;;  %s5933_s24 = sld [smem:[#allocation31_spill]] }
 0x413   : > { %p32_p3 = scmp.ge.s32.totalorder %s35_s27, 6   ;;  %s5934_s19 = sld [smem:[#allocation41_spill]] }
 0x414   : > { %s5935_s20 = sld [smem:[#allocation32_spill]]  ;;  %s5941_s17 = smov %s4168_s18 }
 0x415   : > { %s5936_s16 = sld [smem:[#allocation42_spill]]  ;;  %s5943_s21 = smov %s4184_s22 }
 0x416   : > { %s5937_s23 = sld [smem:[#allocation35_spill]] }
 0x417   : > { %s5938_s15 = sld [smem:[#allocation36_spill]] }
 0x418   : > { %s5939_s25 = sld [smem:[#allocation38_spill]]  ;;  %s5942_s18 = smov %s5933_s24 }
 0x419   : > { %s5940_s26 = sld [smem:[#allocation39_spill]]  ;;  %34 = sbr.rel (!%p32_p3) target bundleno = 23 (0x17), region = 171 }
 0x41b   : > { %s5944_s22 = smov %s5936_s16 }
 0x41d   : > { %s5945_s24 = smov %s5938_s15 }
 0x41e   :  { %2828 = vsyncpa [#allocation4], 1 }
 0x41f   :  { %2830 = vsyncpa [#allocation4 + $0x1], 1 }
 0x420   :  { %2831 = vsyncpa [#allocation13], 1 }
 0x421   :  { %2833 = vsyncpa [#allocation13 + $0x1], 1 }
 0x422   :  { %2834 = vsyncpa [#allocation16], 1 }
 0x423   :  { %2835 = vsyncpa [#allocation19], 1 }
 0x424   :  { %2836 = vsyncpa [#allocation5], 1 }
 0x425   :  { %2838 = vsyncpa [#allocation5 + $0x1], 1 }
 0x426   :  { %2839 = vsyncpa [#allocation6], 1 }
 0x427   :  { %2841 = vsyncpa [#allocation6 + $0x1], 1 }
 0x428   :  { %2842 = vsyncpa [#allocation9], 1 }
 0x429   :  { %2843 = vsyncpa [#allocation7], 1 }
 0x42a   :  { %2845 = vsyncpa [#allocation7 + $0x1], 1 }

</bundles_post_ra>
